<compile_context>
chip_gen: v7x
topology: tpu7x:2x2x1
jax: 0.10.0
libtpu: 0.0.40
codegen_flags: <defaults>
</compile_context>

<pallas_src>
import functools

import jax
import jax.numpy as jnp
from jax.experimental import pallas as pl
from jax.experimental.pallas import tpu as pltpu

EPS = 1e-5
MAX_TM = 512      # row tile for conv matmuls: pipelines DMA, fits v7x 64 MiB VMEM
FC3_PAD = 128     # fc3 output lane-padded to a full vreg width; sliced to 1 in JAX


# ----------------------------- Pallas kernels -----------------------------

def _matmul_shift_kernel(a_ref, b_ref, shift_ref, o_ref, *, act):
    """o = act(a @ b + shift); BN scale is pre-folded into b's columns."""
    y = jnp.dot(a_ref[...], b_ref[...], preferred_element_type=jnp.float32)
    y = y + shift_ref[...]
    if act == "relu":
        y = jnp.maximum(y, 0.0)
    o_ref[...] = y


def matmul_shift(a_bf16, b_bf16, shift, act="relu"):
    """Row-tiled matmul + per-column shift + activation.

    a: (M, K) bf16, b: (K, N) bf16 (BN scale folded in), shift: (1, N) f32.
    The M axis is tiled and marked "parallel" so the kernel double-buffers its
    DMAs and can be sharded across TensorCores on megacore parts (v7x).
    """
    M, K = a_bf16.shape
    _, N = b_bf16.shape
    tm = M if M <= MAX_TM else MAX_TM
    return pl.pallas_call(
        functools.partial(_matmul_shift_kernel, act=act),
        out_shape=jax.ShapeDtypeStruct((M, N), jnp.float32),
        grid=(pl.cdiv(M, tm),),
        in_specs=[
            pl.BlockSpec((tm, K), lambda i: (i, 0)),
            pl.BlockSpec((K, N), lambda i: (0, 0)),
            pl.BlockSpec((1, N), lambda i: (0, 0)),
        ],
        out_specs=pl.BlockSpec((tm, N), lambda i: (i, 0)),
        compiler_params=pltpu.CompilerParams(
            dimension_semantics=("parallel",)),
    )(a_bf16, b_bf16, shift)


def _maxpool_kernel(x_ref, o_ref, *, c):
    """2x2 max pool; x block is (rows, 2, Wh, 2*C): (row-pair, Wh, col-pair*C)."""
    a = x_ref[:, 0, :, 0:c]
    b = x_ref[:, 0, :, c:2 * c]
    d = x_ref[:, 1, :, 0:c]
    e = x_ref[:, 1, :, c:2 * c]
    o_ref[...] = jnp.maximum(jnp.maximum(a, b), jnp.maximum(d, e))


def maxpool2x2_flat(y_flat, n, ho, wo, c):
    """MaxPool2d(2) on a conv output given as (n*ho*wo, c) rows in (n,h,w) order.

    The input is only *reshaped* (no data movement) to (n*ho/2, 2, wo/2, 2*c),
    so one Pallas kernel reads the conv output exactly once and writes the
    pooled (n, ho/2, wo/2, c) result — no XLA-materialized strided slices.
    """
    hh, wh = ho // 2, wo // 2
    r = n * hh
    x = y_flat.reshape(r, 2, wh, 2 * c)
    tr = r if r <= 256 else 256
    out = pl.pallas_call(
        functools.partial(_maxpool_kernel, c=c),
        out_shape=jax.ShapeDtypeStruct((r, wh, c), jnp.float32),
        grid=(pl.cdiv(r, tr),),
        in_specs=[pl.BlockSpec((tr, 2, wh, 2 * c), lambda i: (i, 0, 0, 0))],
        out_specs=pl.BlockSpec((tr, wh, c), lambda i: (i, 0, 0)),
        compiler_params=pltpu.CompilerParams(
            dimension_semantics=("parallel",)),
    )(x)
    return out.reshape(n, hh, wh, c)


def _head_kernel(x_ref, w1_ref, s1_ref, w2_ref, s2_ref, w3_ref, s3_ref, o_ref):
    """AdaptiveAvgPool2d((1,1)) + fc1/bn4/relu + fc2/bn5/relu + fc3 + sigmoid."""
    xm = jnp.mean(x_ref[...], axis=1)                          # (N, 256) avg pool
    h = jnp.dot(xm.astype(jnp.bfloat16), w1_ref[...],
                preferred_element_type=jnp.float32) + s1_ref[...]
    h = jnp.maximum(h, 0.0)
    h = jnp.dot(h.astype(jnp.bfloat16), w2_ref[...],
                preferred_element_type=jnp.float32) + s2_ref[...]
    h = jnp.maximum(h, 0.0)
    h = jnp.dot(h.astype(jnp.bfloat16), w3_ref[...],
                preferred_element_type=jnp.float32) + s3_ref[...]
    o_ref[...] = 1.0 / (1.0 + jnp.exp(-h))


def fused_head(x_pooled, p):
    """(N, Hh, Wh, 256) -> (N, 1): one kernel for avgpool + all FC layers."""
    n, hh, wh, c = x_pooled.shape
    xf = x_pooled.reshape(n, hh * wh, c)
    w1, s1 = p["fc1_w"], p["fc1_shift"]
    w2, s2 = p["fc2_w"], p["fc2_shift"]
    w3, s3 = p["fc3_w"], p["fc3_shift"]
    out = pl.pallas_call(
        _head_kernel,
        out_shape=jax.ShapeDtypeStruct((n, FC3_PAD), jnp.float32),
        grid=(1,),
        in_specs=[
            pl.BlockSpec((n, hh * wh, c), lambda i: (0, 0, 0)),
            pl.BlockSpec(w1.shape, lambda i: (0, 0)),
            pl.BlockSpec(s1.shape, lambda i: (0, 0)),
            pl.BlockSpec(w2.shape, lambda i: (0, 0)),
            pl.BlockSpec(s2.shape, lambda i: (0, 0)),
            pl.BlockSpec(w3.shape, lambda i: (0, 0)),
            pl.BlockSpec(s3.shape, lambda i: (0, 0)),
        ],
        out_specs=pl.BlockSpec((n, FC3_PAD), lambda i: (0, 0)),
    )(xf, w1, s1, w2, s2, w3, s3)
    return out[:, :1]          # fc3 has one real output column (lane-padded)


# ------------------------------- JAX glue ---------------------------------

def im2col(x, kh, kw):
    """x: (N, H, W, C) -> (N*Ho*Wo, kh*kw*C); patch feature order (i, j, c)."""
    N, H, W, C = x.shape
    Ho, Wo = H - kh + 1, W - kw + 1
    patches = [x[:, i:i + Ho, j:j + Wo, :] for i in range(kh) for j in range(kw)]
    flat = jnp.concatenate(patches, axis=-1).reshape(N * Ho * Wo, kh * kw * C)
    return flat, (N, Ho, Wo)


def conv_bn_relu_pool(x, w_bf16, shift):
    """3x3 valid conv + folded BN + ReLU + MaxPool2d(2), NHWC in/out."""
    patches, (n, ho, wo) = im2col(x, 3, 3)
    y = matmul_shift(patches.astype(jnp.bfloat16), w_bf16, shift, act="relu")
    return maxpool2x2_flat(y, n, ho, wo, w_bf16.shape[1])


def _conv_weight_to_mat(w):
    """PyTorch (Cout, Cin, kh, kw) -> (kh*kw*Cin, Cout) matching im2col order."""
    cout, cin, kh, kw = w.shape
    return jnp.transpose(w, (2, 3, 1, 0)).reshape(kh * kw * cin, cout)


def _bn_stats(key, c):
    k0, k1, k2, k3 = jax.random.split(key, 4)
    gamma = 1.0 + 0.1 * jax.random.normal(k0, (c,), jnp.float32)
    beta = 0.1 * jax.random.normal(k1, (c,), jnp.float32)
    mean = 0.1 * jax.random.normal(k2, (c,), jnp.float32)
    var = 1.0 + 0.2 * jax.random.uniform(k3, (c,), jnp.float32)
    return gamma, beta, mean, var


def _fold_bn_into(w_mat, bias, gamma, beta, mean, var):
    """Fold layer bias + eval-mode BN: scale folded into weight columns."""
    scale = gamma / jnp.sqrt(var + EPS)
    shift = beta + (bias - mean) * scale
    w_folded = (w_mat * scale[None, :]).astype(jnp.bfloat16)
    return w_folded, shift.reshape(1, -1).astype(jnp.float32)


def init_params(key):
    keys = jax.random.split(key, 12)
    p = {}

    # conv1: 3 -> 32, k=3   (+ batch1)
    w = 0.1 * jax.random.normal(keys[0], (32, 3, 3, 3), jnp.float32)
    b = 0.05 * jax.random.normal(keys[1], (32,), jnp.float32)
    p["conv1_w"], p["conv1_shift"] = _fold_bn_into(
        _conv_weight_to_mat(w), b, *_bn_stats(keys[2], 32))

    # conv2: 64 -> 128, k=3 (+ batch2)
    w = 0.05 * jax.random.normal(keys[3], (128, 64, 3, 3), jnp.float32)
    b = 0.05 * jax.random.normal(keys[4], (128,), jnp.float32)
    p["conv2_w"], p["conv2_shift"] = _fold_bn_into(
        _conv_weight_to_mat(w), b, *_bn_stats(keys[5], 128))

    # conv3: 128 -> 256, k=3 (+ batch3, treated per-channel; see TODO above)
    w = 0.05 * jax.random.normal(keys[6], (256, 128, 3, 3), jnp.float32)
    b = 0.05 * jax.random.normal(keys[7], (256,), jnp.float32)
    p["conv3_w"], p["conv3_shift"] = _fold_bn_into(
        _conv_weight_to_mat(w), b, *_bn_stats(keys[8], 256))

    # fc1: 256 -> 128 (+ batch4), fc2: 128 -> 64 (+ batch5), fc3: 64 -> 1
    kf = jax.random.split(keys[9], 6)
    w = 0.1 * jax.random.normal(kf[0], (128, 256), jnp.float32)
    b = 0.05 * jax.random.normal(kf[1], (128,), jnp.float32)
    p["fc1_w"], p["fc1_shift"] = _fold_bn_into(w.T, b, *_bn_stats(keys[10], 128))

    w = 0.1 * jax.random.normal(kf[2], (64, 128), jnp.float32)
    b = 0.05 * jax.random.normal(kf[3], (64,), jnp.float32)
    p["fc2_w"], p["fc2_shift"] = _fold_bn_into(w.T, b, *_bn_stats(keys[11], 64))

    w = 0.1 * jax.random.normal(kf[4], (1, 64), jnp.float32)
    b = 0.05 * jax.random.normal(kf[5], (1,), jnp.float32)
    w3 = jnp.zeros((64, FC3_PAD), jnp.float32).at[:, 0].set(w[0])
    b3 = jnp.zeros((FC3_PAD,), jnp.float32).at[0].set(b[0])
    p["fc3_w"] = w3.astype(jnp.bfloat16)
    p["fc3_shift"] = b3.reshape(1, FC3_PAD)
    return p


def net_forward(params, x1_nchw, x2_nchw):
    # Both branches share conv1/batch1 weights -> stack along the batch axis so
    # one conv matmul + one pool kernel handles both (halves kernel launches).
    x = jnp.concatenate([x1_nchw, x2_nchw], axis=0)
    x = jnp.transpose(x, (0, 2, 3, 1)).astype(jnp.float32)      # NCHW -> NHWC

    x = conv_bn_relu_pool(x, params["conv1_w"], params["conv1_shift"])
    # Dropout(0.3): identity in eval mode.
    n = x.shape[0] // 2
    x = jnp.concatenate([x[:n], x[n:]], axis=-1)   # torch.cat(dim=1) == channel concat

    x = conv_bn_relu_pool(x, params["conv2_w"], params["conv2_shift"])
    x = conv_bn_relu_pool(x, params["conv3_w"], params["conv3_shift"])

    return fused_head(x, params)                   # (N, 1)


if __name__ == "__main__":
    key = jax.random.PRNGKey(0)
    kp, k1, k2 = jax.random.split(key, 3)
    params = init_params(kp)

    # batch=2, channels=3, spatial=30:
    # 30 -> conv 28 -> pool 14 -> conv 12 -> pool 6 -> conv 4 -> pool 2 -> avg 1.
    x1 = jax.random.normal(k1, (2, 3, 30, 30), jnp.float32)
    x2 = jax.random.normal(k2, (2, 3, 30, 30), jnp.float32)

    out = jax.jit(net_forward)(params, x1, x2)
    out = jax.block_until_ready(out)
    assert out.shape == (2, 1)
    assert bool(jnp.all(jnp.isfinite(out)))
    assert bool(jnp.all((out >= 0.0) & (out <= 1.0)))
    print("KERNEL_OK")
</pallas_src>

<mosaic_0001>
module attributes {stable_mosaic.version = 11 : i64} {
  func.func @_matmul_shift_kernel(%arg0: i32, %arg1: memref<512x27xbf16, #tpu.memory_space<vmem>>, %arg2: memref<27x32xbf16, #tpu.memory_space<vmem>>, %arg3: memref<1x32xf32, #tpu.memory_space<vmem>>, %arg4: memref<512x32xf32, #tpu.memory_space<vmem>>) attributes {dimension_semantics = [#tpu.dimension_semantics<parallel>], iteration_bounds = array<i64: 7>, scalar_prefetch = 0 : i64, scratch_operands = 0 : i64, tpu.core_type = #tpu.core_type<tc>, window_params = [{transform_indices = @transform_0, window_bounds = array<i64: 512, 27>}, {pipeline_mode = #tpu.pipeline_mode<synchronous>, transform_indices = @transform_1, window_bounds = array<i64: 27, 32>}, {pipeline_mode = #tpu.pipeline_mode<synchronous>, transform_indices = @transform_2, window_bounds = array<i64: 1, 32>}, {transform_indices = @transform_3, window_bounds = array<i64: 512, 32>}]} {
    %c0 = arith.constant 0 : index
    %c0_0 = arith.constant 0 : index
    %0 = vector.load %arg1[%c0, %c0_0] : memref<512x27xbf16, #tpu.memory_space<vmem>>, vector<512x27xbf16>
    %c0_1 = arith.constant 0 : index
    %c0_2 = arith.constant 0 : index
    %1 = vector.load %arg2[%c0_1, %c0_2] : memref<27x32xbf16, #tpu.memory_space<vmem>>, vector<27x32xbf16>
    %cst = arith.constant dense<0.000000e+00> : vector<512x32xf32>
    %2 = tpu.matmul %0, %1, %cst {dimension_numbers = #tpu.dot_dimension_numbers<[1], [0], [0], [1], [0, 0, 1, 1], [], []>} : vector<512x27xbf16>, vector<27x32xbf16>, vector<512x32xf32> -> vector<512x32xf32>
    %c0_3 = arith.constant 0 : index
    %c0_4 = arith.constant 0 : index
    %3 = vector.load %arg3[%c0_3, %c0_4] : memref<1x32xf32, #tpu.memory_space<vmem>>, vector<1x32xf32>
    %4 = vector.broadcast %3 : vector<1x32xf32> to vector<512x32xf32>
    %5 = arith.addf %2, %4 : vector<512x32xf32>
    %cst_5 = arith.constant 0.000000e+00 : f32
    %6 = vector.broadcast %cst_5 : f32 to vector<512x32xf32>
    %7 = arith.maximumf %5, %6 : vector<512x32xf32>
    %c0_6 = arith.constant 0 : index
    %c0_7 = arith.constant 0 : index
    %8 = vector.load %arg4[%c0_6, %c0_7] : memref<512x32xf32, #tpu.memory_space<vmem>>, vector<512x32xf32>
    tpu.vector_store %arg4[%c0_6, %c0_7], %7 {strides = array<i32>} : memref<512x32xf32, #tpu.memory_space<vmem>>, vector<512x32xf32>,
    return
  }
  func.func @transform_0(%arg0: i32) -> (i32, i32) {
    %c0_i32 = arith.constant 0 : i32
    %c0_i32_0 = arith.constant 0 : i32
    return %arg0, %c0_i32 : i32, i32
  }
  func.func @transform_1(%arg0: i32) -> (i32, i32) {
    %c0_i32 = arith.constant 0 : i32
    %c0_i32_0 = arith.constant 0 : i32
    %c0_i32_1 = arith.constant 0 : i32
    return %c0_i32, %c0_i32_0 : i32, i32
  }
  func.func @transform_2(%arg0: i32) -> (i32, i32) {
    %c0_i32 = arith.constant 0 : i32
    %c0_i32_0 = arith.constant 0 : i32
    %c0_i32_1 = arith.constant 0 : i32
    return %c0_i32, %c0_i32_0 : i32, i32
  }
  func.func @transform_3(%arg0: i32) -> (i32, i32) {
    %c0_i32 = arith.constant 0 : i32
    %c0_i32_0 = arith.constant 0 : i32
    return %arg0, %c0_i32 : i32, i32
  }
}

module attributes {stable_mosaic.version = 11 : i64} {
  func.func @_maxpool_kernel(%arg0: i32, %arg1: memref<56x2x14x64xf32, #tpu.memory_space<vmem>>, %arg2: memref<56x14x32xf32, #tpu.memory_space<vmem>>) attributes {dimension_semantics = [#tpu.dimension_semantics<parallel>], iteration_bounds = array<i64: 1>, scalar_prefetch = 0 : i64, scratch_operands = 0 : i64, tpu.core_type = #tpu.core_type<tc>, window_params = [{transform_indices = @transform_0, window_bounds = array<i64: 56, 2, 14, 64>}, {transform_indices = @transform_1, window_bounds = array<i64: 56, 14, 32>}]} {
    %c0 = arith.constant 0 : index
    %c0_0 = arith.constant 0 : index
    %c0_1 = arith.constant 0 : index
    %c0_2 = arith.constant 0 : index
    %0 = vector.load %arg1[%c0, %c0_0, %c0_1, %c0_2] : memref<56x2x14x64xf32, #tpu.memory_space<vmem>>, vector<56x1x14x32xf32>
    %1 = vector.shape_cast %0 : vector<56x1x14x32xf32> to vector<56x14x32xf32>
    %c0_3 = arith.constant 0 : index
    %c0_4 = arith.constant 0 : index
    %c0_5 = arith.constant 0 : index
    %c32 = arith.constant 32 : index
    %2 = vector.load %arg1[%c0_3, %c0_4, %c0_5, %c32] : memref<56x2x14x64xf32, #tpu.memory_space<vmem>>, vector<56x1x14x32xf32>
    %3 = vector.shape_cast %2 : vector<56x1x14x32xf32> to vector<56x14x32xf32>
    %c0_6 = arith.constant 0 : index
    %c1 = arith.constant 1 : index
    %c0_7 = arith.constant 0 : index
    %c0_8 = arith.constant 0 : index
    %4 = vector.load %arg1[%c0_6, %c1, %c0_7, %c0_8] : memref<56x2x14x64xf32, #tpu.memory_space<vmem>>, vector<56x1x14x32xf32>
    %5 = vector.shape_cast %4 : vector<56x1x14x32xf32> to vector<56x14x32xf32>
    %c0_9 = arith.constant 0 : index
    %c1_10 = arith.constant 1 : index
    %c0_11 = arith.constant 0 : index
    %c32_12 = arith.constant 32 : index
    %6 = vector.load %arg1[%c0_9, %c1_10, %c0_11, %c32_12] : memref<56x2x14x64xf32, #tpu.memory_space<vmem>>, vector<56x1x14x32xf32>
    %7 = vector.shape_cast %6 : vector<56x1x14x32xf32> to vector<56x14x32xf32>
    %8 = arith.maximumf %1, %3 : vector<56x14x32xf32>
    %9 = arith.maximumf %5, %7 : vector<56x14x32xf32>
    %10 = arith.maximumf %8, %9 : vector<56x14x32xf32>
    %c0_13 = arith.constant 0 : index
    %c0_14 = arith.constant 0 : index
    %c0_15 = arith.constant 0 : index
    %11 = vector.load %arg2[%c0_13, %c0_14, %c0_15] : memref<56x14x32xf32, #tpu.memory_space<vmem>>, vector<56x14x32xf32>
    tpu.vector_store %arg2[%c0_13, %c0_14, %c0_15], %10 {strides = array<i32>} : memref<56x14x32xf32, #tpu.memory_space<vmem>>, vector<56x14x32xf32>,
    return
  }
  func.func @transform_0(%arg0: i32) -> (i32, i32, i32, i32) {
    %c0_i32 = arith.constant 0 : i32
    %c0_i32_0 = arith.constant 0 : i32
    %c0_i32_1 = arith.constant 0 : i32
    %c0_i32_2 = arith.constant 0 : i32
    return %arg0, %c0_i32, %c0_i32_0, %c0_i32_1 : i32, i32, i32, i32
  }
  func.func @transform_1(%arg0: i32) -> (i32, i32, i32) {
    %c0_i32 = arith.constant 0 : i32
    %c0_i32_0 = arith.constant 0 : i32
    %c0_i32_1 = arith.constant 0 : i32
    return %arg0, %c0_i32, %c0_i32_0 : i32, i32, i32
  }
}

module attributes {stable_mosaic.version = 11 : i64} {
  func.func @_matmul_shift_kernel(%arg0: i32, %arg1: memref<288x576xbf16, #tpu.memory_space<vmem>>, %arg2: memref<576x128xbf16, #tpu.memory_space<vmem>>, %arg3: memref<1x128xf32, #tpu.memory_space<vmem>>, %arg4: memref<288x128xf32, #tpu.memory_space<vmem>>) attributes {dimension_semantics = [#tpu.dimension_semantics<parallel>], iteration_bounds = array<i64: 1>, scalar_prefetch = 0 : i64, scratch_operands = 0 : i64, tpu.core_type = #tpu.core_type<tc>, window_params = [{transform_indices = @transform_0, window_bounds = array<i64: 288, 576>}, {pipeline_mode = #tpu.pipeline_mode<synchronous>, transform_indices = @transform_1, window_bounds = array<i64: 576, 128>}, {pipeline_mode = #tpu.pipeline_mode<synchronous>, transform_indices = @transform_2, window_bounds = array<i64: 1, 128>}, {transform_indices = @transform_3, window_bounds = array<i64: 288, 128>}]} {
    %c0 = arith.constant 0 : index
    %c0_0 = arith.constant 0 : index
    %0 = vector.load %arg1[%c0, %c0_0] : memref<288x576xbf16, #tpu.memory_space<vmem>>, vector<288x576xbf16>
    %c0_1 = arith.constant 0 : index
    %c0_2 = arith.constant 0 : index
    %1 = vector.load %arg2[%c0_1, %c0_2] : memref<576x128xbf16, #tpu.memory_space<vmem>>, vector<576x128xbf16>
    %cst = arith.constant dense<0.000000e+00> : vector<288x128xf32>
    %2 = tpu.matmul %0, %1, %cst {dimension_numbers = #tpu.dot_dimension_numbers<[1], [0], [0], [1], [0, 0, 1, 1], [], []>} : vector<288x576xbf16>, vector<576x128xbf16>, vector<288x128xf32> -> vector<288x128xf32>
    %c0_3 = arith.constant 0 : index
    %c0_4 = arith.constant 0 : index
    %3 = vector.load %arg3[%c0_3, %c0_4] : memref<1x128xf32, #tpu.memory_space<vmem>>, vector<1x128xf32>
    %4 = vector.broadcast %3 : vector<1x128xf32> to vector<288x128xf32>
    %5 = arith.addf %2, %4 : vector<288x128xf32>
    %cst_5 = arith.constant 0.000000e+00 : f32
    %6 = vector.broadcast %cst_5 : f32 to vector<288x128xf32>
    %7 = arith.maximumf %5, %6 : vector<288x128xf32>
    %c0_6 = arith.constant 0 : index
    %c0_7 = arith.constant 0 : index
    %8 = vector.load %arg4[%c0_6, %c0_7] : memref<288x128xf32, #tpu.memory_space<vmem>>, vector<288x128xf32>
    tpu.vector_store %arg4[%c0_6, %c0_7], %7 {strides = array<i32>} : memref<288x128xf32, #tpu.memory_space<vmem>>, vector<288x128xf32>,
    return
  }
  func.func @transform_0(%arg0: i32) -> (i32, i32) {
    %c0_i32 = arith.constant 0 : i32
    %c0_i32_0 = arith.constant 0 : i32
    return %arg0, %c0_i32 : i32, i32
  }
  func.func @transform_1(%arg0: i32) -> (i32, i32) {
    %c0_i32 = arith.constant 0 : i32
    %c0_i32_0 = arith.constant 0 : i32
    %c0_i32_1 = arith.constant 0 : i32
    return %c0_i32, %c0_i32_0 : i32, i32
  }
  func.func @transform_2(%arg0: i32) -> (i32, i32) {
    %c0_i32 = arith.constant 0 : i32
    %c0_i32_0 = arith.constant 0 : i32
    %c0_i32_1 = arith.constant 0 : i32
    return %c0_i32, %c0_i32_0 : i32, i32
  }
  func.func @transform_3(%arg0: i32) -> (i32, i32) {
    %c0_i32 = arith.constant 0 : i32
    %c0_i32_0 = arith.constant 0 : i32
    return %arg0, %c0_i32 : i32, i32
  }
}

module attributes {stable_mosaic.version = 11 : i64} {
  func.func @_maxpool_kernel(%arg0: i32, %arg1: memref<12x2x6x256xf32, #tpu.memory_space<vmem>>, %arg2: memref<12x6x128xf32, #tpu.memory_space<vmem>>) attributes {dimension_semantics = [#tpu.dimension_semantics<parallel>], iteration_bounds = array<i64: 1>, scalar_prefetch = 0 : i64, scratch_operands = 0 : i64, tpu.core_type = #tpu.core_type<tc>, window_params = [{transform_indices = @transform_0, window_bounds = array<i64: 12, 2, 6, 256>}, {transform_indices = @transform_1, window_bounds = array<i64: 12, 6, 128>}]} {
    %c0 = arith.constant 0 : index
    %c0_0 = arith.constant 0 : index
    %c0_1 = arith.constant 0 : index
    %c0_2 = arith.constant 0 : index
    %0 = vector.load %arg1[%c0, %c0_0, %c0_1, %c0_2] : memref<12x2x6x256xf32, #tpu.memory_space<vmem>>, vector<12x1x6x128xf32>
    %1 = vector.shape_cast %0 : vector<12x1x6x128xf32> to vector<12x6x128xf32>
    %c0_3 = arith.constant 0 : index
    %c0_4 = arith.constant 0 : index
    %c0_5 = arith.constant 0 : index
    %c128 = arith.constant 128 : index
    %2 = vector.load %arg1[%c0_3, %c0_4, %c0_5, %c128] : memref<12x2x6x256xf32, #tpu.memory_space<vmem>>, vector<12x1x6x128xf32>
    %3 = vector.shape_cast %2 : vector<12x1x6x128xf32> to vector<12x6x128xf32>
    %c0_6 = arith.constant 0 : index
    %c1 = arith.constant 1 : index
    %c0_7 = arith.constant 0 : index
    %c0_8 = arith.constant 0 : index
    %4 = vector.load %arg1[%c0_6, %c1, %c0_7, %c0_8] : memref<12x2x6x256xf32, #tpu.memory_space<vmem>>, vector<12x1x6x128xf32>
    %5 = vector.shape_cast %4 : vector<12x1x6x128xf32> to vector<12x6x128xf32>
    %c0_9 = arith.constant 0 : index
    %c1_10 = arith.constant 1 : index
    %c0_11 = arith.constant 0 : index
    %c128_12 = arith.constant 128 : index
    %6 = vector.load %arg1[%c0_9, %c1_10, %c0_11, %c128_12] : memref<12x2x6x256xf32, #tpu.memory_space<vmem>>, vector<12x1x6x128xf32>
    %7 = vector.shape_cast %6 : vector<12x1x6x128xf32> to vector<12x6x128xf32>
    %8 = arith.maximumf %1, %3 : vector<12x6x128xf32>
    %9 = arith.maximumf %5, %7 : vector<12x6x128xf32>
    %10 = arith.maximumf %8, %9 : vector<12x6x128xf32>
    %c0_13 = arith.constant 0 : index
    %c0_14 = arith.constant 0 : index
    %c0_15 = arith.constant 0 : index
    %11 = vector.load %arg2[%c0_13, %c0_14, %c0_15] : memref<12x6x128xf32, #tpu.memory_space<vmem>>, vector<12x6x128xf32>
    tpu.vector_store %arg2[%c0_13, %c0_14, %c0_15], %10 {strides = array<i32>} : memref<12x6x128xf32, #tpu.memory_space<vmem>>, vector<12x6x128xf32>,
    return
  }
  func.func @transform_0(%arg0: i32) -> (i32, i32, i32, i32) {
    %c0_i32 = arith.constant 0 : i32
    %c0_i32_0 = arith.constant 0 : i32
    %c0_i32_1 = arith.constant 0 : i32
    %c0_i32_2 = arith.constant 0 : i32
    return %arg0, %c0_i32, %c0_i32_0, %c0_i32_1 : i32, i32, i32, i32
  }
  func.func @transform_1(%arg0: i32) -> (i32, i32, i32) {
    %c0_i32 = arith.constant 0 : i32
    %c0_i32_0 = arith.constant 0 : i32
    %c0_i32_1 = arith.constant 0 : i32
    return %arg0, %c0_i32, %c0_i32_0 : i32, i32, i32
  }
}

module attributes {stable_mosaic.version = 11 : i64} {
  func.func @_matmul_shift_kernel(%arg0: i32, %arg1: memref<32x1152xbf16, #tpu.memory_space<vmem>>, %arg2: memref<1152x256xbf16, #tpu.memory_space<vmem>>, %arg3: memref<1x256xf32, #tpu.memory_space<vmem>>, %arg4: memref<32x256xf32, #tpu.memory_space<vmem>>) attributes {dimension_semantics = [#tpu.dimension_semantics<parallel>], iteration_bounds = array<i64: 1>, scalar_prefetch = 0 : i64, scratch_operands = 0 : i64, tpu.core_type = #tpu.core_type<tc>, window_params = [{transform_indices = @transform_0, window_bounds = array<i64: 32, 1152>}, {pipeline_mode = #tpu.pipeline_mode<synchronous>, transform_indices = @transform_1, window_bounds = array<i64: 1152, 256>}, {pipeline_mode = #tpu.pipeline_mode<synchronous>, transform_indices = @transform_2, window_bounds = array<i64: 1, 256>}, {transform_indices = @transform_3, window_bounds = array<i64: 32, 256>}]} {
    %c0 = arith.constant 0 : index
    %c0_0 = arith.constant 0 : index
    %0 = vector.load %arg1[%c0, %c0_0] : memref<32x1152xbf16, #tpu.memory_space<vmem>>, vector<32x1152xbf16>
    %c0_1 = arith.constant 0 : index
    %c0_2 = arith.constant 0 : index
    %1 = vector.load %arg2[%c0_1, %c0_2] : memref<1152x256xbf16, #tpu.memory_space<vmem>>, vector<1152x256xbf16>
    %cst = arith.constant dense<0.000000e+00> : vector<32x256xf32>
    %2 = tpu.matmul %0, %1, %cst {dimension_numbers = #tpu.dot_dimension_numbers<[1], [0], [0], [1], [0, 0, 1, 1], [], []>} : vector<32x1152xbf16>, vector<1152x256xbf16>, vector<32x256xf32> -> vector<32x256xf32>
    %c0_3 = arith.constant 0 : index
    %c0_4 = arith.constant 0 : index
    %3 = vector.load %arg3[%c0_3, %c0_4] : memref<1x256xf32, #tpu.memory_space<vmem>>, vector<1x256xf32>
    %4 = vector.broadcast %3 : vector<1x256xf32> to vector<32x256xf32>
    %5 = arith.addf %2, %4 : vector<32x256xf32>
    %cst_5 = arith.constant 0.000000e+00 : f32
    %6 = vector.broadcast %cst_5 : f32 to vector<32x256xf32>
    %7 = arith.maximumf %5, %6 : vector<32x256xf32>
    %c0_6 = arith.constant 0 : index
    %c0_7 = arith.constant 0 : index
    %8 = vector.load %arg4[%c0_6, %c0_7] : memref<32x256xf32, #tpu.memory_space<vmem>>, vector<32x256xf32>
    tpu.vector_store %arg4[%c0_6, %c0_7], %7 {strides = array<i32>} : memref<32x256xf32, #tpu.memory_space<vmem>>, vector<32x256xf32>,
    return
  }
  func.func @transform_0(%arg0: i32) -> (i32, i32) {
    %c0_i32 = arith.constant 0 : i32
    %c0_i32_0 = arith.constant 0 : i32
    return %arg0, %c0_i32 : i32, i32
  }
  func.func @transform_1(%arg0: i32) -> (i32, i32) {
    %c0_i32 = arith.constant 0 : i32
    %c0_i32_0 = arith.constant 0 : i32
    %c0_i32_1 = arith.constant 0 : i32
    return %c0_i32, %c0_i32_0 : i32, i32
  }
  func.func @transform_2(%arg0: i32) -> (i32, i32) {
    %c0_i32 = arith.constant 0 : i32
    %c0_i32_0 = arith.constant 0 : i32
    %c0_i32_1 = arith.constant 0 : i32
    return %c0_i32, %c0_i32_0 : i32, i32
  }
  func.func @transform_3(%arg0: i32) -> (i32, i32) {
    %c0_i32 = arith.constant 0 : i32
    %c0_i32_0 = arith.constant 0 : i32
    return %arg0, %c0_i32 : i32, i32
  }
}

module attributes {stable_mosaic.version = 11 : i64} {
  func.func @_maxpool_kernel(%arg0: i32, %arg1: memref<4x2x2x512xf32, #tpu.memory_space<vmem>>, %arg2: memref<4x2x256xf32, #tpu.memory_space<vmem>>) attributes {dimension_semantics = [#tpu.dimension_semantics<parallel>], iteration_bounds = array<i64: 1>, scalar_prefetch = 0 : i64, scratch_operands = 0 : i64, tpu.core_type = #tpu.core_type<tc>, window_params = [{transform_indices = @transform_0, window_bounds = array<i64: 4, 2, 2, 512>}, {transform_indices = @transform_1, window_bounds = array<i64: 4, 2, 256>}]} {
    %c0 = arith.constant 0 : index
    %c0_0 = arith.constant 0 : index
    %c0_1 = arith.constant 0 : index
    %c0_2 = arith.constant 0 : index
    %0 = vector.load %arg1[%c0, %c0_0, %c0_1, %c0_2] : memref<4x2x2x512xf32, #tpu.memory_space<vmem>>, vector<4x1x2x256xf32>
    %1 = vector.shape_cast %0 : vector<4x1x2x256xf32> to vector<4x2x256xf32>
    %c0_3 = arith.constant 0 : index
    %c0_4 = arith.constant 0 : index
    %c0_5 = arith.constant 0 : index
    %c256 = arith.constant 256 : index
    %2 = vector.load %arg1[%c0_3, %c0_4, %c0_5, %c256] : memref<4x2x2x512xf32, #tpu.memory_space<vmem>>, vector<4x1x2x256xf32>
    %3 = vector.shape_cast %2 : vector<4x1x2x256xf32> to vector<4x2x256xf32>
    %c0_6 = arith.constant 0 : index
    %c1 = arith.constant 1 : index
    %c0_7 = arith.constant 0 : index
    %c0_8 = arith.constant 0 : index
    %4 = vector.load %arg1[%c0_6, %c1, %c0_7, %c0_8] : memref<4x2x2x512xf32, #tpu.memory_space<vmem>>, vector<4x1x2x256xf32>
    %5 = vector.shape_cast %4 : vector<4x1x2x256xf32> to vector<4x2x256xf32>
    %c0_9 = arith.constant 0 : index
    %c1_10 = arith.constant 1 : index
    %c0_11 = arith.constant 0 : index
    %c256_12 = arith.constant 256 : index
    %6 = vector.load %arg1[%c0_9, %c1_10, %c0_11, %c256_12] : memref<4x2x2x512xf32, #tpu.memory_space<vmem>>, vector<4x1x2x256xf32>
    %7 = vector.shape_cast %6 : vector<4x1x2x256xf32> to vector<4x2x256xf32>
    %8 = arith.maximumf %1, %3 : vector<4x2x256xf32>
    %9 = arith.maximumf %5, %7 : vector<4x2x256xf32>
    %10 = arith.maximumf %8, %9 : vector<4x2x256xf32>
    %c0_13 = arith.constant 0 : index
    %c0_14 = arith.constant 0 : index
    %c0_15 = arith.constant 0 : index
    %11 = vector.load %arg2[%c0_13, %c0_14, %c0_15] : memref<4x2x256xf32, #tpu.memory_space<vmem>>, vector<4x2x256xf32>
    tpu.vector_store %arg2[%c0_13, %c0_14, %c0_15], %10 {strides = array<i32>} : memref<4x2x256xf32, #tpu.memory_space<vmem>>, vector<4x2x256xf32>,
    return
  }
  func.func @transform_0(%arg0: i32) -> (i32, i32, i32, i32) {
    %c0_i32 = arith.constant 0 : i32
    %c0_i32_0 = arith.constant 0 : i32
    %c0_i32_1 = arith.constant 0 : i32
    %c0_i32_2 = arith.constant 0 : i32
    return %arg0, %c0_i32, %c0_i32_0, %c0_i32_1 : i32, i32, i32, i32
  }
  func.func @transform_1(%arg0: i32) -> (i32, i32, i32) {
    %c0_i32 = arith.constant 0 : i32
    %c0_i32_0 = arith.constant 0 : i32
    %c0_i32_1 = arith.constant 0 : i32
    return %arg0, %c0_i32, %c0_i32_0 : i32, i32, i32
  }
}

module attributes {stable_mosaic.version = 11 : i64} {
  func.func @_head_kernel(%arg0: i32, %arg1: memref<2x4x256xf32, #tpu.memory_space<vmem>>, %arg2: memref<256x128xbf16, #tpu.memory_space<vmem>>, %arg3: memref<1x128xf32, #tpu.memory_space<vmem>>, %arg4: memref<128x64xbf16, #tpu.memory_space<vmem>>, %arg5: memref<1x64xf32, #tpu.memory_space<vmem>>, %arg6: memref<64x128xbf16, #tpu.memory_space<vmem>>, %arg7: memref<1x128xf32, #tpu.memory_space<vmem>>, %arg8: memref<2x128xf32, #tpu.memory_space<vmem>>) attributes {dimension_semantics = [#tpu.dimension_semantics<arbitrary>], iteration_bounds = array<i64: 1>, scalar_prefetch = 0 : i64, scratch_operands = 0 : i64, tpu.core_type = #tpu.core_type<tc>, window_params = [{pipeline_mode = #tpu.pipeline_mode<synchronous>, transform_indices = @transform_0, window_bounds = array<i64: 2, 4, 256>}, {pipeline_mode = #tpu.pipeline_mode<synchronous>, transform_indices = @transform_1, window_bounds = array<i64: 256, 128>}, {pipeline_mode = #tpu.pipeline_mode<synchronous>, transform_indices = @transform_2, window_bounds = array<i64: 1, 128>}, {pipeline_mode = #tpu.pipeline_mode<synchronous>, transform_indices = @transform_3, window_bounds = array<i64: 128, 64>}, {pipeline_mode = #tpu.pipeline_mode<synchronous>, transform_indices = @transform_4, window_bounds = array<i64: 1, 64>}, {pipeline_mode = #tpu.pipeline_mode<synchronous>, transform_indices = @transform_5, window_bounds = array<i64: 64, 128>}, {pipeline_mode = #tpu.pipeline_mode<synchronous>, transform_indices = @transform_6, window_bounds = array<i64: 1, 128>}, {pipeline_mode = #tpu.pipeline_mode<synchronous>, transform_indices = @transform_7, window_bounds = array<i64: 2, 128>}]} {
    %c0 = arith.constant 0 : index
    %c0_0 = arith.constant 0 : index
    %c0_1 = arith.constant 0 : index
    %0 = vector.load %arg1[%c0, %c0_0, %c0_1] : memref<2x4x256xf32, #tpu.memory_space<vmem>>, vector<2x4x256xf32>
    %cst = arith.constant dense<0.000000e+00> : vector<2x256xf32>
    %1 = vector.multi_reduction <add>, %0, %cst [1] : vector<2x4x256xf32> to vector<2x256xf32>
    %cst_2 = arith.constant 4.000000e+00 : f32
    %2 = vector.broadcast %cst_2 : f32 to vector<2x256xf32>
    %3 = arith.divf %1, %2 : vector<2x256xf32>
    %4 = arith.truncf %3 : vector<2x256xf32> to vector<2x256xbf16>
    %c0_3 = arith.constant 0 : index
    %c0_4 = arith.constant 0 : index
    %5 = vector.load %arg2[%c0_3, %c0_4] : memref<256x128xbf16, #tpu.memory_space<vmem>>, vector<256x128xbf16>
    %cst_5 = arith.constant dense<0.000000e+00> : vector<2x128xf32>
    %6 = tpu.matmul %4, %5, %cst_5 {dimension_numbers = #tpu.dot_dimension_numbers<[1], [0], [0], [1], [0, 0, 1, 1], [], []>} : vector<2x256xbf16>, vector<256x128xbf16>, vector<2x128xf32> -> vector<2x128xf32>
    %c0_6 = arith.constant 0 : index
    %c0_7 = arith.constant 0 : index
    %7 = vector.load %arg3[%c0_6, %c0_7] : memref<1x128xf32, #tpu.memory_space<vmem>>, vector<1x128xf32>
    %8 = vector.broadcast %7 : vector<1x128xf32> to vector<2x128xf32>
    %9 = arith.addf %6, %8 : vector<2x128xf32>
    %cst_8 = arith.constant 0.000000e+00 : f32
    %10 = vector.broadcast %cst_8 : f32 to vector<2x128xf32>
    %11 = arith.maximumf %9, %10 : vector<2x128xf32>
    %12 = arith.truncf %11 : vector<2x128xf32> to vector<2x128xbf16>
    %c0_9 = arith.constant 0 : index
    %c0_10 = arith.constant 0 : index
    %13 = vector.load %arg4[%c0_9, %c0_10] : memref<128x64xbf16, #tpu.memory_space<vmem>>, vector<128x64xbf16>
    %cst_11 = arith.constant dense<0.000000e+00> : vector<2x64xf32>
    %14 = tpu.matmul %12, %13, %cst_11 {dimension_numbers = #tpu.dot_dimension_numbers<[1], [0], [0], [1], [0, 0, 1, 1], [], []>} : vector<2x128xbf16>, vector<128x64xbf16>, vector<2x64xf32> -> vector<2x64xf32>
    %c0_12 = arith.constant 0 : index
    %c0_13 = arith.constant 0 : index
    %15 = vector.load %arg5[%c0_12, %c0_13] : memref<1x64xf32, #tpu.memory_space<vmem>>, vector<1x64xf32>
    %16 = vector.broadcast %15 : vector<1x64xf32> to vector<2x64xf32>
    %17 = arith.addf %14, %16 : vector<2x64xf32>
    %cst_14 = arith.constant 0.000000e+00 : f32
    %18 = vector.broadcast %cst_14 : f32 to vector<2x64xf32>
    %19 = arith.maximumf %17, %18 : vector<2x64xf32>
    %20 = arith.truncf %19 : vector<2x64xf32> to vector<2x64xbf16>
    %c0_15 = arith.constant 0 : index
    %c0_16 = arith.constant 0 : index
    %21 = vector.load %arg6[%c0_15, %c0_16] : memref<64x128xbf16, #tpu.memory_space<vmem>>, vector<64x128xbf16>
    %cst_17 = arith.constant dense<0.000000e+00> : vector<2x128xf32>
    %22 = tpu.matmul %20, %21, %cst_17 {dimension_numbers = #tpu.dot_dimension_numbers<[1], [0], [0], [1], [0, 0, 1, 1], [], []>} : vector<2x64xbf16>, vector<64x128xbf16>, vector<2x128xf32> -> vector<2x128xf32>
    %c0_18 = arith.constant 0 : index
    %c0_19 = arith.constant 0 : index
    %23 = vector.load %arg7[%c0_18, %c0_19] : memref<1x128xf32, #tpu.memory_space<vmem>>, vector<1x128xf32>
    %24 = vector.broadcast %23 : vector<1x128xf32> to vector<2x128xf32>
    %25 = arith.addf %22, %24 : vector<2x128xf32>
    %cst_20 = arith.constant 0.000000e+00 : f32
    %26 = vector.broadcast %cst_20 : f32 to vector<2x128xf32>
    %27 = arith.subf %26, %25 : vector<2x128xf32>
    %28 = math.exp %27 : vector<2x128xf32>
    %cst_21 = arith.constant 1.000000e+00 : f32
    %29 = vector.broadcast %cst_21 : f32 to vector<2x128xf32>
    %30 = arith.addf %29, %28 : vector<2x128xf32>
    %cst_22 = arith.constant 1.000000e+00 : f32
    %31 = vector.broadcast %cst_22 : f32 to vector<2x128xf32>
    %32 = arith.divf %31, %30 : vector<2x128xf32>
    %c0_23 = arith.constant 0 : index
    %c0_24 = arith.constant 0 : index
    %33 = vector.load %arg8[%c0_23, %c0_24] : memref<2x128xf32, #tpu.memory_space<vmem>>, vector<2x128xf32>
    tpu.vector_store %arg8[%c0_23, %c0_24], %32 {strides = array<i32>} : memref<2x128xf32, #tpu.memory_space<vmem>>, vector<2x128xf32>,
    return
  }
  func.func @transform_0(%arg0: i32) -> (i32, i32, i32) {
    %c0_i32 = arith.constant 0 : i32
    %c0_i32_0 = arith.constant 0 : i32
    %c0_i32_1 = arith.constant 0 : i32
    %c0_i32_2 = arith.constant 0 : i32
    return %c0_i32, %c0_i32_0, %c0_i32_1 : i32, i32, i32
  }
  func.func @transform_1(%arg0: i32) -> (i32, i32) {
    %c0_i32 = arith.constant 0 : i32
    %c0_i32_0 = arith.constant 0 : i32
    %c0_i32_1 = arith.constant 0 : i32
    return %c0_i32, %c0_i32_0 : i32, i32
  }
  func.func @transform_2(%arg0: i32) -> (i32, i32) {
    %c0_i32 = arith.constant 0 : i32
    %c0_i32_0 = arith.constant 0 : i32
    %c0_i32_1 = arith.constant 0 : i32
    return %c0_i32, %c0_i32_0 : i32, i32
  }
  func.func @transform_3(%arg0: i32) -> (i32, i32) {
    %c0_i32 = arith.constant 0 : i32
    %c0_i32_0 = arith.constant 0 : i32
    %c0_i32_1 = arith.constant 0 : i32
    return %c0_i32, %c0_i32_0 : i32, i32
  }
  func.func @transform_4(%arg0: i32) -> (i32, i32) {
    %c0_i32 = arith.constant 0 : i32
    %c0_i32_0 = arith.constant 0 : i32
    %c0_i32_1 = arith.constant 0 : i32
    return %c0_i32, %c0_i32_0 : i32, i32
  }
  func.func @transform_5(%arg0: i32) -> (i32, i32) {
    %c0_i32 = arith.constant 0 : i32
    %c0_i32_0 = arith.constant 0 : i32
    %c0_i32_1 = arith.constant 0 : i32
    return %c0_i32, %c0_i32_0 : i32, i32
  }
  func.func @transform_6(%arg0: i32) -> (i32, i32) {
    %c0_i32 = arith.constant 0 : i32
    %c0_i32_0 = arith.constant 0 : i32
    %c0_i32_1 = arith.constant 0 : i32
    return %c0_i32, %c0_i32_0 : i32, i32
  }
  func.func @transform_7(%arg0: i32) -> (i32, i32) {
    %c0_i32 = arith.constant 0 : i32
    %c0_i32_0 = arith.constant 0 : i32
    %c0_i32_1 = arith.constant 0 : i32
    return %c0_i32, %c0_i32_0 : i32, i32
  }
}

</mosaic_0001>

<bundles_post_ra>
// kernel: net_forward.7
= control target key start
LH: loop header
LB: loop body
LE: loop exit
PB: predicated region body
PF: predicated region fallthrough
CT: control target
= control target key end

     0   :  { %s1860_s12 = smov 0   ;;  %s1862_s13 = smov 0   ;;  %s2375_s0 = inlined_call_operand.vmem [shape: bf16[3136,27], index: 0, kind: input, shape index: {}]   ;;  %s2376_s1 = inlined_call_operand.vmem [shape: bf16[27,32], index: 1, kind: input, shape index: {}]   ;;  %s2377_s2 = inlined_call_operand.vmem [shape: f32[1,32], index: 2, kind: input, shape index: {}]   ;;  %s2378_s3 = inlined_call_operand.vmem [shape: f32[3136,32], index: 3, kind: output, shape index: {}]  }
   0x1   :  { %s1864_s14 = smov 0  }
   0x2 LB: > { %s1873_s15 = sadd.s32 4294967295, %s1805_s14   ;;  %s1875_s16 = sadd.s32 1, %s1805_s14   ;;  %s1805_s14 = sphi %s1864_s14, %s2387_s14   ;;  %s1801_s13 = sphi %s1862_s13, %s2386_s13   ;;  %s1797_s12 = sphi %s1860_s12, %s2385_s12  }
   0x3   : > { %s85_s17 = ssub.s32 %s1805_s14, %s1875_s16  ;;  %s88_s18 = sadd.s32 1, %s1801_s13 }
   0x4   : > { %p86_p0 = scmp.eq.s32.totalorder %s85_s17, 0  ;;  %p98_p1 = scmp.ne.s32.totalorder %s1801_s13, %s1797_s12 }
   0x5   : > { %p99_p2 = scmp.eq.s32.totalorder %s1873_s15, 6  ;;  %p1431_p3 = scmp.ge.s32.totalorder %s1805_s14, 1 }
   0x6   : > { %s1883_s19 = scalar_select %p86_p0, %s1801_s13, %s88_s18  }
   0x7   : > { %p1885_p4 = por %p99_p2, %p98_p1  ;;  %p146_p5 = scmp.lt.s32.totalorder %s1805_s14, 8 }
   0x9   : > { %p147_p6 = pnand %p1431_p3, %p146_p5 }
   0xa   : > { %v1717_v0 = vld [vmem:[%s2376_s1] sm:$0xff] (!%p147_p6)   ;;  %vm536_vm0 = vcmask (!%p147_p6), 1044480   ;;  %v1718_v1 = vld [vmem:[%s2376_s1 + $0x8] sm:$0x3f] (!%p147_p6)   ;;  %vm537_vm1 = vcmask (!%p147_p6), 1045504   ;;  %s1896_s25 = sshll.u32 (!%p147_p6), %s1873_s15, 6 }
   0xb   : > { %150 = sbr.rel (%p147_p6) target bundleno = 373 (0x175), region = 32  ;;  %1556 = vmatprep.subr.bf16.mxu0 (!%p147_p6), %v1717_v0  ;;  %1624 = vmatprep.subr.bf16.mxu1 (!%p147_p6), %v1717_v0  ;;  %v1839_v2 = vmov (!%p147_p6), 65535   ;;  %p178_p7 = scmp.lt.s32.totalorder (!%p147_p6), %s1896_s25, 391  ;;  %vm439_vm2 = vcmask (!%p147_p6), 220160   ;;  %v1973_v38 = vld [vmem:[%s2377_s2] ss:$0 sm:$0xff] (!%p147_p6) }
   0xc   : > { %1557 = vmatpush3.bf16.msra.mxu0 (!%p147_p6), %v1717_v0  ;;  %1626 = vmatpush3.bf16.msra.mxu1 (!%p147_p6), %v1717_v0  ;;  %v538_v3 = vsel (!%p147_p6), %vm536_vm0, 4294967295, %v1839_v2  ;;  %s170_s4 = sand.u32 (!%p147_p6), 1, %s1797_s12   ;;  %vm896_vm3 = vcmask (!%p147_p6), 261120  }
   0xd   : > { %v539_v4 = vsel (!%p147_p6), %vm537_vm1, %v538_v3, 0  ;;  %s1432_s7 = sshll.u32 (!%p147_p6), %s170_s4, 9 }
   0xe   : > { %v541_v5 = vand.u32 (!%p147_p6), %v1718_v1, %v539_v4  ;;  %s1982_s8 = scalar_lea.vmem (!%p147_p6), [#allocation2], %s1432_s7  }
  0x10   : > { %1558 = vmatprep.subr.bf16.mxu0 (!%p147_p6), %v541_v5  ;;  %1625 = vmatprep.subr.bf16.mxu1 (!%p147_p6), %v541_v5 }
  0x11   : > { %1559 = vmatpush3.bf16.msra.mxu0 (!%p147_p6), %v541_v5  ;;  %1627 = vmatpush3.bf16.msra.mxu1 (!%p147_p6), %v541_v5 }
  0x12   : > { %s179_s26 = scalar_select %p178_p7, %s1896_s25, 391 }
  0x13   : > { %s969_s9 = ssub.s32 (%p1885_p4), 392, %s1896_s25  ;;  %s1519_s10 = sshll.u32 (%p1885_p4), %s1873_s15, 9 }
  0x14   : > { %s1434_s27 = sshll.u32 %s179_s26, 2  ;;  %p970_p8 = scmp.lt.s32.totalorder (%p1885_p4), %s969_s9, 64 }
  0x15   : > { %s1903_s30 = scalar_lea.vmem %s2375_s0, %s1434_s27  ;;  %s2176_s14 = scalar_lea.vmem (%p1885_p4), %s2378_s3, %s1519_s10  }
  0x16   : > { %v1719_v6 = vld [vmem:[%s1903_s30] sm:$0xff]   ;;  %v1721_v8 = vld [vmem:[%s1903_s30 + $0x8] sm:$0xff]   ;;  %v1723_v10 = vld [vmem:[%s1903_s30 + $0x10] sm:$0xff]  }
  0x17   : > { %v1720_v7 = vld [vmem:[%s1903_s30 + $0x80] sm:$0xff]   ;;  %1560 = vmatprep.mubr.msk.bf16.mxu0 %vm439_vm2, %v1719_v6  ;;  %v1722_v9 = vld [vmem:[%s1903_s30 + $0x88] sm:$0xff]   ;;  %v1724_v11 = vld [vmem:[%s1903_s30 + $0x90] sm:$0xff]  }
  0x18   : > { %1592 = vmatprep.mubr.msk.bf16.mxu1 %vm439_vm2, %v1720_v7  ;;  %1561 = vmatmul.mubr.msk.bf16.vlgmr.msra.gmra.mrb[0].mxu0 %vm439_vm2, %v1721_v8  ;;  %v1725_v12 = vld [vmem:[%s1903_s30 + $0x18] sm:$0xff]   ;;  %v1727_v14 = vld [vmem:[%s1903_s30 + $0x20] sm:$0xff]   ;;  %v1729_v16 = vld [vmem:[%s1903_s30 + $0x28] sm:$0xff]  }
  0x19   : > { %1593 = vmatmul.mubr.msk.bf16.vlgmr.msra.gmra.mrb[0].mxu1 %vm439_vm2, %v1722_v9  ;;  %1564 = vmatprep.mubr.msk.bf16.mxu0 %vm439_vm2, %v1723_v10  ;;  %v1726_v13 = vld [vmem:[%s1903_s30 + $0x98] sm:$0xff]   ;;  %v1728_v15 = vld [vmem:[%s1903_s30 + $0xa0] sm:$0xff]   ;;  %v1730_v17 = vld [vmem:[%s1903_s30 + $0xa8] sm:$0xff]  }
  0x1a   : > { %1596 = vmatprep.mubr.msk.bf16.mxu1 %vm439_vm2, %v1724_v11  ;;  %v1731_v18 = vld [vmem:[%s1903_s30 + $0x30] sm:$0xff]   ;;  %v1733_v20 = vld [vmem:[%s1903_s30 + $0x38] sm:$0xff]   ;;  %v1735_v22 = vld [vmem:[%s1903_s30 + $0x40] sm:$0xff]  }
  0x1b   : > { %v1732_v19 = vld [vmem:[%s1903_s30 + $0xb0] sm:$0xff]   ;;  %v1734_v21 = vld [vmem:[%s1903_s30 + $0xb8] sm:$0xff]   ;;  %v1736_v23 = vld [vmem:[%s1903_s30 + $0xc0] sm:$0xff]  }
  0x1c   : > { %v1737_v24 = vld [vmem:[%s1903_s30 + $0x48] sm:$0xff]   ;;  %v1739_v26 = vld [vmem:[%s1903_s30 + $0x50] sm:$0xff]   ;;  %v1741_v28 = vld [vmem:[%s1903_s30 + $0x58] sm:$0xff]  }
  0x1d   : > { %v1738_v25 = vld [vmem:[%s1903_s30 + $0xc8] sm:$0xff]   ;;  %v1740_v27 = vld [vmem:[%s1903_s30 + $0xd0] sm:$0xff]   ;;  %v1742_v29 = vld [vmem:[%s1903_s30 + $0xd8] sm:$0xff]  }
  0x1e   : > { %v1743_v30 = vld [vmem:[%s1903_s30 + $0x60] sm:$0xff]   ;;  %v1745_v32 = vld [vmem:[%s1903_s30 + $0x68] sm:$0xff]   ;;  %v1747_v34 = vld [vmem:[%s1903_s30 + $0x70] sm:$0xff]  }
  0x1f   : > { %v1744_v31 = vld [vmem:[%s1903_s30 + $0xe0] sm:$0xff]   ;;  %v1746_v33 = vld [vmem:[%s1903_s30 + $0xe8] sm:$0xff]   ;;  %v1748_v35 = vld [vmem:[%s1903_s30 + $0xf0] sm:$0xff]  }
  0x20   : > { %1565 = vmatmul.mubr.msk.bf16.gmra.mrb[4].mxu0 %vm439_vm2, %v1725_v12  ;;  %v1749_v36 = vld [vmem:[%s1903_s30 + $0x78] sm:$0xff]  }
  0x21   : > { %1597 = vmatmul.mubr.msk.bf16.gmra.mrb[4].mxu1 %vm439_vm2, %v1726_v13  ;;  %1568 = vmatprep.mubr.msk.bf16.mxu0 %vm439_vm2, %v1727_v14  ;;  %v1750_v37 = vld [vmem:[%s1903_s30 + $0xf8] sm:$0xff]  }
  0x22   : > { %1600 = vmatprep.mubr.msk.bf16.mxu1 %vm439_vm2, %v1728_v15 }
  0x28   : > { %1569 = vmatmul.mubr.msk.bf16.gmra.mrb[8].mxu0 %vm439_vm2, %v1729_v16 }
  0x29   : > { %1601 = vmatmul.mubr.msk.bf16.gmra.mrb[8].mxu1 %vm439_vm2, %v1730_v17  ;;  %1572 = vmatprep.mubr.msk.bf16.mxu0 %vm439_vm2, %v1731_v18 }
  0x2a   : > { %1604 = vmatprep.mubr.msk.bf16.mxu1 %vm439_vm2, %v1732_v19 }
  0x30   : > { %1573 = vmatmul.mubr.msk.bf16.gmra.mrb[12].mxu0 %vm439_vm2, %v1733_v20 }
  0x31   : > { %1605 = vmatmul.mubr.msk.bf16.gmra.mrb[12].mxu1 %vm439_vm2, %v1734_v21  ;;  %1576 = vmatprep.mubr.msk.bf16.mxu0 %vm439_vm2, %v1735_v22 }
  0x32   : > { %1608 = vmatprep.mubr.msk.bf16.mxu1 %vm439_vm2, %v1736_v23 }
  0x38   : > { %1577 = vmatmul.mubr.msk.bf16.gmra.mrb[16].mxu0 %vm439_vm2, %v1737_v24 }
  0x39   : > { %1609 = vmatmul.mubr.msk.bf16.gmra.mrb[16].mxu1 %vm439_vm2, %v1738_v25  ;;  %1580 = vmatprep.mubr.msk.bf16.mxu0 %vm439_vm2, %v1739_v26 }
  0x3a   : > { %1612 = vmatprep.mubr.msk.bf16.mxu1 %vm439_vm2, %v1740_v27 }
  0x40   : > { %1581 = vmatmul.mubr.msk.bf16.gmra.mrb[20].mxu0 %vm439_vm2, %v1741_v28 }
  0x41   : > { %1613 = vmatmul.mubr.msk.bf16.gmra.mrb[20].mxu1 %vm439_vm2, %v1742_v29  ;;  %1584 = vmatprep.mubr.msk.bf16.mxu0 %vm439_vm2, %v1743_v30 }
  0x42   : > { %1616 = vmatprep.mubr.msk.bf16.mxu1 %vm439_vm2, %v1744_v31 }
  0x48   : > { %1585 = vmatmul.mubr.msk.bf16.gmra.mrb[24].mxu0 %vm439_vm2, %v1745_v32 }
  0x49   : > { %1617 = vmatmul.mubr.msk.bf16.gmra.mrb[24].mxu1 %vm439_vm2, %v1746_v33  ;;  %1588 = vmatprep.mubr.msk.bf16.mxu0 %vm439_vm2, %v1747_v34 }
  0x4a   : > { %1620 = vmatprep.mubr.msk.bf16.mxu1 %vm439_vm2, %v1748_v35 }
  0x50   : > { %1589 = vmatmul.mubr.msk.bf16.gmra.mrb[28].mxu0 %vm439_vm2, %v1749_v36 }
  0x51   : > { %1621 = vmatmul.mubr.msk.bf16.gmra.mrb[28].mxu1 %vm439_vm2, %v1750_v37 }
  0xeb   : > { %v1562_v39 = vpop.f32.mrb[0].mxu0 }
  0xec   : > { %v586_v40 = vadd.f32 %v1562_v39, %v1973_v38  ;;  %v1594_v41 = vpop.f32.mrb[0].mxu1  ;;  %v577_v42 = vpop.f32.mrb[1].mxu0 }
  0xed   : > { %v714_v43 = vadd.f32 %v1594_v41, %v1973_v38  ;;  %v578_v44 = vadd.f32 %v1973_v38, %v577_v42  ;;  %v705_v45 = vpop.f32.mrb[1].mxu1  ;;  %v1563_v46 = vpop.f32.mrb[2].mxu0 }
  0xee   : > { %v834_v47 = vmax.f32 %v586_v40, 0.0  ;;  %v706_v48 = vadd.f32 %v1973_v38, %v705_v45  ;;  %v589_v49 = vadd.f32 %v1563_v46, %v1973_v38  ;;  %v1595_v50 = vpop.f32.mrb[2].mxu1  ;;  %v580_v51 = vpop.f32.mrb[3].mxu0 }
  0xef   : > { %v866_v52 = vmax.f32 %v714_v43, 0.0  ;;  %v832_v53 = vmax.f32 %v578_v44, 0.0  ;;  %v717_v54 = vadd.f32 %v1595_v50, %v1973_v38  ;;  %v581_v55 = vadd.f32 %v1973_v38, %v580_v51  ;;  %v708_v56 = vpop.f32.mrb[3].mxu1 }
  0xf0   : > { %899 = vst.msk [vmem:[%s1982_s8 + $0x10] sm:$0xff] %vm896_vm3, %v834_v47  ;;  %v864_v57 = vmax.f32 %v706_v48, 0.0  ;;  %v835_v58 = vmax.f32 %v589_v49, 0.0  ;;  %v709_v59 = vadd.f32 %v1973_v38, %v708_v56 }
  0xf1   : > { %931 = vst.msk [vmem:[%s1982_s8 + $0x110] sm:$0xff] %vm896_vm3, %v866_v52  ;;  %897 = vst.msk [vmem:[%s1982_s8] sm:$0xff] %vm896_vm3, %v832_v53  ;;  %v867_v60 = vmax.f32 %v717_v54, 0.0  ;;  %v833_v61 = vmax.f32 %v581_v55, 0.0 }
  0xf2   : > { %929 = vst.msk [vmem:[%s1982_s8 + $0x100] sm:$0xff] %vm896_vm3, %v864_v57  ;;  %900 = vst.msk [vmem:[%s1982_s8 + $0x18] sm:$0xff] %vm896_vm3, %v835_v58  ;;  %v865_v62 = vmax.f32 %v709_v59, 0.0 }
  0xf3   : > { %932 = vst.msk [vmem:[%s1982_s8 + $0x118] sm:$0xff] %vm896_vm3, %v867_v60  ;;  %898 = vst.msk [vmem:[%s1982_s8 + $0x8] sm:$0xff] %vm896_vm3, %v833_v61  ;;  %v1566_v63 = vpop.f32.mrb[4].mxu0 }
  0xf4   : > { %930 = vst.msk [vmem:[%s1982_s8 + $0x108] sm:$0xff] %vm896_vm3, %v865_v62  ;;  %v602_v0 = vadd.f32 %v1566_v63, %v1973_v38  ;;  %v1598_v1 = vpop.f32.mrb[4].mxu1  ;;  %v593_v2 = vpop.f32.mrb[5].mxu0 }
  0xf5   : > { %v730_v3 = vadd.f32 %v1598_v1, %v1973_v38  ;;  %v594_v4 = vadd.f32 %v1973_v38, %v593_v2  ;;  %v721_v5 = vpop.f32.mrb[5].mxu1  ;;  %v1567_v6 = vpop.f32.mrb[6].mxu0 }
  0xf6   : > { %v838_v7 = vmax.f32 %v602_v0, 0.0  ;;  %v722_v8 = vadd.f32 %v1973_v38, %v721_v5  ;;  %v605_v9 = vadd.f32 %v1567_v6, %v1973_v38  ;;  %v1599_v10 = vpop.f32.mrb[6].mxu1  ;;  %v596_v11 = vpop.f32.mrb[7].mxu0 }
  0xf7   : > { %v870_v12 = vmax.f32 %v730_v3, 0.0  ;;  %v836_v13 = vmax.f32 %v594_v4, 0.0  ;;  %v733_v14 = vadd.f32 %v1599_v10, %v1973_v38  ;;  %v597_v15 = vadd.f32 %v1973_v38, %v596_v11  ;;  %v724_v16 = vpop.f32.mrb[7].mxu1 }
  0xf8   : > { %903 = vst.msk [vmem:[%s1982_s8 + $0x30] sm:$0xff] %vm896_vm3, %v838_v7  ;;  %v868_v17 = vmax.f32 %v722_v8, 0.0  ;;  %v839_v18 = vmax.f32 %v605_v9, 0.0  ;;  %v725_v19 = vadd.f32 %v1973_v38, %v724_v16 }
  0xf9   : > { %935 = vst.msk [vmem:[%s1982_s8 + $0x130] sm:$0xff] %vm896_vm3, %v870_v12  ;;  %901 = vst.msk [vmem:[%s1982_s8 + $0x20] sm:$0xff] %vm896_vm3, %v836_v13  ;;  %v871_v20 = vmax.f32 %v733_v14, 0.0  ;;  %v837_v21 = vmax.f32 %v597_v15, 0.0 }
  0xfa   : > { %933 = vst.msk [vmem:[%s1982_s8 + $0x120] sm:$0xff] %vm896_vm3, %v868_v17  ;;  %904 = vst.msk [vmem:[%s1982_s8 + $0x38] sm:$0xff] %vm896_vm3, %v839_v18  ;;  %v869_v22 = vmax.f32 %v725_v19, 0.0 }
  0xfb   : > { %936 = vst.msk [vmem:[%s1982_s8 + $0x138] sm:$0xff] %vm896_vm3, %v871_v20  ;;  %902 = vst.msk [vmem:[%s1982_s8 + $0x28] sm:$0xff] %vm896_vm3, %v837_v21  ;;  %v1570_v23 = vpop.f32.mrb[8].mxu0 }
  0xfc   : > { %934 = vst.msk [vmem:[%s1982_s8 + $0x128] sm:$0xff] %vm896_vm3, %v869_v22  ;;  %v618_v24 = vadd.f32 %v1570_v23, %v1973_v38  ;;  %v1602_v25 = vpop.f32.mrb[8].mxu1  ;;  %v609_v26 = vpop.f32.mrb[9].mxu0 }
  0xfd   : > { %v746_v27 = vadd.f32 %v1602_v25, %v1973_v38  ;;  %v610_v28 = vadd.f32 %v1973_v38, %v609_v26  ;;  %v737_v29 = vpop.f32.mrb[9].mxu1  ;;  %v1571_v30 = vpop.f32.mrb[10].mxu0 }
  0xfe   : > { %v842_v31 = vmax.f32 %v618_v24, 0.0  ;;  %v738_v32 = vadd.f32 %v1973_v38, %v737_v29  ;;  %v621_v33 = vadd.f32 %v1571_v30, %v1973_v38  ;;  %v1603_v34 = vpop.f32.mrb[10].mxu1  ;;  %v612_v35 = vpop.f32.mrb[11].mxu0 }
  0xff   : > { %v874_v36 = vmax.f32 %v746_v27, 0.0  ;;  %v840_v37 = vmax.f32 %v610_v28, 0.0  ;;  %v749_v39 = vadd.f32 %v1603_v34, %v1973_v38  ;;  %v613_v40 = vadd.f32 %v1973_v38, %v612_v35  ;;  %v740_v41 = vpop.f32.mrb[11].mxu1 }
 0x100   : > { %907 = vst.msk [vmem:[%s1982_s8 + $0x50] sm:$0xff] %vm896_vm3, %v842_v31  ;;  %v872_v42 = vmax.f32 %v738_v32, 0.0  ;;  %v843_v43 = vmax.f32 %v621_v33, 0.0  ;;  %v741_v44 = vadd.f32 %v1973_v38, %v740_v41 }
 0x101   : > { %939 = vst.msk [vmem:[%s1982_s8 + $0x150] sm:$0xff] %vm896_vm3, %v874_v36  ;;  %905 = vst.msk [vmem:[%s1982_s8 + $0x40] sm:$0xff] %vm896_vm3, %v840_v37  ;;  %v875_v45 = vmax.f32 %v749_v39, 0.0  ;;  %v841_v46 = vmax.f32 %v613_v40, 0.0 }
 0x102   : > { %937 = vst.msk [vmem:[%s1982_s8 + $0x140] sm:$0xff] %vm896_vm3, %v872_v42  ;;  %908 = vst.msk [vmem:[%s1982_s8 + $0x58] sm:$0xff] %vm896_vm3, %v843_v43  ;;  %v873_v47 = vmax.f32 %v741_v44, 0.0 }
 0x103   : > { %940 = vst.msk [vmem:[%s1982_s8 + $0x158] sm:$0xff] %vm896_vm3, %v875_v45  ;;  %906 = vst.msk [vmem:[%s1982_s8 + $0x48] sm:$0xff] %vm896_vm3, %v841_v46  ;;  %v1574_v48 = vpop.f32.mrb[12].mxu0 }
 0x104   : > { %938 = vst.msk [vmem:[%s1982_s8 + $0x148] sm:$0xff] %vm896_vm3, %v873_v47  ;;  %v634_v49 = vadd.f32 %v1574_v48, %v1973_v38  ;;  %v1606_v50 = vpop.f32.mrb[12].mxu1  ;;  %v625_v51 = vpop.f32.mrb[13].mxu0 }
 0x105   : > { %v762_v52 = vadd.f32 %v1606_v50, %v1973_v38  ;;  %v626_v53 = vadd.f32 %v1973_v38, %v625_v51  ;;  %v753_v54 = vpop.f32.mrb[13].mxu1  ;;  %v1575_v55 = vpop.f32.mrb[14].mxu0 }
 0x106   : > { %v846_v56 = vmax.f32 %v634_v49, 0.0  ;;  %v754_v57 = vadd.f32 %v1973_v38, %v753_v54  ;;  %v637_v58 = vadd.f32 %v1575_v55, %v1973_v38  ;;  %v1607_v59 = vpop.f32.mrb[14].mxu1  ;;  %v628_v60 = vpop.f32.mrb[15].mxu0 }
 0x107   : > { %v878_v61 = vmax.f32 %v762_v52, 0.0  ;;  %v844_v62 = vmax.f32 %v626_v53, 0.0  ;;  %v765_v63 = vadd.f32 %v1607_v59, %v1973_v38  ;;  %v629_v0 = vadd.f32 %v1973_v38, %v628_v60  ;;  %v756_v1 = vpop.f32.mrb[15].mxu1 }
 0x108   : > { %911 = vst.msk [vmem:[%s1982_s8 + $0x70] sm:$0xff] %vm896_vm3, %v846_v56  ;;  %v876_v2 = vmax.f32 %v754_v57, 0.0  ;;  %v847_v3 = vmax.f32 %v637_v58, 0.0  ;;  %v757_v4 = vadd.f32 %v1973_v38, %v756_v1 }
 0x109   : > { %943 = vst.msk [vmem:[%s1982_s8 + $0x170] sm:$0xff] %vm896_vm3, %v878_v61  ;;  %909 = vst.msk [vmem:[%s1982_s8 + $0x60] sm:$0xff] %vm896_vm3, %v844_v62  ;;  %v879_v5 = vmax.f32 %v765_v63, 0.0  ;;  %v845_v6 = vmax.f32 %v629_v0, 0.0 }
 0x10a   : > { %941 = vst.msk [vmem:[%s1982_s8 + $0x160] sm:$0xff] %vm896_vm3, %v876_v2  ;;  %912 = vst.msk [vmem:[%s1982_s8 + $0x78] sm:$0xff] %vm896_vm3, %v847_v3  ;;  %v877_v7 = vmax.f32 %v757_v4, 0.0 }
 0x10b   : > { %944 = vst.msk [vmem:[%s1982_s8 + $0x178] sm:$0xff] %vm896_vm3, %v879_v5  ;;  %910 = vst.msk [vmem:[%s1982_s8 + $0x68] sm:$0xff] %vm896_vm3, %v845_v6  ;;  %v1578_v8 = vpop.f32.mrb[16].mxu0 }
 0x10c   : > { %942 = vst.msk [vmem:[%s1982_s8 + $0x168] sm:$0xff] %vm896_vm3, %v877_v7  ;;  %v650_v9 = vadd.f32 %v1578_v8, %v1973_v38  ;;  %v1610_v10 = vpop.f32.mrb[16].mxu1  ;;  %v641_v11 = vpop.f32.mrb[17].mxu0 }
 0x10d   : > { %v778_v12 = vadd.f32 %v1610_v10, %v1973_v38  ;;  %v642_v13 = vadd.f32 %v1973_v38, %v641_v11  ;;  %v769_v14 = vpop.f32.mrb[17].mxu1  ;;  %v1579_v15 = vpop.f32.mrb[18].mxu0 }
 0x10e   : > { %v850_v16 = vmax.f32 %v650_v9, 0.0  ;;  %v770_v17 = vadd.f32 %v1973_v38, %v769_v14  ;;  %v653_v18 = vadd.f32 %v1579_v15, %v1973_v38  ;;  %v1611_v19 = vpop.f32.mrb[18].mxu1  ;;  %v644_v20 = vpop.f32.mrb[19].mxu0 }
 0x10f   : > { %v882_v21 = vmax.f32 %v778_v12, 0.0  ;;  %v848_v22 = vmax.f32 %v642_v13, 0.0  ;;  %v781_v23 = vadd.f32 %v1611_v19, %v1973_v38  ;;  %v645_v24 = vadd.f32 %v1973_v38, %v644_v20  ;;  %v772_v25 = vpop.f32.mrb[19].mxu1 }
 0x110   : > { %915 = vst.msk [vmem:[%s1982_s8 + $0x90] sm:$0xff] %vm896_vm3, %v850_v16  ;;  %v880_v26 = vmax.f32 %v770_v17, 0.0  ;;  %v851_v27 = vmax.f32 %v653_v18, 0.0  ;;  %v773_v28 = vadd.f32 %v1973_v38, %v772_v25 }
 0x111   : > { %947 = vst.msk [vmem:[%s1982_s8 + $0x190] sm:$0xff] %vm896_vm3, %v882_v21  ;;  %913 = vst.msk [vmem:[%s1982_s8 + $0x80] sm:$0xff] %vm896_vm3, %v848_v22  ;;  %v883_v29 = vmax.f32 %v781_v23, 0.0  ;;  %v849_v30 = vmax.f32 %v645_v24, 0.0 }
 0x112   : > { %945 = vst.msk [vmem:[%s1982_s8 + $0x180] sm:$0xff] %vm896_vm3, %v880_v26  ;;  %916 = vst.msk [vmem:[%s1982_s8 + $0x98] sm:$0xff] %vm896_vm3, %v851_v27  ;;  %v881_v31 = vmax.f32 %v773_v28, 0.0 }
 0x113   : > { %948 = vst.msk [vmem:[%s1982_s8 + $0x198] sm:$0xff] %vm896_vm3, %v883_v29  ;;  %914 = vst.msk [vmem:[%s1982_s8 + $0x88] sm:$0xff] %vm896_vm3, %v849_v30  ;;  %v1582_v32 = vpop.f32.mrb[20].mxu0 }
 0x114   : > { %946 = vst.msk [vmem:[%s1982_s8 + $0x188] sm:$0xff] %vm896_vm3, %v881_v31  ;;  %v666_v33 = vadd.f32 %v1582_v32, %v1973_v38  ;;  %v1614_v34 = vpop.f32.mrb[20].mxu1  ;;  %v657_v35 = vpop.f32.mrb[21].mxu0 }
 0x115   : > { %v794_v36 = vadd.f32 %v1614_v34, %v1973_v38  ;;  %v658_v37 = vadd.f32 %v1973_v38, %v657_v35  ;;  %v785_v39 = vpop.f32.mrb[21].mxu1  ;;  %v1583_v40 = vpop.f32.mrb[22].mxu0 }
 0x116   : > { %v854_v41 = vmax.f32 %v666_v33, 0.0  ;;  %v786_v42 = vadd.f32 %v1973_v38, %v785_v39  ;;  %v669_v43 = vadd.f32 %v1583_v40, %v1973_v38  ;;  %v1615_v44 = vpop.f32.mrb[22].mxu1  ;;  %v660_v45 = vpop.f32.mrb[23].mxu0 }
 0x117   : > { %v886_v46 = vmax.f32 %v794_v36, 0.0  ;;  %v852_v47 = vmax.f32 %v658_v37, 0.0  ;;  %v797_v48 = vadd.f32 %v1615_v44, %v1973_v38  ;;  %v661_v49 = vadd.f32 %v1973_v38, %v660_v45  ;;  %v788_v50 = vpop.f32.mrb[23].mxu1 }
 0x118   : > { %919 = vst.msk [vmem:[%s1982_s8 + $0xb0] sm:$0xff] %vm896_vm3, %v854_v41  ;;  %v884_v51 = vmax.f32 %v786_v42, 0.0  ;;  %v855_v52 = vmax.f32 %v669_v43, 0.0  ;;  %v789_v53 = vadd.f32 %v1973_v38, %v788_v50 }
 0x119   : > { %951 = vst.msk [vmem:[%s1982_s8 + $0x1b0] sm:$0xff] %vm896_vm3, %v886_v46  ;;  %917 = vst.msk [vmem:[%s1982_s8 + $0xa0] sm:$0xff] %vm896_vm3, %v852_v47  ;;  %v887_v54 = vmax.f32 %v797_v48, 0.0  ;;  %v853_v55 = vmax.f32 %v661_v49, 0.0 }
 0x11a   : > { %949 = vst.msk [vmem:[%s1982_s8 + $0x1a0] sm:$0xff] %vm896_vm3, %v884_v51  ;;  %920 = vst.msk [vmem:[%s1982_s8 + $0xb8] sm:$0xff] %vm896_vm3, %v855_v52  ;;  %v885_v56 = vmax.f32 %v789_v53, 0.0 }
 0x11b   : > { %952 = vst.msk [vmem:[%s1982_s8 + $0x1b8] sm:$0xff] %vm896_vm3, %v887_v54  ;;  %918 = vst.msk [vmem:[%s1982_s8 + $0xa8] sm:$0xff] %vm896_vm3, %v853_v55  ;;  %v1586_v57 = vpop.f32.mrb[24].mxu0 }
 0x11c   : > { %950 = vst.msk [vmem:[%s1982_s8 + $0x1a8] sm:$0xff] %vm896_vm3, %v885_v56  ;;  %v682_v58 = vadd.f32 %v1586_v57, %v1973_v38  ;;  %v1618_v59 = vpop.f32.mrb[24].mxu1  ;;  %v673_v60 = vpop.f32.mrb[25].mxu0 }
 0x11d   : > { %v810_v61 = vadd.f32 %v1618_v59, %v1973_v38  ;;  %v674_v62 = vadd.f32 %v1973_v38, %v673_v60  ;;  %v801_v63 = vpop.f32.mrb[25].mxu1  ;;  %v1587_v0 = vpop.f32.mrb[26].mxu0 }
 0x11e   : > { %v858_v1 = vmax.f32 %v682_v58, 0.0  ;;  %v802_v2 = vadd.f32 %v1973_v38, %v801_v63  ;;  %v685_v3 = vadd.f32 %v1587_v0, %v1973_v38  ;;  %v1619_v4 = vpop.f32.mrb[26].mxu1  ;;  %v676_v5 = vpop.f32.mrb[27].mxu0 }
 0x11f   : > { %v890_v6 = vmax.f32 %v810_v61, 0.0  ;;  %v856_v7 = vmax.f32 %v674_v62, 0.0  ;;  %v813_v8 = vadd.f32 %v1619_v4, %v1973_v38  ;;  %v677_v9 = vadd.f32 %v1973_v38, %v676_v5  ;;  %v804_v10 = vpop.f32.mrb[27].mxu1 }
 0x120   : > { %923 = vst.msk [vmem:[%s1982_s8 + $0xd0] sm:$0xff] %vm896_vm3, %v858_v1  ;;  %v888_v11 = vmax.f32 %v802_v2, 0.0  ;;  %v859_v12 = vmax.f32 %v685_v3, 0.0  ;;  %v805_v13 = vadd.f32 %v1973_v38, %v804_v10 }
 0x121   : > { %955 = vst.msk [vmem:[%s1982_s8 + $0x1d0] sm:$0xff] %vm896_vm3, %v890_v6  ;;  %921 = vst.msk [vmem:[%s1982_s8 + $0xc0] sm:$0xff] %vm896_vm3, %v856_v7  ;;  %v891_v14 = vmax.f32 %v813_v8, 0.0  ;;  %v857_v15 = vmax.f32 %v677_v9, 0.0 }
 0x122   : > { %953 = vst.msk [vmem:[%s1982_s8 + $0x1c0] sm:$0xff] %vm896_vm3, %v888_v11  ;;  %924 = vst.msk [vmem:[%s1982_s8 + $0xd8] sm:$0xff] %vm896_vm3, %v859_v12  ;;  %v889_v16 = vmax.f32 %v805_v13, 0.0 }
 0x123   : > { %956 = vst.msk [vmem:[%s1982_s8 + $0x1d8] sm:$0xff] %vm896_vm3, %v891_v14  ;;  %922 = vst.msk [vmem:[%s1982_s8 + $0xc8] sm:$0xff] %vm896_vm3, %v857_v15  ;;  %v1590_v17 = vpop.f32.mrb[28].mxu0 }
 0x124   : > { %954 = vst.msk [vmem:[%s1982_s8 + $0x1c8] sm:$0xff] %vm896_vm3, %v889_v16  ;;  %v698_v18 = vadd.f32 %v1590_v17, %v1973_v38  ;;  %v1622_v19 = vpop.f32.mrb[28].mxu1  ;;  %v689_v20 = vpop.f32.mrb[29].mxu0 }
 0x125   : > { %v826_v21 = vadd.f32 %v1622_v19, %v1973_v38  ;;  %v690_v22 = vadd.f32 %v1973_v38, %v689_v20  ;;  %v817_v23 = vpop.f32.mrb[29].mxu1  ;;  %v1591_v24 = vpop.f32.mrb[30].mxu0 }
 0x126   : > { %v862_v25 = vmax.f32 %v698_v18, 0.0  ;;  %v818_v26 = vadd.f32 %v1973_v38, %v817_v23  ;;  %v701_v27 = vadd.f32 %v1591_v24, %v1973_v38  ;;  %v1623_v28 = vpop.f32.mrb[30].mxu1  ;;  %v692_v29 = vpop.f32.mrb[31].mxu0  ;;  %967 = sbr.rel (!%p1885_p4) target bundleno = 373 (0x175), region = 36 }
 0x127   : > { %v894_v30 = vmax.f32 %v826_v21, 0.0  ;;  %v860_v31 = vmax.f32 %v690_v22, 0.0  ;;  %v829_v32 = vadd.f32 %v1623_v28, %v1973_v38  ;;  %v693_v33 = vadd.f32 %v1973_v38, %v692_v29  ;;  %v820_v34 = vpop.f32.mrb[31].mxu1 }
 0x128   : > { %927 = vst.msk [vmem:[%s1982_s8 + $0xf0] sm:$0xff] %vm896_vm3, %v862_v25  ;;  %v892_v35 = vmax.f32 %v818_v26, 0.0  ;;  %v863_v36 = vmax.f32 %v701_v27, 0.0  ;;  %v821_v37 = vadd.f32 %v1973_v38, %v820_v34 }
 0x129   : > { %959 = vst.msk [vmem:[%s1982_s8 + $0x1f0] sm:$0xff] %vm896_vm3, %v894_v30  ;;  %925 = vst.msk [vmem:[%s1982_s8 + $0xe0] sm:$0xff] %vm896_vm3, %v860_v31  ;;  %v895_v39 = vmax.f32 %v829_v32, 0.0  ;;  %v861_v40 = vmax.f32 %v693_v33, 0.0 }
 0x12a   : > { %957 = vst.msk [vmem:[%s1982_s8 + $0x1e0] sm:$0xff] %vm896_vm3, %v892_v35  ;;  %928 = vst.msk [vmem:[%s1982_s8 + $0xf8] sm:$0xff] %vm896_vm3, %v863_v36  ;;  %v893_v41 = vmax.f32 %v821_v37, 0.0 }
 0x12b   : > { %960 = vst.msk [vmem:[%s1982_s8 + $0x1f8] sm:$0xff] %vm896_vm3, %v895_v39  ;;  %926 = vst.msk [vmem:[%s1982_s8 + $0xe8] sm:$0xff] %vm896_vm3, %v861_v40 }
 0x12c   : > { %958 = vst.msk [vmem:[%s1982_s8 + $0x1e8] sm:$0xff] %vm896_vm3, %v893_v41 }
 0x12d   : > { %s2389_s9 = smov (!%p970_p8, %s969_s9), 64 }
 0x12e   : > { %s1504_s17 = sshll.u32 %s2389_s9, 7 }
 0x12f   : > { %p1507_p9 = scmp.eq.s32.totalorder %s1504_s17, 0 }
 0x130   : > { %s2182_s18 = sshrl.u32 (!%p1507_p9), %s2389_s9, 6 }
 0x131   : > { %978 = sbr.rel (%p1507_p9) target bundleno = 373 (0x175), region = 40  ;;  %p1508_p10 = scmp.le.s32.totalorder (!%p1507_p9), %s2182_s18, 0 }
 0x138   : > { %1384 = sbr.rel (%p1508_p10) target bundleno = 352 (0x160), region = 116  ;;  %s2380_s15 = smov (!%p1508_p10), %s2176_s14 }
 0x139   : > { %s2381_s20 = smov (!%p1508_p10), %s1982_s8  ;;  %s2191_s21 = smov (!%p1508_p10), 0  }
 0x13a   : > { %s2193_s22 = smov (!%p1508_p10), 0  }
 0x13f LB: >> { %v1166_v38 = vld [vmem:[%s1813_s20] sm:$0xff]  ;;  %v1168_v42 = vld [vmem:[%s1813_s20 + $0x8] sm:$0xff]  ;;  %v1170_v43 = vld [vmem:[%s1813_s20 + $0x10] sm:$0xff]  ;;  %s1294_s23 = sadd.s32 1, %s1817_s21  ;;  %s1160_s22 = sadd.s32 1, %s1821_s22   ;;  %s1821_s22 = sphi %s2193_s22, %s1160_s22   ;;  %s1817_s21 = sphi %s2191_s21, %s2384_s21   ;;  %s1813_s20 = sphi %s2381_s20, %s2383_s20   ;;  %s1809_s15 = sphi %s2380_s15, %s2382_s15  }
 0x140   : >> { %1167 = vst [vmem:[%s1809_s15] sm:$0xff] %v1166_v38  ;;  %1169 = vst [vmem:[%s1809_s15 + $0x8] sm:$0xff] %v1168_v42  ;;  %v1172_v44 = vld [vmem:[%s1813_s20 + $0x18] sm:$0xff]  ;;  %v1174_v45 = vld [vmem:[%s1813_s20 + $0x20] sm:$0xff]  ;;  %p1295_p11 = scmp.ge.s32.totalorder %s1294_s23, %s2182_s18  ;;  %p1159_p12 = scmp.ge.s32.totalorder %s1160_s22, %s2182_s18 }
 0x141   : >> { %1171 = vst [vmem:[%s1809_s15 + $0x10] sm:$0xff] %v1170_v43  ;;  %v1176_v46 = vld [vmem:[%s1813_s20 + $0x28] sm:$0xff]  ;;  %1173 = vst [vmem:[%s1809_s15 + $0x18] sm:$0xff] %v1172_v44  ;;  %v1178_v47 = vld [vmem:[%s1813_s20 + $0x30] sm:$0xff] }
 0x142   : >> { %1175 = vst [vmem:[%s1809_s15 + $0x20] sm:$0xff] %v1174_v45  ;;  %1177 = vst [vmem:[%s1809_s15 + $0x28] sm:$0xff] %v1176_v46  ;;  %v1180_v48 = vld [vmem:[%s1813_s20 + $0x38] sm:$0xff]  ;;  %v1182_v49 = vld [vmem:[%s1813_s20 + $0x40] sm:$0xff]  ;;  %s2391_s23 = smov (%p1295_p11, %s1294_s23), 0 }
 0x143   : >> { %1179 = vst [vmem:[%s1809_s15 + $0x30] sm:$0xff] %v1178_v47  ;;  %1181 = vst [vmem:[%s1809_s15 + $0x38] sm:$0xff] %v1180_v48  ;;  %v1184_v50 = vld [vmem:[%s1813_s20 + $0x48] sm:$0xff]  ;;  %v1186_v51 = vld [vmem:[%s1813_s20 + $0x50] sm:$0xff]  ;;  %s1509_s24 = sshll.u32 %s2391_s23, 9  ;;  %s2384_s21 = smov %s2391_s23 }
 0x144   : >> { %1183 = vst [vmem:[%s1809_s15 + $0x40] sm:$0xff] %v1182_v49  ;;  %v1188_v52 = vld [vmem:[%s1813_s20 + $0x58] sm:$0xff]  ;;  %1185 = vst [vmem:[%s1809_s15 + $0x48] sm:$0xff] %v1184_v50  ;;  %v1190_v53 = vld [vmem:[%s1813_s20 + $0x60] sm:$0xff]  ;;  %s2249_s25 = scalar_lea.vmem %s1982_s8, %s1509_s24 [#allocation2]   ;;  %s2252_s26 = scalar_lea.vmem %s2176_s14, %s1509_s24  }
 0x145   : >> { %1187 = vst [vmem:[%s1809_s15 + $0x50] sm:$0xff] %v1186_v51  ;;  %1189 = vst [vmem:[%s1809_s15 + $0x58] sm:$0xff] %v1188_v52  ;;  %v1192_v54 = vld [vmem:[%s1813_s20 + $0x68] sm:$0xff]  ;;  %v1194_v55 = vld [vmem:[%s1813_s20 + $0x70] sm:$0xff] }
 0x146   : >> { %1191 = vst [vmem:[%s1809_s15 + $0x60] sm:$0xff] %v1190_v53  ;;  %1193 = vst [vmem:[%s1809_s15 + $0x68] sm:$0xff] %v1192_v54  ;;  %v1196_v56 = vld [vmem:[%s1813_s20 + $0x78] sm:$0xff]  ;;  %v1198_v57 = vld [vmem:[%s1813_s20 + $0x80] sm:$0xff] }
 0x147   : >> { %1195 = vst [vmem:[%s1809_s15 + $0x70] sm:$0xff] %v1194_v55  ;;  %v1200_v58 = vld [vmem:[%s1813_s20 + $0x88] sm:$0xff]  ;;  %1197 = vst [vmem:[%s1809_s15 + $0x78] sm:$0xff] %v1196_v56  ;;  %v1202_v59 = vld [vmem:[%s1813_s20 + $0x90] sm:$0xff] }
 0x148   : >> { %1199 = vst [vmem:[%s1809_s15 + $0x80] sm:$0xff] %v1198_v57  ;;  %1201 = vst [vmem:[%s1809_s15 + $0x88] sm:$0xff] %v1200_v58  ;;  %v1204_v60 = vld [vmem:[%s1813_s20 + $0x98] sm:$0xff]  ;;  %v1206_v61 = vld [vmem:[%s1813_s20 + $0xa0] sm:$0xff] }
 0x149   : >> { %1203 = vst [vmem:[%s1809_s15 + $0x90] sm:$0xff] %v1202_v59  ;;  %1205 = vst [vmem:[%s1809_s15 + $0x98] sm:$0xff] %v1204_v60  ;;  %v1208_v62 = vld [vmem:[%s1813_s20 + $0xa8] sm:$0xff]  ;;  %v1210_v63 = vld [vmem:[%s1813_s20 + $0xb0] sm:$0xff] }
 0x14a   : >> { %1207 = vst [vmem:[%s1809_s15 + $0xa0] sm:$0xff] %v1206_v61  ;;  %v1212_v0 = vld [vmem:[%s1813_s20 + $0xb8] sm:$0xff]  ;;  %1209 = vst [vmem:[%s1809_s15 + $0xa8] sm:$0xff] %v1208_v62  ;;  %v1214_v1 = vld [vmem:[%s1813_s20 + $0xc0] sm:$0xff] }
 0x14b   : >> { %1211 = vst [vmem:[%s1809_s15 + $0xb0] sm:$0xff] %v1210_v63  ;;  %1213 = vst [vmem:[%s1809_s15 + $0xb8] sm:$0xff] %v1212_v0  ;;  %v1216_v2 = vld [vmem:[%s1813_s20 + $0xc8] sm:$0xff]  ;;  %v1218_v3 = vld [vmem:[%s1813_s20 + $0xd0] sm:$0xff] }
 0x14c   : >> { %1215 = vst [vmem:[%s1809_s15 + $0xc0] sm:$0xff] %v1214_v1  ;;  %1217 = vst [vmem:[%s1809_s15 + $0xc8] sm:$0xff] %v1216_v2  ;;  %v1220_v4 = vld [vmem:[%s1813_s20 + $0xd8] sm:$0xff]  ;;  %v1222_v5 = vld [vmem:[%s1813_s20 + $0xe0] sm:$0xff] }
 0x14d   : >> { %1219 = vst [vmem:[%s1809_s15 + $0xd0] sm:$0xff] %v1218_v3  ;;  %v1224_v6 = vld [vmem:[%s1813_s20 + $0xe8] sm:$0xff]  ;;  %1221 = vst [vmem:[%s1809_s15 + $0xd8] sm:$0xff] %v1220_v4  ;;  %v1226_v7 = vld [vmem:[%s1813_s20 + $0xf0] sm:$0xff] }
 0x14e   : >> { %1223 = vst [vmem:[%s1809_s15 + $0xe0] sm:$0xff] %v1222_v5  ;;  %1225 = vst [vmem:[%s1809_s15 + $0xe8] sm:$0xff] %v1224_v6  ;;  %v1228_v8 = vld [vmem:[%s1813_s20 + $0xf8] sm:$0xff]  ;;  %v1230_v9 = vld [vmem:[%s1813_s20 + $0x100] sm:$0xff] }
 0x14f   : >> { %1227 = vst [vmem:[%s1809_s15 + $0xf0] sm:$0xff] %v1226_v7  ;;  %1229 = vst [vmem:[%s1809_s15 + $0xf8] sm:$0xff] %v1228_v8  ;;  %v1232_v10 = vld [vmem:[%s1813_s20 + $0x108] sm:$0xff]  ;;  %v1234_v11 = vld [vmem:[%s1813_s20 + $0x110] sm:$0xff] }
 0x150   : >> { %1231 = vst [vmem:[%s1809_s15 + $0x100] sm:$0xff] %v1230_v9  ;;  %v1236_v12 = vld [vmem:[%s1813_s20 + $0x118] sm:$0xff]  ;;  %1233 = vst [vmem:[%s1809_s15 + $0x108] sm:$0xff] %v1232_v10  ;;  %v1238_v13 = vld [vmem:[%s1813_s20 + $0x120] sm:$0xff] }
 0x151   : >> { %1235 = vst [vmem:[%s1809_s15 + $0x110] sm:$0xff] %v1234_v11  ;;  %1237 = vst [vmem:[%s1809_s15 + $0x118] sm:$0xff] %v1236_v12  ;;  %v1240_v14 = vld [vmem:[%s1813_s20 + $0x128] sm:$0xff]  ;;  %v1242_v15 = vld [vmem:[%s1813_s20 + $0x130] sm:$0xff] }
 0x152   : >> { %1239 = vst [vmem:[%s1809_s15 + $0x120] sm:$0xff] %v1238_v13  ;;  %1241 = vst [vmem:[%s1809_s15 + $0x128] sm:$0xff] %v1240_v14  ;;  %v1244_v16 = vld [vmem:[%s1813_s20 + $0x138] sm:$0xff]  ;;  %v1246_v17 = vld [vmem:[%s1813_s20 + $0x140] sm:$0xff] }
 0x153   : >> { %1243 = vst [vmem:[%s1809_s15 + $0x130] sm:$0xff] %v1242_v15  ;;  %v1248_v18 = vld [vmem:[%s1813_s20 + $0x148] sm:$0xff]  ;;  %1245 = vst [vmem:[%s1809_s15 + $0x138] sm:$0xff] %v1244_v16  ;;  %v1250_v19 = vld [vmem:[%s1813_s20 + $0x150] sm:$0xff] }
 0x154   : >> { %1247 = vst [vmem:[%s1809_s15 + $0x140] sm:$0xff] %v1246_v17  ;;  %1249 = vst [vmem:[%s1809_s15 + $0x148] sm:$0xff] %v1248_v18  ;;  %v1252_v20 = vld [vmem:[%s1813_s20 + $0x158] sm:$0xff]  ;;  %v1254_v21 = vld [vmem:[%s1813_s20 + $0x160] sm:$0xff] }
 0x155   : >> { %1251 = vst [vmem:[%s1809_s15 + $0x150] sm:$0xff] %v1250_v19  ;;  %1253 = vst [vmem:[%s1809_s15 + $0x158] sm:$0xff] %v1252_v20  ;;  %v1256_v22 = vld [vmem:[%s1813_s20 + $0x168] sm:$0xff]  ;;  %v1258_v23 = vld [vmem:[%s1813_s20 + $0x170] sm:$0xff] }
 0x156   : >> { %1255 = vst [vmem:[%s1809_s15 + $0x160] sm:$0xff] %v1254_v21  ;;  %v1260_v24 = vld [vmem:[%s1813_s20 + $0x178] sm:$0xff]  ;;  %1257 = vst [vmem:[%s1809_s15 + $0x168] sm:$0xff] %v1256_v22  ;;  %v1262_v25 = vld [vmem:[%s1813_s20 + $0x180] sm:$0xff] }
 0x157   : >> { %1259 = vst [vmem:[%s1809_s15 + $0x170] sm:$0xff] %v1258_v23  ;;  %1261 = vst [vmem:[%s1809_s15 + $0x178] sm:$0xff] %v1260_v24  ;;  %v1264_v26 = vld [vmem:[%s1813_s20 + $0x188] sm:$0xff]  ;;  %v1266_v27 = vld [vmem:[%s1813_s20 + $0x190] sm:$0xff] }
 0x158   : >> { %1263 = vst [vmem:[%s1809_s15 + $0x180] sm:$0xff] %v1262_v25  ;;  %1265 = vst [vmem:[%s1809_s15 + $0x188] sm:$0xff] %v1264_v26  ;;  %v1268_v28 = vld [vmem:[%s1813_s20 + $0x198] sm:$0xff]  ;;  %v1270_v29 = vld [vmem:[%s1813_s20 + $0x1a0] sm:$0xff] }
 0x159   : >> { %1267 = vst [vmem:[%s1809_s15 + $0x190] sm:$0xff] %v1266_v27  ;;  %v1272_v30 = vld [vmem:[%s1813_s20 + $0x1a8] sm:$0xff]  ;;  %1269 = vst [vmem:[%s1809_s15 + $0x198] sm:$0xff] %v1268_v28  ;;  %v1274_v31 = vld [vmem:[%s1813_s20 + $0x1b0] sm:$0xff]  ;;  %1162 = sbr.rel (!%p1159_p12) target bundleno = 319 (0x13f), region = 122 }
 0x15a   : >> { %1271 = vst [vmem:[%s1809_s15 + $0x1a0] sm:$0xff] %v1270_v29  ;;  %1273 = vst [vmem:[%s1809_s15 + $0x1a8] sm:$0xff] %v1272_v30  ;;  %v1276_v32 = vld [vmem:[%s1813_s20 + $0x1b8] sm:$0xff]  ;;  %v1278_v33 = vld [vmem:[%s1813_s20 + $0x1c0] sm:$0xff] }
 0x15b   : >> { %1275 = vst [vmem:[%s1809_s15 + $0x1b0] sm:$0xff] %v1274_v31  ;;  %1277 = vst [vmem:[%s1809_s15 + $0x1b8] sm:$0xff] %v1276_v32  ;;  %v1280_v34 = vld [vmem:[%s1813_s20 + $0x1c8] sm:$0xff]  ;;  %v1282_v35 = vld [vmem:[%s1813_s20 + $0x1d0] sm:$0xff] }
 0x15c   : >> { %1279 = vst [vmem:[%s1809_s15 + $0x1c0] sm:$0xff] %v1278_v33  ;;  %v1284_v36 = vld [vmem:[%s1813_s20 + $0x1d8] sm:$0xff]  ;;  %1281 = vst [vmem:[%s1809_s15 + $0x1c8] sm:$0xff] %v1280_v34  ;;  %v1286_v37 = vld [vmem:[%s1813_s20 + $0x1e0] sm:$0xff] }
 0x15d   : >> { %1283 = vst [vmem:[%s1809_s15 + $0x1d0] sm:$0xff] %v1282_v35  ;;  %1285 = vst [vmem:[%s1809_s15 + $0x1d8] sm:$0xff] %v1284_v36  ;;  %v1288_v39 = vld [vmem:[%s1813_s20 + $0x1e8] sm:$0xff]  ;;  %v1290_v40 = vld [vmem:[%s1813_s20 + $0x1f0] sm:$0xff] }
 0x15e   : >> { %1287 = vst [vmem:[%s1809_s15 + $0x1e0] sm:$0xff] %v1286_v37  ;;  %1289 = vst [vmem:[%s1809_s15 + $0x1e8] sm:$0xff] %v1288_v39  ;;  %v1292_v41 = vld [vmem:[%s1813_s20 + $0x1f8] sm:$0xff]  ;;  %s2383_s20 = smov %s2249_s25 }
 0x15f   : >> { %1291 = vst [vmem:[%s1809_s15 + $0x1f0] sm:$0xff] %v1290_v40  ;;  %1293 = vst [vmem:[%s1809_s15 + $0x1f8] sm:$0xff] %v1292_v41  ;;  %s2382_s15 = smov %s2252_s26 }
 0x160 PF: > { %s2357_s27 = sand.u32 63, %s2389_s9   ;;  %s1520_s28 = sshll.u32 %s2182_s18, 9 }
 0x161   : > { %s1305_s29 = scalar_lea.vmem %s1982_s8, %s1520_s28 [#allocation2]   ;;  %s1307_s30 = scalar_lea.vmem %s2176_s14, %s1520_s28  }
 0x162   : > { %p1514_p13 = scmp.le.s32.totalorder %s2357_s27, 0 }
 0x163   : > { %s1823_s4 = smov (!%p1514_p13), %s1307_s30   ;;  %s1827_s5 = smov (!%p1514_p13), %s1305_s29  }
 0x164   : > { %1398 = sbr.rel (%p1514_p13) target bundleno = 373 (0x175), region = 127  ;;  %s1831_s6 = smov (!%p1514_p13), 0  }
 0x165   : > { %s1835_s7 = smov (!%p1514_p13), 0  }
 0x16b LB: >> { %v1317_v38 = vld [vmem:[%s1829_s5] sm:$0xff]  ;;  %s1319_s9 = sadd.s32 1, %s1833_s6  ;;  %s1311_s7 = sadd.s32 1, %s1837_s7   ;;  %s1837_s7 = sphi %s1835_s7, %s1311_s7   ;;  %s1833_s6 = sphi %s1831_s6, %s1832_s6   ;;  %s1829_s5 = sphi %s1827_s5, %s1324_s5   ;;  %s1825_s4 = sphi %s1823_s4, %s1325_s4  }
 0x16c   : >> { %1318 = vst [vmem:[%s1825_s4] sm:$0xff] %v1317_v38  ;;  %p1320_p0 = scmp.ge.s32.totalorder %s1319_s9, %s2357_s27  ;;  %p1310_p1 = scmp.ge.s32.totalorder %s1311_s7, %s2357_s27 }
 0x16e   : >> { %s2393_s9 = smov (%p1320_p0, %s1319_s9), 0  ;;  %1313 = sbr.rel (!%p1310_p1) target bundleno = 363 (0x16b), region = 133 }
 0x16f   : >> { %s1515_s8 = sshll.u32 %s2393_s9, 3  ;;  %s1832_s6 = smov %s2393_s9  }
 0x170   : >> { %s1324_s5 = scalar_lea.vmem %s1305_s29, %s1515_s8 [#allocation2]   ;;  %s1325_s4 = scalar_lea.vmem %s1307_s30, %s1515_s8  }
 0x175 PF: > { %p10_p2 = scmp.ge.s32.totalorder %s1875_s16, 9   ;;  %s2385_s12 = smov %s1801_s13 }
 0x176   : > { %s2386_s13 = smov %s1883_s19  ;;  %s2387_s14 = smov %s1875_s16 }
 0x177   :  { %12 = sbr.rel (!%p10_p2) target bundleno = 2 (0x2), region = 144 }

// kernel: net_forward.8
= control target key start
LH: loop header
LB: loop body
LE: loop exit
PB: predicated region body
PF: predicated region fallthrough
CT: control target
= control target key end

     0   :  { %s1796_s10 = smov 96   ;;  %vm1467_vm0 = vcmask 259072   ;;  %vm1465_vm1 = vcmask 261120   ;;  %s4283_s0 = inlined_call_operand.vmem [shape: f32[56,2,14,64], index: 0, kind: input, shape index: {}]   ;;  %s4284_s1 = inlined_call_operand.vmem [shape: f32[56,14,32], index: 1, kind: output, shape index: {}]  }
   0x1   :  { %v1810_v0 = vld [vmem:[%s4283_s0 + $0x20] sm:$0xff]  ;;  %v1824_v2 = vld [vmem:[%s4283_s0 + $0x28] sm:$0x3f] }
   0x2   :  { %v1815_v1 = vld [vmem:[%s4283_s0] sm:$0xff]  ;;  %349 = vrot.lane.b32.xlu1 %v1810_v0, %s1796_s10  ;;  %v1829_v3 = vld [vmem:[%s4283_s0 + $0x8] sm:$0x3f] }
   0x3   :  { %345 = vrot.lane.b32.xlu0 %v1815_v1, %s1796_s10  ;;  %v1838_v4 = vld [vmem:[%s4283_s0 + $0x48] sm:$0x3f]  ;;  %v1843_v5 = vld [vmem:[%s4283_s0 + $0x40] sm:$0xff] }
   0x4   :  { %v1852_v6 = vld [vmem:[%s4283_s0 + $0x68] sm:$0x3f]  ;;  %v1857_v7 = vld [vmem:[%s4283_s0 + $0x60] sm:$0xff] }
   0x5   :  { %v1866_v8 = vld [vmem:[%s4283_s0 + $0x88] sm:$0x3f]  ;;  %v1871_v9 = vld [vmem:[%s4283_s0 + $0x80] sm:$0xff] }
   0x6   :  { %351 = vrot.lane.b32.xlu1 %v1824_v2, %s1796_s10  ;;  %v1880_v10 = vld [vmem:[%s4283_s0 + $0xa8] sm:$0x3f]  ;;  %v1885_v11 = vld [vmem:[%s4283_s0 + $0xa0] sm:$0xff] }
   0x7   :  { %347 = vrot.lane.b32.xlu0 %v1829_v3, %s1796_s10  ;;  %v21_v12 = vld [vmem:[%s4283_s0 + $0xc8] sm:$0x3f]  ;;  %v20_v13 = vld [vmem:[%s4283_s0 + $0xc0] sm:$0xff] }
   0x8   :  { %v23_v14 = vld [vmem:[%s4283_s0 + $0xe8] sm:$0x3f]  ;;  %v22_v15 = vld [vmem:[%s4283_s0 + $0xe0] sm:$0xff] }
   0x9   :  { %v25_v16 = vld [vmem:[%s4283_s0 + $0x108] sm:$0x3f]  ;;  %v24_v17 = vld [vmem:[%s4283_s0 + $0x100] sm:$0xff] }
   0xa   :  { %355 = vrot.lane.b32.xlu1 %v1838_v4, %s1796_s10  ;;  %v27_v18 = vld [vmem:[%s4283_s0 + $0x128] sm:$0x3f]  ;;  %v26_v19 = vld [vmem:[%s4283_s0 + $0x120] sm:$0xff] }
   0xb   :  { %353 = vrot.lane.b32.xlu0 %v1843_v5, %s1796_s10  ;;  %v29_v20 = vld [vmem:[%s4283_s0 + $0x148] sm:$0x3f]  ;;  %v28_v21 = vld [vmem:[%s4283_s0 + $0x140] sm:$0xff] }
   0xc   :  { %v31_v22 = vld [vmem:[%s4283_s0 + $0x168] sm:$0x3f]  ;;  %v30_v23 = vld [vmem:[%s4283_s0 + $0x160] sm:$0xff] }
   0xd   :  { %v33_v24 = vld [vmem:[%s4283_s0 + $0x188] sm:$0x3f]  ;;  %v32_v25 = vld [vmem:[%s4283_s0 + $0x180] sm:$0xff] }
   0xe   :  { %359 = vrot.lane.b32.xlu1 %v1852_v6, %s1796_s10  ;;  %v35_v26 = vld [vmem:[%s4283_s0 + $0x1a8] sm:$0x3f]  ;;  %v34_v27 = vld [vmem:[%s4283_s0 + $0x1a0] sm:$0xff] }
   0xf   :  { %357 = vrot.lane.b32.xlu0 %v1857_v7, %s1796_s10  ;;  %v37_v28 = vld [vmem:[%s4283_s0 + $0x1c8] sm:$0x3f]  ;;  %v36_v29 = vld [vmem:[%s4283_s0 + $0x1c0] sm:$0xff] }
  0x10   :  { %v39_v30 = vld [vmem:[%s4283_s0 + $0x1e8] sm:$0x3f]  ;;  %v38_v31 = vld [vmem:[%s4283_s0 + $0x1e0] sm:$0xff] }
  0x11   :  { %v41_v32 = vld [vmem:[%s4283_s0 + $0x208] sm:$0x3f]  ;;  %v40_v33 = vld [vmem:[%s4283_s0 + $0x200] sm:$0xff] }
  0x12   :  { %363 = vrot.lane.b32.xlu1 %v1866_v8, %s1796_s10  ;;  %v43_v34 = vld [vmem:[%s4283_s0 + $0x228] sm:$0x3f]  ;;  %v42_v35 = vld [vmem:[%s4283_s0 + $0x220] sm:$0xff] }
  0x13   :  { %361 = vrot.lane.b32.xlu0 %v1871_v9, %s1796_s10  ;;  %v45_v36 = vld [vmem:[%s4283_s0 + $0x248] sm:$0x3f]  ;;  %v44_v37 = vld [vmem:[%s4283_s0 + $0x240] sm:$0xff] }
  0x14   :  { %v47_v38 = vld [vmem:[%s4283_s0 + $0x268] sm:$0x3f]  ;;  %v46_v39 = vld [vmem:[%s4283_s0 + $0x260] sm:$0xff] }
  0x15   :  { %v49_v40 = vld [vmem:[%s4283_s0 + $0x288] sm:$0x3f]  ;;  %v48_v41 = vld [vmem:[%s4283_s0 + $0x280] sm:$0xff] }
  0x16   :  { %367 = vrot.lane.b32.xlu1 %v1880_v10, %s1796_s10  ;;  %v51_v42 = vld [vmem:[%s4283_s0 + $0x2a8] sm:$0x3f]  ;;  %v50_v43 = vld [vmem:[%s4283_s0 + $0x2a0] sm:$0xff] }
  0x17   :  { %365 = vrot.lane.b32.xlu0 %v1885_v11, %s1796_s10  ;;  %v53_v44 = vld [vmem:[%s4283_s0 + $0x2c8] sm:$0x3f]  ;;  %v52_v45 = vld [vmem:[%s4283_s0 + $0x2c0] sm:$0xff] }
  0x18   :  { %v55_v46 = vld [vmem:[%s4283_s0 + $0x2e8] sm:$0x3f]  ;;  %v54_v47 = vld [vmem:[%s4283_s0 + $0x2e0] sm:$0xff] }
  0x19   :  { %v57_v48 = vld [vmem:[%s4283_s0 + $0x308] sm:$0x3f]  ;;  %v56_v49 = vld [vmem:[%s4283_s0 + $0x300] sm:$0xff] }
  0x1a   :  { %371 = vrot.lane.b32.xlu1 %v21_v12, %s1796_s10  ;;  %v59_v50 = vld [vmem:[%s4283_s0 + $0x328] sm:$0x3f]  ;;  %v58_v51 = vld [vmem:[%s4283_s0 + $0x320] sm:$0xff] }
  0x1b   :  { %369 = vrot.lane.b32.xlu0 %v20_v13, %s1796_s10  ;;  %v61_v52 = vld [vmem:[%s4283_s0 + $0x348] sm:$0x3f]  ;;  %v60_v53 = vld [vmem:[%s4283_s0 + $0x340] sm:$0xff] }
  0x1c   :  { %v63_v54 = vld [vmem:[%s4283_s0 + $0x368] sm:$0x3f]  ;;  %v62_v55 = vld [vmem:[%s4283_s0 + $0x360] sm:$0xff] }
  0x1d   :  { %v65_v56 = vld [vmem:[%s4283_s0 + $0x388] sm:$0x3f]  ;;  %v64_v57 = vld [vmem:[%s4283_s0 + $0x380] sm:$0xff] }
  0x1e   :  { %375 = vrot.lane.b32.xlu1 %v23_v14, %s1796_s10  ;;  %v67_v58 = vld [vmem:[%s4283_s0 + $0x3a8] sm:$0x3f]  ;;  %v66_v59 = vld [vmem:[%s4283_s0 + $0x3a0] sm:$0xff] }
  0x1f   :  { %373 = vrot.lane.b32.xlu0 %v22_v15, %s1796_s10  ;;  %v69_v62 = vld [vmem:[%s4283_s0 + $0x3c8] sm:$0x3f]  ;;  %v68_v63 = vld [vmem:[%s4283_s0 + $0x3c0] sm:$0xff] }
  0x20   :  { %v71_v14 = vld [vmem:[%s4283_s0 + $0x3e8] sm:$0x3f]  ;;  %v70_v15 = vld [vmem:[%s4283_s0 + $0x3e0] sm:$0xff] }
  0x22   :  { %379 = vrot.lane.b32.xlu1 %v25_v16, %s1796_s10 }
  0x23   :  { %377 = vrot.lane.b32.xlu0 %v24_v17, %s1796_s10 }
  0x26   :  { %383 = vrot.lane.b32.xlu1 %v27_v18, %s1796_s10  ;;  %v73_v18 = vld [vmem:[%s4283_s0 + $0x408] sm:$0x3f] }
  0x27   :  { %381 = vrot.lane.b32.xlu0 %v26_v19, %s1796_s10  ;;  %v72_v19 = vld [vmem:[%s4283_s0 + $0x400] sm:$0xff] }
  0x2a   :  { %387 = vrot.lane.b32.xlu1 %v29_v20, %s1796_s10 }
  0x2b   :  { %385 = vrot.lane.b32.xlu0 %v28_v21, %s1796_s10 }
  0x2e   :  { %391 = vrot.lane.b32.xlu1 %v31_v22, %s1796_s10  ;;  %v75_v22 = vld [vmem:[%s4283_s0 + $0x428] sm:$0x3f] }
  0x2f   :  { %389 = vrot.lane.b32.xlu0 %v30_v23, %s1796_s10  ;;  %v74_v23 = vld [vmem:[%s4283_s0 + $0x420] sm:$0xff] }
  0x32   :  { %395 = vrot.lane.b32.xlu1 %v33_v24, %s1796_s10 }
  0x33   :  { %393 = vrot.lane.b32.xlu0 %v32_v25, %s1796_s10 }
  0x36   :  { %399 = vrot.lane.b32.xlu1 %v35_v26, %s1796_s10  ;;  %v77_v26 = vld [vmem:[%s4283_s0 + $0x448] sm:$0x3f] }
  0x37   :  { %397 = vrot.lane.b32.xlu0 %v34_v27, %s1796_s10  ;;  %v76_v27 = vld [vmem:[%s4283_s0 + $0x440] sm:$0xff] }
  0x3a   :  { %403 = vrot.lane.b32.xlu1 %v37_v28, %s1796_s10 }
  0x3b   :  { %401 = vrot.lane.b32.xlu0 %v36_v29, %s1796_s10 }
  0x3e   :  { %407 = vrot.lane.b32.xlu1 %v39_v30, %s1796_s10  ;;  %v79_v30 = vld [vmem:[%s4283_s0 + $0x468] sm:$0x3f] }
  0x3f   :  { %405 = vrot.lane.b32.xlu0 %v38_v31, %s1796_s10  ;;  %v78_v31 = vld [vmem:[%s4283_s0 + $0x460] sm:$0xff] }
  0x42   :  { %411 = vrot.lane.b32.xlu1 %v41_v32, %s1796_s10 }
  0x43   :  { %409 = vrot.lane.b32.xlu0 %v40_v33, %s1796_s10 }
  0x46   :  { %415 = vrot.lane.b32.xlu1 %v43_v34, %s1796_s10  ;;  %v81_v34 = vld [vmem:[%s4283_s0 + $0x488] sm:$0x3f] }
  0x47   :  { %413 = vrot.lane.b32.xlu0 %v42_v35, %s1796_s10  ;;  %v80_v35 = vld [vmem:[%s4283_s0 + $0x480] sm:$0xff] }
  0x4a   :  { %419 = vrot.lane.b32.xlu1 %v45_v36, %s1796_s10 }
  0x4b   :  { %417 = vrot.lane.b32.xlu0 %v44_v37, %s1796_s10 }
  0x4e   :  { %423 = vrot.lane.b32.xlu1 %v47_v38, %s1796_s10  ;;  %v83_v38 = vld [vmem:[%s4283_s0 + $0x4a8] sm:$0x3f] }
  0x4f   :  { %421 = vrot.lane.b32.xlu0 %v46_v39, %s1796_s10  ;;  %v82_v39 = vld [vmem:[%s4283_s0 + $0x4a0] sm:$0xff] }
  0x52   :  { %427 = vrot.lane.b32.xlu1 %v49_v40, %s1796_s10 }
  0x53   :  { %425 = vrot.lane.b32.xlu0 %v48_v41, %s1796_s10 }
  0x56   :  { %431 = vrot.lane.b32.xlu1 %v51_v42, %s1796_s10  ;;  %v85_v42 = vld [vmem:[%s4283_s0 + $0x4c8] sm:$0x3f] }
  0x57   :  { %429 = vrot.lane.b32.xlu0 %v50_v43, %s1796_s10  ;;  %v84_v43 = vld [vmem:[%s4283_s0 + $0x4c0] sm:$0xff] }
  0x5a   :  { %435 = vrot.lane.b32.xlu1 %v53_v44, %s1796_s10 }
  0x5b   :  { %433 = vrot.lane.b32.xlu0 %v52_v45, %s1796_s10 }
  0x5e   :  { %439 = vrot.lane.b32.xlu1 %v55_v46, %s1796_s10  ;;  %v87_v46 = vld [vmem:[%s4283_s0 + $0x4e8] sm:$0x3f] }
  0x5f   :  { %437 = vrot.lane.b32.xlu0 %v54_v47, %s1796_s10  ;;  %v86_v47 = vld [vmem:[%s4283_s0 + $0x4e0] sm:$0xff] }
  0x62   :  { %443 = vrot.lane.b32.xlu1 %v57_v48, %s1796_s10 }
  0x63   :  { %441 = vrot.lane.b32.xlu0 %v56_v49, %s1796_s10 }
  0x66   :  { %447 = vrot.lane.b32.xlu1 %v59_v50, %s1796_s10  ;;  %v89_v50 = vld [vmem:[%s4283_s0 + $0x508] sm:$0x3f] }
  0x67   :  { %445 = vrot.lane.b32.xlu0 %v58_v51, %s1796_s10  ;;  %v88_v51 = vld [vmem:[%s4283_s0 + $0x500] sm:$0xff] }
  0x6a   :  { %451 = vrot.lane.b32.xlu1 %v61_v52, %s1796_s10 }
  0x6b   :  { %449 = vrot.lane.b32.xlu0 %v60_v53, %s1796_s10 }
  0x6e   :  { %455 = vrot.lane.b32.xlu1 %v63_v54, %s1796_s10  ;;  %v91_v54 = vld [vmem:[%s4283_s0 + $0x528] sm:$0x3f] }
  0x6f   :  { %453 = vrot.lane.b32.xlu0 %v62_v55, %s1796_s10  ;;  %v90_v55 = vld [vmem:[%s4283_s0 + $0x520] sm:$0xff] }
  0x72   :  { %459 = vrot.lane.b32.xlu1 %v65_v56, %s1796_s10 }
  0x73   :  { %457 = vrot.lane.b32.xlu0 %v64_v57, %s1796_s10 }
  0x74   :  { %v2081_v60 = vpop.permute.xlu1 %349 }
  0x75   :  { %v2083_v61 = vpop.permute.xlu0 %345 }
  0x76   :  { %463 = vrot.lane.b32.xlu1 %v67_v58, %s1796_s10  ;;  %v93_v58 = vld [vmem:[%s4283_s0 + $0x548] sm:$0x3f] }
  0x77   :  { %461 = vrot.lane.b32.xlu0 %v66_v59, %s1796_s10  ;;  %v92_v59 = vld [vmem:[%s4283_s0 + $0x540] sm:$0xff] }
  0x78   :  { %v2093_v12 = vpop.permute.xlu1 %351 }
  0x79   :  { %v2095_v13 = vpop.permute.xlu0 %347 }
  0x7a   :  { %467 = vrot.lane.b32.xlu1 %v69_v62, %s1796_s10 }
  0x7b   :  { %465 = vrot.lane.b32.xlu0 %v68_v63, %s1796_s10 }
  0x7c   :  { %v2105_v16 = vpop.permute.xlu1 %355 }
  0x7d   :  { %v2107_v17 = vpop.permute.xlu0 %353 }
  0x7e   :  { %471 = vrot.lane.b32.xlu1 %v71_v14, %s1796_s10  ;;  %v95_v14 = vld [vmem:[%s4283_s0 + $0x568] sm:$0x3f] }
  0x7f   :  { %469 = vrot.lane.b32.xlu0 %v70_v15, %s1796_s10  ;;  %v94_v15 = vld [vmem:[%s4283_s0 + $0x560] sm:$0xff] }
  0x80   :  { %v2117_v20 = vpop.permute.xlu1 %359 }
  0x81   :  { %v2119_v21 = vpop.permute.xlu0 %357 }
  0x82   :  { %475 = vrot.lane.b32.xlu1 %v73_v18, %s1796_s10 }
  0x83   :  { %473 = vrot.lane.b32.xlu0 %v72_v19, %s1796_s10 }
  0x84   :  { %v2129_v24 = vpop.permute.xlu1 %363 }
  0x85   :  { %v2131_v25 = vpop.permute.xlu0 %361 }
  0x86   :  { %479 = vrot.lane.b32.xlu1 %v75_v22, %s1796_s10  ;;  %v97_v22 = vld [vmem:[%s4283_s0 + $0x588] sm:$0x3f] }
  0x87   :  { %477 = vrot.lane.b32.xlu0 %v74_v23, %s1796_s10  ;;  %v96_v23 = vld [vmem:[%s4283_s0 + $0x580] sm:$0xff] }
  0x88   :  { %v2141_v28 = vpop.permute.xlu1 %367 }
  0x89   :  { %v2143_v29 = vpop.permute.xlu0 %365 }
  0x8a   :  { %483 = vrot.lane.b32.xlu1 %v77_v26, %s1796_s10 }
  0x8b   :  { %481 = vrot.lane.b32.xlu0 %v76_v27, %s1796_s10 }
  0x8c   :  { %v2153_v32 = vpop.permute.xlu1 %371 }
  0x8d   :  { %v2155_v33 = vpop.permute.xlu0 %369 }
  0x8e   :  { %487 = vrot.lane.b32.xlu1 %v79_v30, %s1796_s10  ;;  %v99_v30 = vld [vmem:[%s4283_s0 + $0x5a8] sm:$0x3f] }
  0x8f   :  { %485 = vrot.lane.b32.xlu0 %v78_v31, %s1796_s10  ;;  %v98_v31 = vld [vmem:[%s4283_s0 + $0x5a0] sm:$0xff] }
  0x90   :  { %v2165_v36 = vpop.permute.xlu1 %375 }
  0x91   :  { %v2167_v37 = vpop.permute.xlu0 %373 }
  0x92   :  { %491 = vrot.lane.b32.xlu1 %v81_v34, %s1796_s10 }
  0x93   :  { %489 = vrot.lane.b32.xlu0 %v80_v35, %s1796_s10 }
  0x94   :  { %v2177_v40 = vpop.permute.xlu1 %379 }
  0x95   :  { %v2179_v41 = vpop.permute.xlu0 %377 }
  0x96   :  { %495 = vrot.lane.b32.xlu1 %v83_v38, %s1796_s10  ;;  %v101_v38 = vld [vmem:[%s4283_s0 + $0x5c8] sm:$0x3f] }
  0x97   :  { %493 = vrot.lane.b32.xlu0 %v82_v39, %s1796_s10  ;;  %v100_v39 = vld [vmem:[%s4283_s0 + $0x5c0] sm:$0xff] }
  0x98   :  { %v2189_v44 = vpop.permute.xlu1 %383 }
  0x99   :  { %v2191_v45 = vpop.permute.xlu0 %381 }
  0x9a   :  { %499 = vrot.lane.b32.xlu1 %v85_v42, %s1796_s10 }
  0x9b   :  { %497 = vrot.lane.b32.xlu0 %v84_v43, %s1796_s10 }
  0x9c   :  { %v2201_v48 = vpop.permute.xlu1 %387 }
  0x9d   :  { %v2203_v49 = vpop.permute.xlu0 %385 }
  0x9e   :  { %503 = vrot.lane.b32.xlu1 %v87_v46, %s1796_s10  ;;  %v103_v46 = vld [vmem:[%s4283_s0 + $0x5e8] sm:$0x3f] }
  0x9f   :  { %501 = vrot.lane.b32.xlu0 %v86_v47, %s1796_s10  ;;  %v102_v47 = vld [vmem:[%s4283_s0 + $0x5e0] sm:$0xff] }
  0xa0   :  { %v2213_v52 = vpop.permute.xlu1 %391 }
  0xa1   :  { %4331 = vst [vmem:[#allocation2_spill] sm:$0xff] %v2213_v52  ;;  %v2215_v53 = vpop.permute.xlu0 %389 }
  0xa2   :  { %4332 = vst [vmem:[#allocation3_spill] sm:$0xff] %v2215_v53  ;;  %507 = vrot.lane.b32.xlu1 %v89_v50, %s1796_s10 }
  0xa3   :  { %505 = vrot.lane.b32.xlu0 %v88_v51, %s1796_s10 }
  0xa4   :  { %v2225_v56 = vpop.permute.xlu1 %395 }
  0xa5   :  { %4333 = vst [vmem:[#allocation4_spill] sm:$0xff] %v2225_v56  ;;  %v2227_v57 = vpop.permute.xlu0 %393  ;;  %v2623_v56 = vld [vmem:[%s4283_s0 + $0x190] sm:$0xff] }
  0xa6   :  { %4334 = vst [vmem:[#allocation5_spill] sm:$0xff] %v2227_v57  ;;  %511 = vrot.lane.b32.xlu1 %v91_v54, %s1796_s10  ;;  %v105_v54 = vld [vmem:[%s4283_s0 + $0x608] sm:$0x3f]  ;;  %4392 = vst [vmem:[#allocation63_spill] sm:$0xff] %v2623_v56 }
  0xa7   :  { %509 = vrot.lane.b32.xlu0 %v90_v55, %s1796_s10  ;;  %v104_v55 = vld [vmem:[%s4283_s0 + $0x600] sm:$0xff] }
  0xa8   :  { %v2237_v62 = vpop.permute.xlu1 %399 }
  0xa9   :  { %4335 = vst [vmem:[#allocation6_spill] sm:$0xff] %v2237_v62  ;;  %v2239_v63 = vpop.permute.xlu0 %397  ;;  %v2605_v62 = vld [vmem:[%s4283_s0 + $0x170] sm:$0xff] }
  0xaa   :  { %4336 = vst [vmem:[#allocation7_spill] sm:$0xff] %v2239_v63  ;;  %515 = vrot.lane.b32.xlu1 %v93_v58, %s1796_s10  ;;  %4388 = vst [vmem:[#allocation59_spill] sm:$0xff] %v2605_v62 }
  0xab   :  { %513 = vrot.lane.b32.xlu0 %v92_v59, %s1796_s10 }
  0xac   :  { %v2249_v18 = vpop.permute.xlu1 %403 }
  0xad   :  { %4337 = vst [vmem:[#allocation8_spill] sm:$0xff] %v2249_v18  ;;  %v2251_v19 = vpop.permute.xlu0 %401  ;;  %v2587_v18 = vld [vmem:[%s4283_s0 + $0x150] sm:$0xff] }
  0xae   :  { %4338 = vst [vmem:[#allocation9_spill] sm:$0xff] %v2251_v19  ;;  %519 = vrot.lane.b32.xlu1 %v95_v14, %s1796_s10  ;;  %v107_v14 = vld [vmem:[%s4283_s0 + $0x628] sm:$0x3f]  ;;  %4384 = vst [vmem:[#allocation55_spill] sm:$0xff] %v2587_v18 }
  0xaf   :  { %517 = vrot.lane.b32.xlu0 %v94_v15, %s1796_s10  ;;  %v106_v15 = vld [vmem:[%s4283_s0 + $0x620] sm:$0xff] }
  0xb0   :  { %v2261_v26 = vpop.permute.xlu1 %407 }
  0xb1   :  { %4339 = vst [vmem:[#allocation10_spill] sm:$0xff] %v2261_v26  ;;  %v2263_v27 = vpop.permute.xlu0 %405  ;;  %v2569_v26 = vld [vmem:[%s4283_s0 + $0x130] sm:$0xff] }
  0xb2   :  { %4340 = vst [vmem:[#allocation11_spill] sm:$0xff] %v2263_v27  ;;  %523 = vrot.lane.b32.xlu1 %v97_v22, %s1796_s10 }
  0xb3   :  { %521 = vrot.lane.b32.xlu0 %v96_v23, %s1796_s10 }
  0xb4   :  { %v2273_v34 = vpop.permute.xlu1 %411 }
  0xb5   :  { %4341 = vst [vmem:[#allocation12_spill] sm:$0xff] %v2273_v34  ;;  %v2275_v35 = vpop.permute.xlu0 %409  ;;  %v2551_v34 = vld [vmem:[%s4283_s0 + $0x110] sm:$0xff] }
  0xb6   :  { %4342 = vst [vmem:[#allocation13_spill] sm:$0xff] %v2275_v35  ;;  %527 = vrot.lane.b32.xlu1 %v99_v30, %s1796_s10  ;;  %v109_v30 = vld [vmem:[%s4283_s0 + $0x648] sm:$0x3f] }
  0xb7   :  { %525 = vrot.lane.b32.xlu0 %v98_v31, %s1796_s10  ;;  %v108_v31 = vld [vmem:[%s4283_s0 + $0x640] sm:$0xff] }
  0xb8   :  { %v2285_v42 = vpop.permute.xlu1 %415 }
  0xb9   :  { %4343 = vst [vmem:[#allocation14_spill] sm:$0xff] %v2285_v42  ;;  %v2287_v43 = vpop.permute.xlu0 %413  ;;  %v2533_v42 = vld [vmem:[%s4283_s0 + $0xf0] sm:$0xff] }
  0xba   :  { %4344 = vst [vmem:[#allocation15_spill] sm:$0xff] %v2287_v43  ;;  %531 = vrot.lane.b32.xlu1 %v101_v38, %s1796_s10 }
  0xbb   :  { %529 = vrot.lane.b32.xlu0 %v100_v39, %s1796_s10 }
  0xbc   :  { %v2297_v50 = vpop.permute.xlu1 %419 }
  0xbd   :  { %4345 = vst [vmem:[#allocation16_spill] sm:$0xff] %v2297_v50  ;;  %v2299_v51 = vpop.permute.xlu0 %417  ;;  %v2515_v50 = vld [vmem:[%s4283_s0 + $0xd0] sm:$0xff] }
  0xbe   :  { %4346 = vst [vmem:[#allocation17_spill] sm:$0xff] %v2299_v51  ;;  %535 = vrot.lane.b32.xlu1 %v103_v46, %s1796_s10  ;;  %v111_v46 = vld [vmem:[%s4283_s0 + $0x668] sm:$0x3f] }
  0xbf   :  { %533 = vrot.lane.b32.xlu0 %v102_v47, %s1796_s10  ;;  %v110_v47 = vld [vmem:[%s4283_s0 + $0x660] sm:$0xff] }
  0xc0   :  { %v2309_v58 = vpop.permute.xlu1 %423 }
  0xc1   :  { %4347 = vst [vmem:[#allocation18_spill] sm:$0xff] %v2309_v58  ;;  %v2311_v59 = vpop.permute.xlu0 %421  ;;  %v2497_v58 = vld [vmem:[%s4283_s0 + $0xb0] sm:$0xff] }
  0xc2   :  { %4348 = vst [vmem:[#allocation19_spill] sm:$0xff] %v2311_v59  ;;  %539 = vrot.lane.b32.xlu1 %v105_v54, %s1796_s10 }
  0xc3   :  { %537 = vrot.lane.b32.xlu0 %v104_v55, %s1796_s10 }
  0xc4   :  { %v2321_v22 = vpop.permute.xlu1 %427 }
  0xc5   :  { %4349 = vst [vmem:[#allocation20_spill] sm:$0xff] %v2321_v22  ;;  %v2323_v23 = vpop.permute.xlu0 %425  ;;  %v2479_v22 = vld [vmem:[%s4283_s0 + $0x90] sm:$0xff] }
  0xc6   :  { %4350 = vst [vmem:[#allocation21_spill] sm:$0xff] %v2323_v23  ;;  %543 = vrot.lane.b32.xlu1 %v107_v14, %s1796_s10  ;;  %v113_v14 = vld [vmem:[%s4283_s0 + $0x688] sm:$0x3f] }
  0xc7   :  { %541 = vrot.lane.b32.xlu0 %v106_v15, %s1796_s10  ;;  %v112_v15 = vld [vmem:[%s4283_s0 + $0x680] sm:$0xff] }
  0xc8   :  { %v2333_v38 = vpop.permute.xlu1 %431 }
  0xc9   :  { %4351 = vst [vmem:[#allocation22_spill] sm:$0xff] %v2333_v38  ;;  %v2335_v39 = vpop.permute.xlu0 %429  ;;  %v2461_v38 = vld [vmem:[%s4283_s0 + $0x70] sm:$0xff] }
  0xca   :  { %4352 = vst [vmem:[#allocation23_spill] sm:$0xff] %v2335_v39  ;;  %547 = vrot.lane.b32.xlu1 %v109_v30, %s1796_s10 }
  0xcb   :  { %545 = vrot.lane.b32.xlu0 %v108_v31, %s1796_s10 }
  0xcc   :  { %v2345_v54 = vpop.permute.xlu1 %435 }
  0xcd   :  { %4353 = vst [vmem:[#allocation24_spill] sm:$0xff] %v2345_v54  ;;  %v2347_v55 = vpop.permute.xlu0 %433 }
  0xce   :  { %4354 = vst [vmem:[#allocation25_spill] sm:$0xff] %v2347_v55  ;;  %551 = vrot.lane.b32.xlu1 %v111_v46, %s1796_s10  ;;  %v115_v46 = vld [vmem:[%s4283_s0 + $0x6a8] sm:$0x3f] }
  0xcf   :  { %549 = vrot.lane.b32.xlu0 %v110_v47, %s1796_s10  ;;  %v114_v47 = vld [vmem:[%s4283_s0 + $0x6a0] sm:$0xff] }
  0xd0   :  { %v2357_v30 = vpop.permute.xlu1 %439 }
  0xd1   :  { %4355 = vst [vmem:[#allocation26_spill] sm:$0xff] %v2357_v30  ;;  %v2359_v31 = vpop.permute.xlu0 %437 }
  0xd2   :  { %4356 = vst [vmem:[#allocation27_spill] sm:$0xff] %v2359_v31  ;;  %555 = vrot.lane.b32.xlu1 %v113_v14, %s1796_s10  ;;  %v117_v14 = vld [vmem:[%s4283_s0 + $0x6c8] sm:$0x3f] }
  0xd3   :  { %553 = vrot.lane.b32.xlu0 %v112_v15, %s1796_s10  ;;  %v116_v15 = vld [vmem:[%s4283_s0 + $0x6c0] sm:$0xff] }
  0xd4   :  { %v2369_v55 = vpop.permute.xlu1 %443 }
  0xd5   :  { %4357 = vst [vmem:[#allocation28_spill] sm:$0xff] %v2369_v55  ;;  %v2371_v54 = vpop.permute.xlu0 %441 }
  0xd6   :  { %4358 = vst [vmem:[#allocation29_spill] sm:$0xff] %v2371_v54  ;;  %559 = vrot.lane.b32.xlu1 %v115_v46, %s1796_s10  ;;  %v119_v46 = vld [vmem:[%s4283_s0 + $0x6e8] sm:$0x3f] }
  0xd7   :  { %557 = vrot.lane.b32.xlu0 %v114_v47, %s1796_s10  ;;  %v118_v47 = vld [vmem:[%s4283_s0 + $0x6e0] sm:$0xff] }
  0xd8   :  { %v2381_v31 = vpop.permute.xlu1 %447 }
  0xd9   :  { %4359 = vst [vmem:[#allocation30_spill] sm:$0xff] %v2381_v31  ;;  %v2383_v30 = vpop.permute.xlu0 %445 }
  0xda   :  { %4360 = vst [vmem:[#allocation31_spill] sm:$0xff] %v2383_v30  ;;  %563 = vrot.lane.b32.xlu1 %v117_v14, %s1796_s10  ;;  %v2402_v14 = vld [vmem:[%s4283_s0 + $0x18] sm:$0x3f] }
  0xdb   :  { %561 = vrot.lane.b32.xlu0 %v116_v15, %s1796_s10  ;;  %v2407_v15 = vld [vmem:[%s4283_s0 + $0x10] sm:$0xff] }
  0xdc   :  { %v2393_v54 = vpop.permute.xlu1 %451 }
  0xdd   :  { %4361 = vst [vmem:[#allocation32_spill] sm:$0xff] %v2393_v54  ;;  %v2395_v55 = vpop.permute.xlu0 %449  ;;  %v2443_v54 = vld [vmem:[%s4283_s0 + $0x50] sm:$0xff] }
  0xde   :  { %4362 = vst [vmem:[#allocation33_spill] sm:$0xff] %v2395_v55  ;;  %567 = vrot.lane.b32.xlu1 %v119_v46, %s1796_s10  ;;  %v2420_v46 = vld [vmem:[%s4283_s0 + $0x38] sm:$0x3f] }
  0xdf   :  { %565 = vrot.lane.b32.xlu0 %v118_v47, %s1796_s10  ;;  %v2425_v47 = vld [vmem:[%s4283_s0 + $0x30] sm:$0xff] }
  0xe0   :  { %v2409_v30 = vpop.permute.xlu1 %455 }
  0xe1   :  { %4363 = vst [vmem:[#allocation34_spill] sm:$0xff] %v2409_v30  ;;  %v2411_v31 = vpop.permute.xlu0 %453 }
  0xe2   :  { %4364 = vst [vmem:[#allocation35_spill] sm:$0xff] %v2411_v31  ;;  %907 = vrot.lane.b32.xlu1 %v2402_v14, %s1796_s10  ;;  %v2438_v31 = vld [vmem:[%s4283_s0 + $0x58] sm:$0x3f] }
  0xe3   :  { %905 = vrot.lane.b32.xlu0 %v2407_v15, %s1796_s10 }
  0xe4   :  { %v2427_v55 = vpop.permute.xlu1 %459 }
  0xe5   :  { %4365 = vst [vmem:[#allocation36_spill] sm:$0xff] %v2427_v55  ;;  %v2429_v30 = vpop.permute.xlu0 %457 }
  0xe6   :  { %4366 = vst [vmem:[#allocation37_spill] sm:$0xff] %v2429_v30  ;;  %911 = vrot.lane.b32.xlu1 %v2420_v46, %s1796_s10  ;;  %v2456_v30 = vld [vmem:[%s4283_s0 + $0x78] sm:$0x3f] }
  0xe7   :  { %909 = vrot.lane.b32.xlu0 %v2425_v47, %s1796_s10 }
  0xe8   :  { %v2445_v39 = vpop.permute.xlu1 %463 }
  0xe9   :  { %4367 = vst [vmem:[#allocation38_spill] sm:$0xff] %v2445_v39  ;;  %v2447_v55 = vpop.permute.xlu0 %461 }
  0xea   :  { %4368 = vst [vmem:[#allocation39_spill] sm:$0xff] %v2447_v55  ;;  %915 = vrot.lane.b32.xlu1 %v2438_v31, %s1796_s10  ;;  %v2474_v55 = vld [vmem:[%s4283_s0 + $0x98] sm:$0x3f] }
  0xeb   :  { %913 = vrot.lane.b32.xlu0 %v2443_v54, %s1796_s10 }
  0xec   :  { %v2463_v23 = vpop.permute.xlu1 %467 }
  0xed   :  { %4369 = vst [vmem:[#allocation40_spill] sm:$0xff] %v2463_v23  ;;  %v2465_v39 = vpop.permute.xlu0 %465 }
  0xee   :  { %4370 = vst [vmem:[#allocation41_spill] sm:$0xff] %v2465_v39  ;;  %919 = vrot.lane.b32.xlu1 %v2456_v30, %s1796_s10  ;;  %v2492_v39 = vld [vmem:[%s4283_s0 + $0xb8] sm:$0x3f] }
  0xef   :  { %917 = vrot.lane.b32.xlu0 %v2461_v38, %s1796_s10 }
  0xf0   :  { %v2481_v59 = vpop.permute.xlu1 %471 }
  0xf1   :  { %4371 = vst [vmem:[#allocation42_spill] sm:$0xff] %v2481_v59  ;;  %v2483_v23 = vpop.permute.xlu0 %469 }
  0xf2   :  { %4372 = vst [vmem:[#allocation43_spill] sm:$0xff] %v2483_v23  ;;  %923 = vrot.lane.b32.xlu1 %v2474_v55, %s1796_s10  ;;  %v2510_v23 = vld [vmem:[%s4283_s0 + $0xd8] sm:$0x3f] }
  0xf3   :  { %921 = vrot.lane.b32.xlu0 %v2479_v22, %s1796_s10 }
  0xf4   :  { %v2499_v51 = vpop.permute.xlu1 %475 }
  0xf5   :  { %4373 = vst [vmem:[#allocation44_spill] sm:$0xff] %v2499_v51  ;;  %v2501_v59 = vpop.permute.xlu0 %473 }
  0xf6   :  { %4374 = vst [vmem:[#allocation45_spill] sm:$0xff] %v2501_v59  ;;  %927 = vrot.lane.b32.xlu1 %v2492_v39, %s1796_s10  ;;  %v2528_v59 = vld [vmem:[%s4283_s0 + $0xf8] sm:$0x3f] }
  0xf7   :  { %925 = vrot.lane.b32.xlu0 %v2497_v58, %s1796_s10 }
  0xf8   :  { %v2517_v43 = vpop.permute.xlu1 %479 }
  0xf9   :  { %4375 = vst [vmem:[#allocation46_spill] sm:$0xff] %v2517_v43  ;;  %v2519_v51 = vpop.permute.xlu0 %477 }
  0xfa   :  { %4376 = vst [vmem:[#allocation47_spill] sm:$0xff] %v2519_v51  ;;  %931 = vrot.lane.b32.xlu1 %v2510_v23, %s1796_s10  ;;  %v2546_v51 = vld [vmem:[%s4283_s0 + $0x118] sm:$0x3f] }
  0xfb   :  { %929 = vrot.lane.b32.xlu0 %v2515_v50, %s1796_s10 }
  0xfc   :  { %v2535_v35 = vpop.permute.xlu1 %483 }
  0xfd   :  { %4377 = vst [vmem:[#allocation48_spill] sm:$0xff] %v2535_v35  ;;  %v2537_v43 = vpop.permute.xlu0 %481 }
  0xfe   :  { %4378 = vst [vmem:[#allocation49_spill] sm:$0xff] %v2537_v43  ;;  %935 = vrot.lane.b32.xlu1 %v2528_v59, %s1796_s10  ;;  %v2564_v43 = vld [vmem:[%s4283_s0 + $0x138] sm:$0x3f] }
  0xff   :  { %933 = vrot.lane.b32.xlu0 %v2533_v42, %s1796_s10 }
 0x100   :  { %v2553_v27 = vpop.permute.xlu1 %487 }
 0x101   :  { %4379 = vst [vmem:[#allocation50_spill] sm:$0xff] %v2553_v27  ;;  %v2555_v35 = vpop.permute.xlu0 %485 }
 0x102   :  { %4380 = vst [vmem:[#allocation51_spill] sm:$0xff] %v2555_v35  ;;  %939 = vrot.lane.b32.xlu1 %v2546_v51, %s1796_s10  ;;  %v2582_v35 = vld [vmem:[%s4283_s0 + $0x158] sm:$0x3f] }
 0x103   :  { %937 = vrot.lane.b32.xlu0 %v2551_v34, %s1796_s10  ;;  %4383 = vst [vmem:[#allocation54_spill] sm:$0xff] %v2582_v35 }
 0x104   :  { %v2571_v19 = vpop.permute.xlu1 %491 }
 0x105   :  { %4381 = vst [vmem:[#allocation52_spill] sm:$0xff] %v2571_v19  ;;  %v2573_v27 = vpop.permute.xlu0 %489 }
 0x106   :  { %4382 = vst [vmem:[#allocation53_spill] sm:$0xff] %v2573_v27  ;;  %943 = vrot.lane.b32.xlu1 %v2564_v43, %s1796_s10  ;;  %v2600_v27 = vld [vmem:[%s4283_s0 + $0x178] sm:$0x3f] }
 0x107   :  { %941 = vrot.lane.b32.xlu0 %v2569_v26, %s1796_s10  ;;  %4387 = vst [vmem:[#allocation58_spill] sm:$0xff] %v2600_v27 }
 0x108   :  { %v2589_v63 = vpop.permute.xlu1 %495 }
 0x109   :  { %4385 = vst [vmem:[#allocation56_spill] sm:$0xff] %v2589_v63  ;;  %v2591_v19 = vpop.permute.xlu0 %493 }
 0x10a   :  { %4386 = vst [vmem:[#allocation57_spill] sm:$0xff] %v2591_v19  ;;  %947 = vrot.lane.b32.xlu1 %v2582_v35, %s1796_s10  ;;  %v2618_v19 = vld [vmem:[%s4283_s0 + $0x198] sm:$0x3f] }
 0x10b   :  { %945 = vrot.lane.b32.xlu0 %v2587_v18, %s1796_s10  ;;  %4391 = vst [vmem:[#allocation62_spill] sm:$0xff] %v2618_v19 }
 0x10c   :  { %v2607_v57 = vpop.permute.xlu1 %499 }
 0x10d   :  { %4389 = vst [vmem:[#allocation60_spill] sm:$0xff] %v2607_v57  ;;  %v2609_v63 = vpop.permute.xlu0 %497 }
 0x10e   :  { %4390 = vst [vmem:[#allocation61_spill] sm:$0xff] %v2609_v63  ;;  %951 = vrot.lane.b32.xlu1 %v2600_v27, %s1796_s10  ;;  %v2636_v63 = vld [vmem:[%s4283_s0 + $0x1b8] sm:$0x3f] }
 0x10f   :  { %949 = vrot.lane.b32.xlu0 %v2605_v62, %s1796_s10  ;;  %4395 = vst [vmem:[#allocation66_spill] sm:$0xff] %v2636_v63  ;;  %v2641_v62 = vld [vmem:[%s4283_s0 + $0x1b0] sm:$0xff] }
 0x110   :  { %v2625_v53 = vpop.permute.xlu1 %503  ;;  %4396 = vst [vmem:[#allocation67_spill] sm:$0xff] %v2641_v62 }
 0x111   :  { %4393 = vst [vmem:[#allocation64_spill] sm:$0xff] %v2625_v53  ;;  %v2627_v57 = vpop.permute.xlu0 %501 }
 0x112   :  { %4394 = vst [vmem:[#allocation65_spill] sm:$0xff] %v2627_v57  ;;  %955 = vrot.lane.b32.xlu1 %v2618_v19, %s1796_s10  ;;  %v2654_v57 = vld [vmem:[%s4283_s0 + $0x1d8] sm:$0x3f] }
 0x113   :  { %953 = vrot.lane.b32.xlu0 %v2623_v56, %s1796_s10  ;;  %4399 = vst [vmem:[#allocation70_spill] sm:$0xff] %v2654_v57  ;;  %v2659_v56 = vld [vmem:[%s4283_s0 + $0x1d0] sm:$0xff] }
 0x114   :  { %v2643_v27 = vpop.permute.xlu1 %507  ;;  %4400 = vst [vmem:[#allocation71_spill] sm:$0xff] %v2659_v56 }
 0x115   :  { %4397 = vst [vmem:[#allocation68_spill] sm:$0xff] %v2643_v27  ;;  %v2645_v53 = vpop.permute.xlu0 %505 }
 0x116   :  { %4398 = vst [vmem:[#allocation69_spill] sm:$0xff] %v2645_v53  ;;  %959 = vrot.lane.b32.xlu1 %v2636_v63, %s1796_s10  ;;  %v2672_v53 = vld [vmem:[%s4283_s0 + $0x1f8] sm:$0x3f] }
 0x117   :  { %957 = vrot.lane.b32.xlu0 %v2641_v62, %s1796_s10  ;;  %4403 = vst [vmem:[#allocation74_spill] sm:$0xff] %v2672_v53  ;;  %v2677_v62 = vld [vmem:[%s4283_s0 + $0x1f0] sm:$0xff] }
 0x118   :  { %v2661_v19 = vpop.permute.xlu1 %511  ;;  %4404 = vst [vmem:[#allocation75_spill] sm:$0xff] %v2677_v62 }
 0x119   :  { %4401 = vst [vmem:[#allocation72_spill] sm:$0xff] %v2661_v19  ;;  %v2663_v27 = vpop.permute.xlu0 %509 }
 0x11a   :  { %4402 = vst [vmem:[#allocation73_spill] sm:$0xff] %v2663_v27  ;;  %963 = vrot.lane.b32.xlu1 %v2654_v57, %s1796_s10  ;;  %v2690_v27 = vld [vmem:[%s4283_s0 + $0x218] sm:$0x3f] }
 0x11b   :  { %961 = vrot.lane.b32.xlu0 %v2659_v56, %s1796_s10  ;;  %4407 = vst [vmem:[#allocation78_spill] sm:$0xff] %v2690_v27  ;;  %v2695_v56 = vld [vmem:[%s4283_s0 + $0x210] sm:$0xff] }
 0x11c   :  { %v2679_v63 = vpop.permute.xlu1 %515  ;;  %4408 = vst [vmem:[#allocation79_spill] sm:$0xff] %v2695_v56 }
 0x11d   :  { %4405 = vst [vmem:[#allocation76_spill] sm:$0xff] %v2679_v63  ;;  %v2681_v19 = vpop.permute.xlu0 %513 }
 0x11e   :  { %4406 = vst [vmem:[#allocation77_spill] sm:$0xff] %v2681_v19  ;;  %967 = vrot.lane.b32.xlu1 %v2672_v53, %s1796_s10  ;;  %v2708_v19 = vld [vmem:[%s4283_s0 + $0x238] sm:$0x3f] }
 0x11f   :  { %965 = vrot.lane.b32.xlu0 %v2677_v62, %s1796_s10  ;;  %4411 = vst [vmem:[#allocation82_spill] sm:$0xff] %v2708_v19  ;;  %v2713_v62 = vld [vmem:[%s4283_s0 + $0x230] sm:$0xff] }
 0x120   :  { %v2697_v57 = vpop.permute.xlu1 %519  ;;  %4412 = vst [vmem:[#allocation83_spill] sm:$0xff] %v2713_v62 }
 0x121   :  { %4409 = vst [vmem:[#allocation80_spill] sm:$0xff] %v2697_v57  ;;  %v2699_v63 = vpop.permute.xlu0 %517 }
 0x122   :  { %4410 = vst [vmem:[#allocation81_spill] sm:$0xff] %v2699_v63  ;;  %971 = vrot.lane.b32.xlu1 %v2690_v27, %s1796_s10  ;;  %v2726_v63 = vld [vmem:[%s4283_s0 + $0x258] sm:$0x3f] }
 0x123   :  { %969 = vrot.lane.b32.xlu0 %v2695_v56, %s1796_s10  ;;  %4415 = vst [vmem:[#allocation86_spill] sm:$0xff] %v2726_v63  ;;  %v2731_v56 = vld [vmem:[%s4283_s0 + $0x250] sm:$0xff] }
 0x124   :  { %v2715_v53 = vpop.permute.xlu1 %523  ;;  %4416 = vst [vmem:[#allocation87_spill] sm:$0xff] %v2731_v56 }
 0x125   :  { %4413 = vst [vmem:[#allocation84_spill] sm:$0xff] %v2715_v53  ;;  %v2717_v57 = vpop.permute.xlu0 %521 }
 0x126   :  { %4414 = vst [vmem:[#allocation85_spill] sm:$0xff] %v2717_v57  ;;  %975 = vrot.lane.b32.xlu1 %v2708_v19, %s1796_s10  ;;  %v2744_v57 = vld [vmem:[%s4283_s0 + $0x278] sm:$0x3f] }
 0x127   :  { %973 = vrot.lane.b32.xlu0 %v2713_v62, %s1796_s10  ;;  %4419 = vst [vmem:[#allocation90_spill] sm:$0xff] %v2744_v57  ;;  %v2749_v62 = vld [vmem:[%s4283_s0 + $0x270] sm:$0xff] }
 0x128   :  { %v2733_v27 = vpop.permute.xlu1 %527  ;;  %4420 = vst [vmem:[#allocation91_spill] sm:$0xff] %v2749_v62 }
 0x129   :  { %4417 = vst [vmem:[#allocation88_spill] sm:$0xff] %v2733_v27  ;;  %v2735_v53 = vpop.permute.xlu0 %525 }
 0x12a   :  { %4418 = vst [vmem:[#allocation89_spill] sm:$0xff] %v2735_v53  ;;  %979 = vrot.lane.b32.xlu1 %v2726_v63, %s1796_s10  ;;  %v2762_v53 = vld [vmem:[%s4283_s0 + $0x298] sm:$0x3f] }
 0x12b   :  { %977 = vrot.lane.b32.xlu0 %v2731_v56, %s1796_s10  ;;  %4423 = vst [vmem:[#allocation94_spill] sm:$0xff] %v2762_v53  ;;  %v2767_v56 = vld [vmem:[%s4283_s0 + $0x290] sm:$0xff] }
 0x12c   :  { %v2751_v19 = vpop.permute.xlu1 %531  ;;  %4424 = vst [vmem:[#allocation95_spill] sm:$0xff] %v2767_v56 }
 0x12d   :  { %4421 = vst [vmem:[#allocation92_spill] sm:$0xff] %v2751_v19  ;;  %v2753_v27 = vpop.permute.xlu0 %529 }
 0x12e   :  { %4422 = vst [vmem:[#allocation93_spill] sm:$0xff] %v2753_v27  ;;  %983 = vrot.lane.b32.xlu1 %v2744_v57, %s1796_s10  ;;  %v2780_v27 = vld [vmem:[%s4283_s0 + $0x2b8] sm:$0x3f] }
 0x12f   :  { %981 = vrot.lane.b32.xlu0 %v2749_v62, %s1796_s10  ;;  %4427 = vst [vmem:[#allocation98_spill] sm:$0xff] %v2780_v27  ;;  %v2785_v62 = vld [vmem:[%s4283_s0 + $0x2b0] sm:$0xff] }
 0x130   :  { %v2769_v63 = vpop.permute.xlu1 %535  ;;  %4428 = vst [vmem:[#allocation99_spill] sm:$0xff] %v2785_v62 }
 0x131   :  { %4425 = vst [vmem:[#allocation96_spill] sm:$0xff] %v2769_v63  ;;  %v2771_v19 = vpop.permute.xlu0 %533 }
 0x132   :  { %4426 = vst [vmem:[#allocation97_spill] sm:$0xff] %v2771_v19  ;;  %987 = vrot.lane.b32.xlu1 %v2762_v53, %s1796_s10  ;;  %v2798_v19 = vld [vmem:[%s4283_s0 + $0x2d8] sm:$0x3f] }
 0x133   :  { %985 = vrot.lane.b32.xlu0 %v2767_v56, %s1796_s10  ;;  %4431 = vst [vmem:[#allocation102_spill] sm:$0xff] %v2798_v19  ;;  %v2803_v56 = vld [vmem:[%s4283_s0 + $0x2d0] sm:$0xff] }
 0x134   :  { %v2787_v57 = vpop.permute.xlu1 %539  ;;  %4432 = vst [vmem:[#allocation103_spill] sm:$0xff] %v2803_v56 }
 0x135   :  { %4429 = vst [vmem:[#allocation100_spill] sm:$0xff] %v2787_v57  ;;  %v2789_v63 = vpop.permute.xlu0 %537 }
 0x136   :  { %4430 = vst [vmem:[#allocation101_spill] sm:$0xff] %v2789_v63  ;;  %991 = vrot.lane.b32.xlu1 %v2780_v27, %s1796_s10  ;;  %v2816_v63 = vld [vmem:[%s4283_s0 + $0x2f8] sm:$0x3f] }
 0x137   :  { %989 = vrot.lane.b32.xlu0 %v2785_v62, %s1796_s10  ;;  %4435 = vst [vmem:[#allocation106_spill] sm:$0xff] %v2816_v63  ;;  %v2821_v62 = vld [vmem:[%s4283_s0 + $0x2f0] sm:$0xff] }
 0x138   :  { %v2805_v53 = vpop.permute.xlu1 %543  ;;  %4436 = vst [vmem:[#allocation107_spill] sm:$0xff] %v2821_v62 }
 0x139   :  { %4433 = vst [vmem:[#allocation104_spill] sm:$0xff] %v2805_v53  ;;  %v2807_v57 = vpop.permute.xlu0 %541 }
 0x13a   :  { %4434 = vst [vmem:[#allocation105_spill] sm:$0xff] %v2807_v57  ;;  %995 = vrot.lane.b32.xlu1 %v2798_v19, %s1796_s10  ;;  %v2834_v57 = vld [vmem:[%s4283_s0 + $0x318] sm:$0x3f] }
 0x13b   :  { %993 = vrot.lane.b32.xlu0 %v2803_v56, %s1796_s10  ;;  %4439 = vst [vmem:[#allocation110_spill] sm:$0xff] %v2834_v57  ;;  %v2839_v56 = vld [vmem:[%s4283_s0 + $0x310] sm:$0xff] }
 0x13c   :  { %v2823_v27 = vpop.permute.xlu1 %547  ;;  %4440 = vst [vmem:[#allocation111_spill] sm:$0xff] %v2839_v56 }
 0x13d   :  { %4437 = vst [vmem:[#allocation108_spill] sm:$0xff] %v2823_v27  ;;  %v2825_v53 = vpop.permute.xlu0 %545 }
 0x13e   :  { %4438 = vst [vmem:[#allocation109_spill] sm:$0xff] %v2825_v53  ;;  %999 = vrot.lane.b32.xlu1 %v2816_v63, %s1796_s10  ;;  %v2852_v53 = vld [vmem:[%s4283_s0 + $0x338] sm:$0x3f] }
 0x13f   :  { %997 = vrot.lane.b32.xlu0 %v2821_v62, %s1796_s10  ;;  %4443 = vst [vmem:[#allocation114_spill] sm:$0xff] %v2852_v53  ;;  %v2857_v62 = vld [vmem:[%s4283_s0 + $0x330] sm:$0xff] }
 0x140   :  { %v2841_v19 = vpop.permute.xlu1 %551  ;;  %4444 = vst [vmem:[#allocation115_spill] sm:$0xff] %v2857_v62 }
 0x141   :  { %4441 = vst [vmem:[#allocation112_spill] sm:$0xff] %v2841_v19  ;;  %v2843_v27 = vpop.permute.xlu0 %549 }
 0x142   :  { %4442 = vst [vmem:[#allocation113_spill] sm:$0xff] %v2843_v27  ;;  %1003 = vrot.lane.b32.xlu1 %v2834_v57, %s1796_s10  ;;  %v2870_v27 = vld [vmem:[%s4283_s0 + $0x358] sm:$0x3f] }
 0x143   :  { %1001 = vrot.lane.b32.xlu0 %v2839_v56, %s1796_s10  ;;  %4447 = vst [vmem:[#allocation118_spill] sm:$0xff] %v2870_v27  ;;  %v2875_v56 = vld [vmem:[%s4283_s0 + $0x350] sm:$0xff] }
 0x144   :  { %v2859_v63 = vpop.permute.xlu1 %555  ;;  %4448 = vst [vmem:[#allocation119_spill] sm:$0xff] %v2875_v56 }
 0x145   :  { %4445 = vst [vmem:[#allocation116_spill] sm:$0xff] %v2859_v63  ;;  %v2861_v19 = vpop.permute.xlu0 %553 }
 0x146   :  { %4446 = vst [vmem:[#allocation117_spill] sm:$0xff] %v2861_v19  ;;  %1007 = vrot.lane.b32.xlu1 %v2852_v53, %s1796_s10  ;;  %v2888_v19 = vld [vmem:[%s4283_s0 + $0x378] sm:$0x3f] }
 0x147   :  { %1005 = vrot.lane.b32.xlu0 %v2857_v62, %s1796_s10  ;;  %4451 = vst [vmem:[#allocation122_spill] sm:$0xff] %v2888_v19  ;;  %v2893_v62 = vld [vmem:[%s4283_s0 + $0x370] sm:$0xff] }
 0x148   :  { %v2877_v57 = vpop.permute.xlu1 %559  ;;  %4452 = vst [vmem:[#allocation123_spill] sm:$0xff] %v2893_v62 }
 0x149   :  { %4449 = vst [vmem:[#allocation120_spill] sm:$0xff] %v2877_v57  ;;  %v2879_v63 = vpop.permute.xlu0 %557 }
 0x14a   :  { %4450 = vst [vmem:[#allocation121_spill] sm:$0xff] %v2879_v63  ;;  %1011 = vrot.lane.b32.xlu1 %v2870_v27, %s1796_s10  ;;  %v2906_v63 = vld [vmem:[%s4283_s0 + $0x398] sm:$0x3f] }
 0x14b   :  { %1009 = vrot.lane.b32.xlu0 %v2875_v56, %s1796_s10  ;;  %4455 = vst [vmem:[#allocation126_spill] sm:$0xff] %v2906_v63  ;;  %v2911_v56 = vld [vmem:[%s4283_s0 + $0x390] sm:$0xff] }
 0x14c   :  { %v2895_v53 = vpop.permute.xlu1 %563  ;;  %4456 = vst [vmem:[#allocation127_spill] sm:$0xff] %v2911_v56 }
 0x14d   :  { %4453 = vst [vmem:[#allocation124_spill] sm:$0xff] %v2895_v53  ;;  %v2897_v57 = vpop.permute.xlu0 %561 }
 0x14e   :  { %4454 = vst [vmem:[#allocation125_spill] sm:$0xff] %v2897_v57  ;;  %1015 = vrot.lane.b32.xlu1 %v2888_v19, %s1796_s10  ;;  %v2924_v57 = vld [vmem:[%s4283_s0 + $0x3b8] sm:$0x3f] }
 0x14f   :  { %1013 = vrot.lane.b32.xlu0 %v2893_v62, %s1796_s10  ;;  %v2929_v62 = vld [vmem:[%s4283_s0 + $0x3b0] sm:$0xff] }
 0x150   :  { %v2913_v27 = vpop.permute.xlu1 %567 }
 0x151   :  { %4457 = vst [vmem:[#allocation128_spill] sm:$0xff] %v2913_v27  ;;  %v2915_v53 = vpop.permute.xlu0 %565 }
 0x152   :  { %4458 = vst [vmem:[#allocation129_spill] sm:$0xff] %v2915_v53  ;;  %1019 = vrot.lane.b32.xlu1 %v2906_v63, %s1796_s10  ;;  %v681_v53 = vmax.f32 %v1815_v1, %v2083_v61  ;;  %v682_v63 = vmax.f32 %v1829_v3, %v2095_v13  ;;  %v2944_v1 = vld [vmem:[%s4283_s0 + $0x3d8] sm:$0x3f]  ;;  %v2949_v3 = vld [vmem:[%s4283_s0 + $0x3d0] sm:$0xff] }
 0x153   :  { %1017 = vrot.lane.b32.xlu0 %v2911_v56, %s1796_s10 }
 0x154   :  { %v908_v19 = vpop.permute.xlu1 %907 }
 0x155   :  { %v906_v27 = vpop.permute.xlu0 %905  ;;  %v1242_v56 = vmax.f32 %v2402_v14, %v908_v19  ;;  %v683_v19 = vmax.f32 %v1810_v0, %v2081_v60  ;;  %v2972_v60 = vld [vmem:[%s4283_s0 + $0x3f8] sm:$0x3f] }
 0x156   :  { %v1241_v52 = vmax.f32 %v2407_v15, %v906_v27  ;;  %1023 = vrot.lane.b32.xlu1 %v2924_v57, %s1796_s10  ;;  %v684_v27 = vmax.f32 %v1824_v2, %v2093_v12  ;;  %v2977_v12 = vld [vmem:[%s4283_s0 + $0x3f0] sm:$0xff] }
 0x157   :  { %1021 = vrot.lane.b32.xlu0 %v2929_v62, %s1796_s10  ;;  %v1354_v18 = vmax.f32 %v682_v63, %v1242_v56 }
 0x158   :  { %v1353_v35 = vmax.f32 %v681_v53, %v1241_v52  ;;  %v912_v61 = vpop.permute.xlu1 %911 }
 0x159   :  { %v910_v13 = vpop.permute.xlu0 %909  ;;  %1468 = vst.msk [vmem:[%s4284_s1 + $0x8] sm:$0x3f] %vm1467_vm0, %v1354_v18  ;;  %v1244_v52 = vmax.f32 %v2420_v46, %v912_v61  ;;  %v686_v18 = vmax.f32 %v1838_v4, %v2105_v16  ;;  %v3000_v16 = vld [vmem:[%s4283_s0 + $0x418] sm:$0x3f]  ;;  %v688_v46 = vmax.f32 %v1852_v6, %v2117_v20 }
 0x15a   :  { %1466 = vst.msk [vmem:[%s4284_s1] sm:$0xff] %vm1465_vm1, %v1353_v35  ;;  %v1243_v53 = vmax.f32 %v2425_v47, %v910_v13  ;;  %1027 = vrot.lane.b32.xlu1 %v2944_v1, %s1796_s10  ;;  %v685_v35 = vmax.f32 %v1843_v5, %v2107_v17  ;;  %v3005_v17 = vld [vmem:[%s4283_s0 + $0x410] sm:$0xff]  ;;  %v687_v47 = vmax.f32 %v1857_v7, %v2119_v21  ;;  %v3028_v20 = vld [vmem:[%s4283_s0 + $0x438] sm:$0x3f] }
 0x15b   :  { %1025 = vrot.lane.b32.xlu0 %v2949_v3, %s1796_s10  ;;  %v1356_v0 = vmax.f32 %v684_v27, %v1244_v52  ;;  %v3033_v21 = vld [vmem:[%s4283_s0 + $0x430] sm:$0xff]  ;;  %v689_v27 = vmax.f32 %v1871_v9, %v2131_v25 }
 0x15c   :  { %v1355_v2 = vmax.f32 %v683_v19, %v1243_v53  ;;  %v916_v56 = vpop.permute.xlu1 %915  ;;  %v690_v19 = vmax.f32 %v1866_v8, %v2129_v24  ;;  %v3056_v24 = vld [vmem:[%s4283_s0 + $0x458] sm:$0x3f]  ;;  %v3061_v25 = vld [vmem:[%s4283_s0 + $0x450] sm:$0xff] }
 0x15d   :  { %v914_v63 = vpop.permute.xlu0 %913  ;;  %1470 = vst.msk [vmem:[%s4284_s1 + $0x18] sm:$0x3f] %vm1467_vm0, %v1356_v0  ;;  %v1246_v14 = vmax.f32 %v2438_v31, %v916_v56  ;;  %v692_v0 = vmax.f32 %v1880_v10, %v2141_v28  ;;  %v3084_v28 = vld [vmem:[%s4283_s0 + $0x478] sm:$0x3f] }
 0x15e   :  { %1469 = vst.msk [vmem:[%s4284_s1 + $0x10] sm:$0xff] %vm1465_vm1, %v1355_v2  ;;  %v1245_v15 = vmax.f32 %v2443_v54, %v914_v63  ;;  %1031 = vrot.lane.b32.xlu1 %v2972_v60, %s1796_s10  ;;  %v691_v2 = vmax.f32 %v1885_v11, %v2143_v29  ;;  %v3089_v29 = vld [vmem:[%s4283_s0 + $0x470] sm:$0xff] }
 0x15f   :  { %1029 = vrot.lane.b32.xlu0 %v2977_v12, %s1796_s10  ;;  %v1358_v4 = vmax.f32 %v686_v18, %v1246_v14  ;;  %v1696_v18 = vld [vmem:[%s4283_s0 + $0xc8] sm:$0x3f]  ;;  %v1697_v14 = vld [vmem:[%s4283_s0 + $0xc0] sm:$0xff] }
 0x160   :  { %v1357_v5 = vmax.f32 %v685_v35, %v1245_v15  ;;  %v920_v31 = vpop.permute.xlu1 %919  ;;  %v694_v35 = vmax.f32 %v1696_v18, %v2153_v32  ;;  %v693_v15 = vmax.f32 %v1697_v14, %v2155_v33  ;;  %v1704_v18 = vld [vmem:[%s4283_s0 + $0x148] sm:$0x3f]  ;;  %v1705_v14 = vld [vmem:[%s4283_s0 + $0x140] sm:$0xff] }
 0x161   :  { %v918_v54 = vpop.permute.xlu0 %917  ;;  %1472 = vst.msk [vmem:[%s4284_s1 + $0x28] sm:$0x3f] %vm1467_vm0, %v1358_v4  ;;  %v1248_v61 = vmax.f32 %v2456_v30, %v920_v31  ;;  %v3116_v31 = vld [vmem:[%s4283_s0 + $0x498] sm:$0x3f] }
 0x162   :  { %1471 = vst.msk [vmem:[%s4284_s1 + $0x20] sm:$0xff] %vm1465_vm1, %v1357_v5  ;;  %v1247_v13 = vmax.f32 %v2461_v38, %v918_v54  ;;  %1035 = vrot.lane.b32.xlu1 %v3000_v16, %s1796_s10  ;;  %v3121_v54 = vld [vmem:[%s4283_s0 + $0x490] sm:$0xff] }
 0x163   :  { %1033 = vrot.lane.b32.xlu0 %v3005_v17, %s1796_s10  ;;  %v1360_v6 = vmax.f32 %v688_v46, %v1248_v61  ;;  %v1698_v46 = vld [vmem:[%s4283_s0 + $0xe8] sm:$0x3f]  ;;  %v1699_v61 = vld [vmem:[%s4283_s0 + $0xe0] sm:$0xff] }
 0x164   :  { %v1359_v7 = vmax.f32 %v687_v47, %v1247_v13  ;;  %v924_v30 = vpop.permute.xlu1 %923  ;;  %v696_v47 = vmax.f32 %v1698_v46, %v2165_v36  ;;  %v695_v13 = vmax.f32 %v1699_v61, %v2167_v37  ;;  %v1706_v61 = vld [vmem:[%s4283_s0 + $0x168] sm:$0x3f] }
 0x165   :  { %v922_v38 = vpop.permute.xlu0 %921  ;;  %1474 = vst.msk [vmem:[%s4284_s1 + $0x38] sm:$0x3f] %vm1467_vm0, %v1360_v6  ;;  %v1250_v52 = vmax.f32 %v2474_v55, %v924_v30  ;;  %v3148_v30 = vld [vmem:[%s4283_s0 + $0x4b8] sm:$0x3f] }
 0x166   :  { %1473 = vst.msk [vmem:[%s4284_s1 + $0x30] sm:$0xff] %vm1465_vm1, %v1359_v7  ;;  %v1249_v53 = vmax.f32 %v2479_v22, %v922_v38  ;;  %1039 = vrot.lane.b32.xlu1 %v3028_v20, %s1796_s10  ;;  %v3153_v38 = vld [vmem:[%s4283_s0 + $0x4b0] sm:$0xff] }
 0x167   :  { %1037 = vrot.lane.b32.xlu0 %v3033_v21, %s1796_s10  ;;  %v1362_v8 = vmax.f32 %v690_v19, %v1250_v52  ;;  %v1700_v19 = vld [vmem:[%s4283_s0 + $0x108] sm:$0x3f]  ;;  %v1701_v52 = vld [vmem:[%s4283_s0 + $0x100] sm:$0xff] }
 0x168   :  { %v1361_v9 = vmax.f32 %v689_v27, %v1249_v53  ;;  %v928_v55 = vpop.permute.xlu1 %927  ;;  %v698_v27 = vmax.f32 %v1700_v19, %v2177_v40  ;;  %v697_v53 = vmax.f32 %v1701_v52, %v2179_v41  ;;  %v4464_v19 = vld [vmem:[#allocation59_spill] sm:$0xff] }
 0x169   :  { %v926_v22 = vpop.permute.xlu0 %925  ;;  %1476 = vst.msk [vmem:[%s4284_s1 + $0x48] sm:$0x3f] %vm1467_vm0, %v1362_v8  ;;  %v1252_v56 = vmax.f32 %v2492_v39, %v928_v55  ;;  %v3180_v55 = vld [vmem:[%s4283_s0 + $0x4d8] sm:$0x3f] }
 0x16a   :  { %1475 = vst.msk [vmem:[%s4284_s1 + $0x40] sm:$0xff] %vm1465_vm1, %v1361_v9  ;;  %v1251_v63 = vmax.f32 %v2497_v58, %v926_v22  ;;  %1043 = vrot.lane.b32.xlu1 %v3056_v24, %s1796_s10  ;;  %v3185_v22 = vld [vmem:[%s4283_s0 + $0x4d0] sm:$0xff] }
 0x16b   :  { %1041 = vrot.lane.b32.xlu0 %v3061_v25, %s1796_s10  ;;  %v1364_v10 = vmax.f32 %v692_v0, %v1252_v56  ;;  %v1702_v0 = vld [vmem:[%s4283_s0 + $0x128] sm:$0x3f]  ;;  %v1703_v56 = vld [vmem:[%s4283_s0 + $0x120] sm:$0xff] }
 0x16c   :  { %v1363_v11 = vmax.f32 %v691_v2, %v1251_v63  ;;  %v932_v39 = vpop.permute.xlu1 %931  ;;  %v700_v2 = vmax.f32 %v1702_v0, %v2189_v44  ;;  %v699_v63 = vmax.f32 %v1703_v56, %v2191_v45  ;;  %v4466_v56 = vld [vmem:[#allocation5_spill] sm:$0xff] }
 0x16d   :  { %v930_v58 = vpop.permute.xlu0 %929  ;;  %1478 = vst.msk [vmem:[%s4284_s1 + $0x58] sm:$0x3f] %vm1467_vm0, %v1364_v10  ;;  %v1254_v4 = vmax.f32 %v2510_v23, %v932_v39  ;;  %v3212_v39 = vld [vmem:[%s4283_s0 + $0x4f8] sm:$0x3f] }
 0x16e   :  { %1477 = vst.msk [vmem:[%s4284_s1 + $0x50] sm:$0xff] %vm1465_vm1, %v1363_v11  ;;  %v1253_v32 = vmax.f32 %v2515_v50, %v930_v58  ;;  %1047 = vrot.lane.b32.xlu1 %v3084_v28, %s1796_s10  ;;  %v3217_v58 = vld [vmem:[%s4283_s0 + $0x4f0] sm:$0xff] }
 0x16f   :  { %1045 = vrot.lane.b32.xlu0 %v3089_v29, %s1796_s10  ;;  %v1366_v33 = vmax.f32 %v694_v35, %v1254_v4  ;;  %v702_v35 = vmax.f32 %v1704_v18, %v2201_v48  ;;  %v4459_v4 = vld [vmem:[#allocation54_spill] sm:$0xff]  ;;  %v3308_v18 = vld [vmem:[%s4283_s0 + $0x558] sm:$0x3f] }
 0x170   :  { %v1365_v5 = vmax.f32 %v693_v15, %v1253_v32  ;;  %v936_v23 = vpop.permute.xlu1 %935  ;;  %v701_v15 = vmax.f32 %v1705_v14, %v2203_v49 }
 0x171   :  { %v934_v50 = vpop.permute.xlu0 %933  ;;  %1480 = vst.msk [vmem:[%s4284_s1 + $0x68] sm:$0x3f] %vm1467_vm0, %v1366_v33  ;;  %v1256_v6 = vmax.f32 %v2528_v59, %v936_v23  ;;  %v4460_v33 = vld [vmem:[#allocation55_spill] sm:$0xff]  ;;  %v3244_v23 = vld [vmem:[%s4283_s0 + $0x518] sm:$0x3f] }
 0x172   :  { %1479 = vst.msk [vmem:[%s4284_s1 + $0x60] sm:$0xff] %vm1465_vm1, %v1365_v5  ;;  %v1255_v36 = vmax.f32 %v2533_v42, %v934_v50  ;;  %1051 = vrot.lane.b32.xlu1 %v3116_v31, %s1796_s10  ;;  %v3249_v50 = vld [vmem:[%s4283_s0 + $0x510] sm:$0xff] }
 0x173   :  { %1049 = vrot.lane.b32.xlu0 %v3121_v54, %s1796_s10  ;;  %v1368_v37 = vmax.f32 %v696_v47, %v1256_v6 }
 0x174   :  { %v1367_v7 = vmax.f32 %v695_v13, %v1255_v36  ;;  %v940_v59 = vpop.permute.xlu1 %939  ;;  %v4461_v13 = vld [vmem:[#allocation2_spill] sm:$0xff] }
 0x175   :  { %v938_v42 = vpop.permute.xlu0 %937  ;;  %1482 = vst.msk [vmem:[%s4284_s1 + $0x78] sm:$0x3f] %vm1467_vm0, %v1368_v37  ;;  %v1258_v8 = vmax.f32 %v2546_v51, %v940_v59  ;;  %v704_v6 = vmax.f32 %v1706_v61, %v4461_v13  ;;  %v1707_v36 = vld [vmem:[%s4283_s0 + $0x160] sm:$0xff]  ;;  %v4462_v37 = vld [vmem:[#allocation3_spill] sm:$0xff] }
 0x176   :  { %1481 = vst.msk [vmem:[%s4284_s1 + $0x70] sm:$0xff] %vm1465_vm1, %v1367_v7  ;;  %v1257_v40 = vmax.f32 %v2551_v34, %v938_v42  ;;  %1055 = vrot.lane.b32.xlu1 %v3148_v30, %s1796_s10  ;;  %v703_v7 = vmax.f32 %v1707_v36, %v4462_v37  ;;  %v4463_v59 = vld [vmem:[#allocation58_spill] sm:$0xff]  ;;  %v4472_v61 = vld [vmem:[#allocation67_spill] sm:$0xff]  ;;  %v3340_v37 = vld [vmem:[%s4283_s0 + $0x578] sm:$0x3f] }
 0x177   :  { %1053 = vrot.lane.b32.xlu0 %v3153_v38, %s1796_s10  ;;  %v1370_v41 = vmax.f32 %v698_v27, %v1258_v8  ;;  %v3276_v8 = vld [vmem:[%s4283_s0 + $0x538] sm:$0x3f] }
 0x178   :  { %v1369_v9 = vmax.f32 %v697_v53, %v1257_v40  ;;  %v944_v51 = vpop.permute.xlu1 %943  ;;  %v3281_v40 = vld [vmem:[%s4283_s0 + $0x530] sm:$0xff] }
 0x179   :  { %v942_v34 = vpop.permute.xlu0 %941  ;;  %1484 = vst.msk [vmem:[%s4284_s1 + $0x88] sm:$0x3f] %vm1467_vm0, %v1370_v41  ;;  %v1260_v10 = vmax.f32 %v2564_v43, %v944_v51  ;;  %v1708_v51 = vld [vmem:[%s4283_s0 + $0x188] sm:$0x3f] }
 0x17a   :  { %1483 = vst.msk [vmem:[%s4284_s1 + $0x80] sm:$0xff] %vm1465_vm1, %v1369_v9  ;;  %v1259_v44 = vmax.f32 %v2569_v26, %v942_v34  ;;  %1059 = vrot.lane.b32.xlu1 %v3180_v55, %s1796_s10  ;;  %v4465_v34 = vld [vmem:[#allocation4_spill] sm:$0xff] }
 0x17b   :  { %1057 = vrot.lane.b32.xlu0 %v3185_v22, %s1796_s10  ;;  %v1372_v45 = vmax.f32 %v700_v2, %v1260_v10  ;;  %v706_v0 = vmax.f32 %v1708_v51, %v4465_v34  ;;  %v1709_v2 = vld [vmem:[%s4283_s0 + $0x180] sm:$0xff] }
 0x17c   :  { %v1371_v11 = vmax.f32 %v699_v63, %v1259_v44  ;;  %v948_v43 = vpop.permute.xlu1 %947  ;;  %v705_v63 = vmax.f32 %v1709_v2, %v4466_v56  ;;  %v4467_v10 = vld [vmem:[#allocation62_spill] sm:$0xff] }
 0x17d   :  { %v946_v26 = vpop.permute.xlu0 %945  ;;  %1486 = vst.msk [vmem:[%s4284_s1 + $0x98] sm:$0x3f] %vm1467_vm0, %v1372_v45  ;;  %v1262_v32 = vmax.f32 %v4459_v4, %v948_v43  ;;  %v4468_v45 = vld [vmem:[#allocation63_spill] sm:$0xff]  ;;  %v4475_v51 = vld [vmem:[#allocation70_spill] sm:$0xff] }
 0x17e   :  { %1485 = vst.msk [vmem:[%s4284_s1 + $0x90] sm:$0xff] %vm1465_vm1, %v1371_v11  ;;  %v1261_v48 = vmax.f32 %v4460_v33, %v946_v26  ;;  %1063 = vrot.lane.b32.xlu1 %v3212_v39, %s1796_s10  ;;  %v1710_v4 = vld [vmem:[%s4283_s0 + $0x1a8] sm:$0x3f] }
 0x17f   :  { %1061 = vrot.lane.b32.xlu0 %v3217_v58, %s1796_s10  ;;  %v1374_v49 = vmax.f32 %v702_v35, %v1262_v32  ;;  %v3313_v35 = vld [vmem:[%s4283_s0 + $0x550] sm:$0xff]  ;;  %v4469_v32 = vld [vmem:[#allocation6_spill] sm:$0xff] }
 0x180   :  { %v1373_v5 = vmax.f32 %v701_v15, %v1261_v48  ;;  %v952_v46 = vpop.permute.xlu1 %951  ;;  %v708_v33 = vmax.f32 %v1710_v4, %v4469_v32  ;;  %v1711_v48 = vld [vmem:[%s4283_s0 + $0x1a0] sm:$0xff]  ;;  %v4478_v4 = vld [vmem:[#allocation11_spill] sm:$0xff] }
 0x181   :  { %v950_v47 = vpop.permute.xlu0 %949  ;;  %1488 = vst.msk [vmem:[%s4284_s1 + $0xa8] sm:$0x3f] %vm1467_vm0, %v1374_v49  ;;  %v1264_v42 = vmax.f32 %v4463_v59, %v952_v46  ;;  %v4470_v49 = vld [vmem:[#allocation7_spill] sm:$0xff]  ;;  %v4471_v46 = vld [vmem:[#allocation66_spill] sm:$0xff] }
 0x182   :  { %1487 = vst.msk [vmem:[%s4284_s1 + $0xa0] sm:$0xff] %vm1465_vm1, %v1373_v5  ;;  %v1263_v27 = vmax.f32 %v4464_v19, %v950_v47  ;;  %1067 = vrot.lane.b32.xlu1 %v3244_v23, %s1796_s10  ;;  %v707_v5 = vmax.f32 %v1711_v48, %v4470_v49  ;;  %v1712_v19 = vld [vmem:[%s4283_s0 + $0x1c8] sm:$0x3f] }
 0x183   :  { %1065 = vrot.lane.b32.xlu0 %v3249_v50, %s1796_s10  ;;  %v1376_v52 = vmax.f32 %v704_v6, %v1264_v42  ;;  %v4480_v49 = vld [vmem:[#allocation75_spill] sm:$0xff] }
 0x184   :  { %v1375_v53 = vmax.f32 %v703_v7, %v1263_v27  ;;  %v956_v41 = vpop.permute.xlu1 %955  ;;  %v3345_v7 = vld [vmem:[%s4283_s0 + $0x570] sm:$0xff] }
 0x185   :  { %v954_v9 = vpop.permute.xlu0 %953  ;;  %1490 = vst.msk [vmem:[%s4284_s1 + $0xb8] sm:$0x3f] %vm1467_vm0, %v1376_v52  ;;  %v1266_v44 = vmax.f32 %v4467_v10, %v956_v41  ;;  %v4473_v27 = vld [vmem:[#allocation8_spill] sm:$0xff]  ;;  %v4474_v41 = vld [vmem:[#allocation9_spill] sm:$0xff] }
 0x186   :  { %1489 = vst.msk [vmem:[%s4284_s1 + $0xb0] sm:$0xff] %vm1465_vm1, %v1375_v53  ;;  %v1265_v11 = vmax.f32 %v4468_v45, %v954_v9  ;;  %1071 = vrot.lane.b32.xlu1 %v3276_v8, %s1796_s10  ;;  %v710_v52 = vmax.f32 %v1712_v19, %v4473_v27  ;;  %v1713_v53 = vld [vmem:[%s4283_s0 + $0x1c0] sm:$0xff]  ;;  %v3372_v10 = vld [vmem:[%s4283_s0 + $0x598] sm:$0x3f] }
 0x187   :  { %1069 = vrot.lane.b32.xlu0 %v3281_v40, %s1796_s10  ;;  %v1378_v43 = vmax.f32 %v706_v0, %v1266_v44  ;;  %v709_v9 = vmax.f32 %v1713_v53, %v4474_v41  ;;  %v4476_v0 = vld [vmem:[#allocation71_spill] sm:$0xff]  ;;  %v3377_v44 = vld [vmem:[%s4283_s0 + $0x590] sm:$0xff]  ;;  %v1717_v27 = vld [vmem:[%s4283_s0 + $0x200] sm:$0xff] }
 0x188   :  { %v1377_v26 = vmax.f32 %v705_v63, %v1265_v11  ;;  %v960_v14 = vpop.permute.xlu1 %959  ;;  %v4483_v41 = vld [vmem:[#allocation78_spill] sm:$0xff] }
 0x189   :  { %v958_v15 = vpop.permute.xlu0 %957  ;;  %1492 = vst.msk [vmem:[%s4284_s1 + $0xc8] sm:$0x3f] %vm1467_vm0, %v1378_v43  ;;  %v1268_v47 = vmax.f32 %v4471_v46, %v960_v14  ;;  %v1714_v43 = vld [vmem:[%s4283_s0 + $0x1e8] sm:$0x3f] }
 0x18a   :  { %1491 = vst.msk [vmem:[%s4284_s1 + $0xc0] sm:$0xff] %vm1465_vm1, %v1377_v26  ;;  %v1267_v13 = vmax.f32 %v4472_v61, %v958_v15  ;;  %1075 = vrot.lane.b32.xlu1 %v3308_v18, %s1796_s10  ;;  %v4477_v26 = vld [vmem:[#allocation10_spill] sm:$0xff]  ;;  %v3404_v61 = vld [vmem:[%s4283_s0 + $0x5b8] sm:$0x3f] }
 0x18b   :  { %1073 = vrot.lane.b32.xlu0 %v3313_v35, %s1796_s10  ;;  %v1380_v6 = vmax.f32 %v708_v33, %v1268_v47  ;;  %v712_v14 = vmax.f32 %v1714_v43, %v4477_v26  ;;  %v1715_v15 = vld [vmem:[%s4283_s0 + $0x1e0] sm:$0xff]  ;;  %v1718_v43 = vld [vmem:[%s4283_s0 + $0x228] sm:$0x3f] }
 0x18c   :  { %v1379_v36 = vmax.f32 %v707_v5, %v1267_v13  ;;  %v964_v59 = vpop.permute.xlu1 %963  ;;  %v711_v32 = vmax.f32 %v1715_v15, %v4478_v4  ;;  %v4479_v33 = vld [vmem:[#allocation74_spill] sm:$0xff]  ;;  %v3409_v13 = vld [vmem:[%s4283_s0 + $0x5b0] sm:$0xff]  ;;  %v4486_v4 = vld [vmem:[#allocation15_spill] sm:$0xff] }
 0x18d   :  { %v962_v42 = vpop.permute.xlu0 %961  ;;  %1494 = vst.msk [vmem:[%s4284_s1 + $0xd8] sm:$0x3f] %vm1467_vm0, %v1380_v6  ;;  %v1270_v34 = vmax.f32 %v4475_v51, %v964_v59  ;;  %v1716_v59 = vld [vmem:[%s4283_s0 + $0x208] sm:$0x3f]  ;;  %v4485_v26 = vld [vmem:[#allocation14_spill] sm:$0xff] }
 0x18e   :  { %1493 = vst.msk [vmem:[%s4284_s1 + $0xd0] sm:$0xff] %vm1465_vm1, %v1379_v36  ;;  %v1269_v2 = vmax.f32 %v4476_v0, %v962_v42  ;;  %1079 = vrot.lane.b32.xlu1 %v3340_v37, %s1796_s10  ;;  %v4481_v42 = vld [vmem:[#allocation12_spill] sm:$0xff]  ;;  %v4484_v51 = vld [vmem:[#allocation79_spill] sm:$0xff]  ;;  %v1719_v15 = vld [vmem:[%s4283_s0 + $0x220] sm:$0xff] }
 0x18f   :  { %1077 = vrot.lane.b32.xlu0 %v3345_v7, %s1796_s10  ;;  %v1382_v56 = vmax.f32 %v710_v52, %v1270_v34  ;;  %v714_v19 = vmax.f32 %v1716_v59, %v4481_v42  ;;  %v4482_v52 = vld [vmem:[#allocation13_spill] sm:$0xff] }
 0x190   :  { %v1381_v63 = vmax.f32 %v709_v9, %v1269_v2  ;;  %v968_v45 = vpop.permute.xlu1 %967  ;;  %v713_v53 = vmax.f32 %v1717_v27, %v4482_v52  ;;  %v4489_v27 = vld [vmem:[#allocation16_spill] sm:$0xff] }
 0x191   :  { %v966_v11 = vpop.permute.xlu0 %965  ;;  %1496 = vst.msk [vmem:[%s4284_s1 + $0xe8] sm:$0x3f] %vm1467_vm0, %v1382_v56  ;;  %v1272_v48 = vmax.f32 %v4479_v33, %v968_v45  ;;  %v3436_v56 = vld [vmem:[%s4283_s0 + $0x5d8] sm:$0x3f]  ;;  %v4487_v33 = vld [vmem:[#allocation82_spill] sm:$0xff] }
 0x192   :  { %1495 = vst.msk [vmem:[%s4284_s1 + $0xe0] sm:$0xff] %vm1465_vm1, %v1381_v63  ;;  %v1271_v5 = vmax.f32 %v4480_v49, %v966_v11  ;;  %1083 = vrot.lane.b32.xlu1 %v3372_v10, %s1796_s10  ;;  %v3441_v63 = vld [vmem:[%s4283_s0 + $0x5d0] sm:$0xff]  ;;  %v4488_v49 = vld [vmem:[#allocation83_spill] sm:$0xff] }
 0x193   :  { %1081 = vrot.lane.b32.xlu0 %v3377_v44, %s1796_s10  ;;  %v1384_v46 = vmax.f32 %v712_v14, %v1272_v48  ;;  %v716_v14 = vmax.f32 %v1718_v43, %v4485_v26  ;;  %v3500_v43 = vld [vmem:[%s4283_s0 + $0x618] sm:$0x3f]  ;;  %v3505_v26 = vld [vmem:[%s4283_s0 + $0x610] sm:$0xff] }
 0x194   :  { %v1383_v47 = vmax.f32 %v711_v32, %v1271_v5  ;;  %v972_v6 = vpop.permute.xlu1 %971  ;;  %v715_v32 = vmax.f32 %v1719_v15, %v4486_v4  ;;  %v1722_v4 = vld [vmem:[%s4283_s0 + $0x268] sm:$0x3f] }
 0x195   :  { %v970_v36 = vpop.permute.xlu0 %969  ;;  %1498 = vst.msk [vmem:[%s4284_s1 + $0xf8] sm:$0x3f] %vm1467_vm0, %v1384_v46  ;;  %v1274_v9 = vmax.f32 %v4483_v41, %v972_v6  ;;  %v3468_v6 = vld [vmem:[%s4283_s0 + $0x5f8] sm:$0x3f] }
 0x196   :  { %1497 = vst.msk [vmem:[%s4284_s1 + $0xf0] sm:$0xff] %vm1465_vm1, %v1383_v47  ;;  %v1273_v34 = vmax.f32 %v4484_v51, %v970_v36  ;;  %1087 = vrot.lane.b32.xlu1 %v3404_v61, %s1796_s10  ;;  %v3473_v36 = vld [vmem:[%s4283_s0 + $0x5f0] sm:$0xff]  ;;  %v4490_v41 = vld [vmem:[#allocation17_spill] sm:$0xff]  ;;  %v4491_v51 = vld [vmem:[#allocation86_spill] sm:$0xff] }
 0x197   :  { %1085 = vrot.lane.b32.xlu0 %v3409_v13, %s1796_s10  ;;  %v1386_v0 = vmax.f32 %v714_v19, %v1274_v9  ;;  %v1720_v19 = vld [vmem:[%s4283_s0 + $0x248] sm:$0x3f] }
 0x198   :  { %v1385_v2 = vmax.f32 %v713_v53, %v1273_v34  ;;  %v976_v45 = vpop.permute.xlu1 %975  ;;  %v718_v52 = vmax.f32 %v1720_v19, %v4489_v27  ;;  %v1721_v53 = vld [vmem:[%s4283_s0 + $0x240] sm:$0xff] }
 0x199   :  { %v974_v11 = vpop.permute.xlu0 %973  ;;  %1500 = vst.msk [vmem:[%s4284_s1 + $0x108] sm:$0x3f] %vm1467_vm0, %v1386_v0  ;;  %v1276_v48 = vmax.f32 %v4487_v33, %v976_v45  ;;  %v717_v9 = vmax.f32 %v1721_v53, %v4490_v41  ;;  %v4492_v0 = vld [vmem:[#allocation87_spill] sm:$0xff]  ;;  %v3537_v53 = vld [vmem:[%s4283_s0 + $0x630] sm:$0xff] }
 0x19a   :  { %1499 = vst.msk [vmem:[%s4284_s1 + $0x100] sm:$0xff] %vm1465_vm1, %v1385_v2  ;;  %v1275_v5 = vmax.f32 %v4488_v49, %v974_v11  ;;  %1091 = vrot.lane.b32.xlu1 %v3436_v56, %s1796_s10  ;;  %v4494_v49 = vld [vmem:[#allocation19_spill] sm:$0xff] }
 0x19b   :  { %1089 = vrot.lane.b32.xlu0 %v3441_v63, %s1796_s10  ;;  %v1388_v46 = vmax.f32 %v716_v14, %v1276_v48  ;;  %v1723_v48 = vld [vmem:[%s4283_s0 + $0x260] sm:$0xff] }
 0x19c   :  { %v1387_v47 = vmax.f32 %v715_v32, %v1275_v5  ;;  %v980_v59 = vpop.permute.xlu1 %979  ;;  %v4493_v32 = vld [vmem:[#allocation18_spill] sm:$0xff]  ;;  %v719_v5 = vmax.f32 %v1723_v48, %v4494_v49  ;;  %v3564_v49 = vld [vmem:[%s4283_s0 + $0x658] sm:$0x3f] }
 0x19d   :  { %v978_v42 = vpop.permute.xlu0 %977  ;;  %1502 = vst.msk [vmem:[%s4284_s1 + $0x118] sm:$0x3f] %vm1467_vm0, %v1388_v46  ;;  %v1278_v34 = vmax.f32 %v4491_v51, %v980_v59  ;;  %v720_v33 = vmax.f32 %v1722_v4, %v4493_v32  ;;  %v4495_v46 = vld [vmem:[#allocation90_spill] sm:$0xff]  ;;  %v4496_v59 = vld [vmem:[#allocation91_spill] sm:$0xff] }
 0x19e   :  { %1501 = vst.msk [vmem:[%s4284_s1 + $0x110] sm:$0xff] %vm1465_vm1, %v1387_v47  ;;  %v1277_v2 = vmax.f32 %v4492_v0, %v978_v42  ;;  %1095 = vrot.lane.b32.xlu1 %v3468_v6, %s1796_s10  ;;  %v1724_v51 = vld [vmem:[%s4283_s0 + $0x288] sm:$0x3f] }
 0x19f   :  { %1093 = vrot.lane.b32.xlu0 %v3473_v36, %s1796_s10  ;;  %v1390_v45 = vmax.f32 %v718_v52, %v1278_v34  ;;  %v3532_v52 = vld [vmem:[%s4283_s0 + $0x638] sm:$0x3f]  ;;  %v4497_v34 = vld [vmem:[#allocation20_spill] sm:$0xff]  ;;  %v4500_v4 = vld [vmem:[#allocation95_spill] sm:$0xff] }
 0x1a0   :  { %v1389_v11 = vmax.f32 %v717_v9, %v1277_v2  ;;  %v984_v14 = vpop.permute.xlu1 %983  ;;  %v722_v0 = vmax.f32 %v1724_v51, %v4497_v34  ;;  %v1725_v2 = vld [vmem:[%s4283_s0 + $0x280] sm:$0xff] }
 0x1a1   :  { %v982_v15 = vpop.permute.xlu0 %981  ;;  %1504 = vst.msk [vmem:[%s4284_s1 + $0x128] sm:$0x3f] %vm1467_vm0, %v1390_v45  ;;  %v1280_v47 = vmax.f32 %v4495_v46, %v984_v14  ;;  %v4498_v45 = vld [vmem:[#allocation21_spill] sm:$0xff]  ;;  %v4499_v14 = vld [vmem:[#allocation94_spill] sm:$0xff] }
 0x1a2   :  { %1503 = vst.msk [vmem:[%s4284_s1 + $0x120] sm:$0xff] %vm1465_vm1, %v1389_v11  ;;  %v1279_v42 = vmax.f32 %v4496_v59, %v982_v15  ;;  %1099 = vrot.lane.b32.xlu1 %v3500_v43, %s1796_s10  ;;  %v721_v11 = vmax.f32 %v1725_v2, %v4498_v45  ;;  %v1726_v59 = vld [vmem:[%s4283_s0 + $0x2a8] sm:$0x3f]  ;;  %v4503_v51 = vld [vmem:[#allocation98_spill] sm:$0xff] }
 0x1a3   :  { %1097 = vrot.lane.b32.xlu0 %v3505_v26, %s1796_s10  ;;  %v1392_v19 = vmax.f32 %v720_v33, %v1280_v47 }
 0x1a4   :  { %v1391_v27 = vmax.f32 %v719_v5, %v1279_v42  ;;  %v988_v41 = vpop.permute.xlu1 %987  ;;  %v3569_v5 = vld [vmem:[%s4283_s0 + $0x650] sm:$0xff]  ;;  %v4501_v42 = vld [vmem:[#allocation22_spill] sm:$0xff] }
 0x1a5   :  { %v986_v9 = vpop.permute.xlu0 %985  ;;  %1506 = vst.msk [vmem:[%s4284_s1 + $0x138] sm:$0x3f] %vm1467_vm0, %v1392_v19  ;;  %v1282_v15 = vmax.f32 %v4499_v14, %v988_v41  ;;  %v724_v19 = vmax.f32 %v1726_v59, %v4501_v42  ;;  %v4502_v41 = vld [vmem:[#allocation23_spill] sm:$0xff]  ;;  %v3596_v14 = vld [vmem:[%s4283_s0 + $0x678] sm:$0x3f] }
 0x1a6   :  { %1505 = vst.msk [vmem:[%s4284_s1 + $0x130] sm:$0xff] %vm1465_vm1, %v1391_v27  ;;  %v1281_v32 = vmax.f32 %v4500_v4, %v986_v9  ;;  %1103 = vrot.lane.b32.xlu1 %v3532_v52, %s1796_s10  ;;  %v1727_v27 = vld [vmem:[%s4283_s0 + $0x2a0] sm:$0xff]  ;;  %v4506_v59 = vld [vmem:[#allocation25_spill] sm:$0xff] }
 0x1a7   :  { %1101 = vrot.lane.b32.xlu0 %v3537_v53, %s1796_s10  ;;  %v1394_v33 = vmax.f32 %v722_v0, %v1282_v15  ;;  %v723_v9 = vmax.f32 %v1727_v27, %v4502_v41  ;;  %v4504_v0 = vld [vmem:[#allocation99_spill] sm:$0xff]  ;;  %v3601_v15 = vld [vmem:[%s4283_s0 + $0x670] sm:$0xff] }
 0x1a8   :  { %v1393_v48 = vmax.f32 %v721_v11, %v1281_v32  ;;  %v992_v46 = vpop.permute.xlu1 %991  ;;  %v4508_v41 = vld [vmem:[#allocation103_spill] sm:$0xff] }
 0x1a9   :  { %v990_v47 = vpop.permute.xlu0 %989  ;;  %1508 = vst.msk [vmem:[%s4284_s1 + $0x148] sm:$0x3f] %vm1467_vm0, %v1394_v33  ;;  %v1284_v34 = vmax.f32 %v4503_v51, %v992_v46  ;;  %v1728_v33 = vld [vmem:[%s4283_s0 + $0x2c8] sm:$0x3f] }
 0x1aa   :  { %1507 = vst.msk [vmem:[%s4284_s1 + $0x140] sm:$0xff] %vm1465_vm1, %v1393_v48  ;;  %v1283_v2 = vmax.f32 %v4504_v0, %v990_v47  ;;  %1107 = vrot.lane.b32.xlu1 %v3564_v49, %s1796_s10  ;;  %v4505_v48 = vld [vmem:[#allocation24_spill] sm:$0xff]  ;;  %v1729_v47 = vld [vmem:[%s4283_s0 + $0x2c0] sm:$0xff]  ;;  %v3628_v0 = vld [vmem:[%s4283_s0 + $0x698] sm:$0x3f] }
 0x1ab   :  { %1105 = vrot.lane.b32.xlu0 %v3569_v5, %s1796_s10  ;;  %v1396_v45 = vmax.f32 %v724_v19, %v1284_v34  ;;  %v726_v46 = vmax.f32 %v1728_v33, %v4505_v48  ;;  %v725_v42 = vmax.f32 %v1729_v47, %v4506_v59  ;;  %v4507_v19 = vld [vmem:[#allocation102_spill] sm:$0xff]  ;;  %4509 = vst [vmem:[#allocation54_spill] sm:$0xff] %v3628_v0 }
 0x1ac   :  { %v1395_v11 = vmax.f32 %v723_v9, %v1283_v2  ;;  %v996_v4 = vpop.permute.xlu1 %995  ;;  %v3633_v2 = vld [vmem:[%s4283_s0 + $0x690] sm:$0xff]  ;;  %v1731_v48 = vld [vmem:[%s4283_s0 + $0x2e0] sm:$0xff] }
 0x1ad   :  { %v994_v32 = vpop.permute.xlu0 %993  ;;  %1510 = vst.msk [vmem:[%s4284_s1 + $0x158] sm:$0x3f] %vm1467_vm0, %v1396_v45  ;;  %v1286_v27 = vmax.f32 %v4507_v19, %v996_v4  ;;  %4510 = vst [vmem:[#allocation55_spill] sm:$0xff] %v3633_v2  ;;  %v1730_v4 = vld [vmem:[%s4283_s0 + $0x2e8] sm:$0x3f]  ;;  %v4513_v59 = vld [vmem:[#allocation106_spill] sm:$0xff] }
 0x1ae   :  { %1509 = vst.msk [vmem:[%s4284_s1 + $0x150] sm:$0xff] %vm1465_vm1, %v1395_v11  ;;  %v1285_v9 = vmax.f32 %v4508_v41, %v994_v32  ;;  %1111 = vrot.lane.b32.xlu1 %v3596_v14, %s1796_s10  ;;  %v4511_v32 = vld [vmem:[#allocation26_spill] sm:$0xff]  ;;  %v4514_v19 = vld [vmem:[#allocation107_spill] sm:$0xff] }
 0x1af   :  { %1109 = vrot.lane.b32.xlu0 %v3601_v15, %s1796_s10  ;;  %v1398_v51 = vmax.f32 %v726_v46, %v1286_v27  ;;  %v728_v33 = vmax.f32 %v1730_v4, %v4511_v32  ;;  %v4512_v46 = vld [vmem:[#allocation27_spill] sm:$0xff]  ;;  %v4517_v32 = vld [vmem:[#allocation28_spill] sm:$0xff] }
 0x1b0   :  { %v1397_v34 = vmax.f32 %v725_v42, %v1285_v9  ;;  %v1000_v45 = vpop.permute.xlu1 %999  ;;  %v727_v47 = vmax.f32 %v1731_v48, %v4512_v46  ;;  %v1732_v4 = vld [vmem:[%s4283_s0 + $0x308] sm:$0x3f]  ;;  %v4518_v46 = vld [vmem:[#allocation29_spill] sm:$0xff] }
 0x1b1   :  { %v998_v11 = vpop.permute.xlu0 %997  ;;  %1512 = vst.msk [vmem:[%s4284_s1 + $0x168] sm:$0x3f] %vm1467_vm0, %v1398_v51  ;;  %v1288_v42 = vmax.f32 %v4513_v59, %v1000_v45  ;;  %v3660_v51 = vld [vmem:[%s4283_s0 + $0x6b8] sm:$0x3f]  ;;  %v730_v48 = vmax.f32 %v1732_v4, %v4517_v32  ;;  %v4519_v59 = vld [vmem:[#allocation110_spill] sm:$0xff] }
 0x1b2   :  { %1511 = vst.msk [vmem:[%s4284_s1 + $0x160] sm:$0xff] %vm1465_vm1, %v1397_v34  ;;  %v1287_v27 = vmax.f32 %v4514_v19, %v998_v11  ;;  %1115 = vrot.lane.b32.xlu1 %v3628_v0, %s1796_s10  ;;  %4515 = vst [vmem:[#allocation2_spill] sm:$0xff] %v3660_v51  ;;  %v3665_v34 = vld [vmem:[%s4283_s0 + $0x6b0] sm:$0xff]  ;;  %v4520_v19 = vld [vmem:[#allocation111_spill] sm:$0xff] }
 0x1b3   :  { %1113 = vrot.lane.b32.xlu0 %v3633_v2, %s1796_s10  ;;  %v1400_v41 = vmax.f32 %v728_v33, %v1288_v42  ;;  %4516 = vst [vmem:[#allocation3_spill] sm:$0xff] %v3665_v34  ;;  %v1733_v33 = vld [vmem:[%s4283_s0 + $0x300] sm:$0xff]  ;;  %v4538_v0 = vld [vmem:[#allocation37_spill] sm:$0xff] }
 0x1b4   :  { %v1399_v9 = vmax.f32 %v727_v47, %v1287_v27  ;;  %v1004_v45 = vpop.permute.xlu1 %1003  ;;  %v729_v47 = vmax.f32 %v1733_v33, %v4518_v46  ;;  %v1734_v33 = vld [vmem:[%s4283_s0 + $0x328] sm:$0x3f]  ;;  %v4523_v46 = vld [vmem:[#allocation30_spill] sm:$0xff] }
 0x1b5   :  { %v1002_v11 = vpop.permute.xlu0 %1001  ;;  %1514 = vst.msk [vmem:[%s4284_s1 + $0x178] sm:$0x3f] %vm1467_vm0, %v1400_v41  ;;  %v1290_v42 = vmax.f32 %v4519_v59, %v1004_v45  ;;  %v3692_v41 = vld [vmem:[%s4283_s0 + $0x6d8] sm:$0x3f]  ;;  %v732_v59 = vmax.f32 %v1734_v33, %v4523_v46  ;;  %v4533_v2 = vld [vmem:[#allocation34_spill] sm:$0xff] }
 0x1b6   :  { %1513 = vst.msk [vmem:[%s4284_s1 + $0x170] sm:$0xff] %vm1465_vm1, %v1399_v9  ;;  %v1289_v27 = vmax.f32 %v4520_v19, %v1002_v11  ;;  %1119 = vrot.lane.b32.xlu1 %v3660_v51, %s1796_s10  ;;  %4521 = vst [vmem:[#allocation58_spill] sm:$0xff] %v3692_v41  ;;  %v3697_v9 = vld [vmem:[%s4283_s0 + $0x6d0] sm:$0xff]  ;;  %v4525_v19 = vld [vmem:[#allocation114_spill] sm:$0xff] }
 0x1b7   :  { %1117 = vrot.lane.b32.xlu0 %v3665_v34, %s1796_s10  ;;  %v1402_v4 = vmax.f32 %v730_v48, %v1290_v42  ;;  %4522 = vst [vmem:[#allocation59_spill] sm:$0xff] %v3697_v9  ;;  %v1735_v48 = vld [vmem:[%s4283_s0 + $0x320] sm:$0xff]  ;;  %v4526_v34 = vld [vmem:[#allocation115_spill] sm:$0xff] }
 0x1b8   :  { %v1401_v32 = vmax.f32 %v729_v47, %v1289_v27  ;;  %v1008_v45 = vpop.permute.xlu1 %1007  ;;  %v4524_v47 = vld [vmem:[#allocation31_spill] sm:$0xff] }
 0x1b9   :  { %v1006_v11 = vpop.permute.xlu0 %1005  ;;  %v731_v42 = vmax.f32 %v1735_v48, %v4524_v47  ;;  %1516 = vst.msk [vmem:[%s4284_s1 + $0x188] sm:$0x3f] %vm1467_vm0, %v1402_v4  ;;  %v1292_v27 = vmax.f32 %v4525_v19, %v1008_v45  ;;  %v3724_v4 = vld [vmem:[%s4283_s0 + $0x6f8] sm:$0x3f]  ;;  %v4529_v47 = vld [vmem:[#allocation32_spill] sm:$0xff] }
 0x1ba   :  { %1515 = vst.msk [vmem:[%s4284_s1 + $0x180] sm:$0xff] %vm1465_vm1, %v1401_v32  ;;  %v1291_v33 = vmax.f32 %v4526_v34, %v1006_v11  ;;  %1123 = vrot.lane.b32.xlu1 %v3692_v41, %s1796_s10  ;;  %4527 = vst [vmem:[#allocation4_spill] sm:$0xff] %v3724_v4  ;;  %v3729_v32 = vld [vmem:[%s4283_s0 + $0x6f0] sm:$0xff]  ;;  %v1736_v11 = vld [vmem:[%s4283_s0 + $0x348] sm:$0x3f] }
 0x1bb   :  { %1121 = vrot.lane.b32.xlu0 %v3697_v9, %s1796_s10  ;;  %v1404_v46 = vmax.f32 %v732_v59, %v1292_v27  ;;  %4528 = vst [vmem:[#allocation5_spill] sm:$0xff] %v3729_v32  ;;  %v734_v19 = vmax.f32 %v1736_v11, %v4529_v47  ;;  %v1737_v59 = vld [vmem:[%s4283_s0 + $0x340] sm:$0xff]  ;;  %v4532_v41 = vld [vmem:[#allocation119_spill] sm:$0xff] }
 0x1bc   :  { %v1403_v48 = vmax.f32 %v731_v42, %v1291_v33  ;;  %v1012_v45 = vpop.permute.xlu1 %1011  ;;  %v4530_v42 = vld [vmem:[#allocation33_spill] sm:$0xff]  ;;  %v4531_v33 = vld [vmem:[#allocation118_spill] sm:$0xff] }
 0x1bd   :  { %v1010_v34 = vpop.permute.xlu0 %1009  ;;  %v733_v27 = vmax.f32 %v1737_v59, %v4530_v42  ;;  %1518 = vst.msk [vmem:[%s4284_s1 + $0x198] sm:$0x3f] %vm1467_vm0, %v1404_v46  ;;  %v1294_v9 = vmax.f32 %v4531_v33, %v1012_v45  ;;  %v1738_v46 = vld [vmem:[%s4283_s0 + $0x368] sm:$0x3f] }
 0x1be   :  { %1517 = vst.msk [vmem:[%s4284_s1 + $0x190] sm:$0xff] %vm1465_vm1, %v1403_v48  ;;  %v1293_v11 = vmax.f32 %v4532_v41, %v1010_v34  ;;  %1127 = vrot.lane.b32.xlu1 %v3724_v4, %s1796_s10  ;;  %v736_v48 = vmax.f32 %v1738_v46, %v4533_v2  ;;  %v1739_v41 = vld [vmem:[%s4283_s0 + $0x360] sm:$0xff]  ;;  %v4534_v45 = vld [vmem:[#allocation35_spill] sm:$0xff] }
 0x1bf   :  { %1125 = vrot.lane.b32.xlu0 %v3729_v32, %s1796_s10  ;;  %v1406_v47 = vmax.f32 %v734_v19, %v1294_v9  ;;  %v735_v34 = vmax.f32 %v1739_v41, %v4534_v45  ;;  %v4535_v9 = vld [vmem:[#allocation122_spill] sm:$0xff]  ;;  %v1740_v41 = vld [vmem:[%s4283_s0 + $0x388] sm:$0x3f]  ;;  %v4537_v45 = vld [vmem:[#allocation36_spill] sm:$0xff] }
 0x1c0   :  { %v1405_v59 = vmax.f32 %v733_v27, %v1293_v11  ;;  %v1016_v42 = vpop.permute.xlu1 %1015  ;;  %v4536_v27 = vld [vmem:[#allocation123_spill] sm:$0xff]  ;;  %v738_v4 = vmax.f32 %v1740_v41, %v4537_v45  ;;  %v4541_v41 = vld [vmem:[#allocation38_spill] sm:$0xff] }
 0x1c1   :  { %v1014_v51 = vpop.permute.xlu0 %1013  ;;  %1520 = vst.msk [vmem:[%s4284_s1 + $0x1a8] sm:$0x3f] %vm1467_vm0, %v1406_v47  ;;  %v1296_v19 = vmax.f32 %v4535_v9, %v1016_v42  ;;  %v1741_v47 = vld [vmem:[%s4283_s0 + $0x380] sm:$0xff] }
 0x1c2   :  { %1519 = vst.msk [vmem:[%s4284_s1 + $0x1a0] sm:$0xff] %vm1465_vm1, %v1405_v59  ;;  %v1295_v2 = vmax.f32 %v4536_v27, %v1014_v51  ;;  %v737_v59 = vmax.f32 %v1741_v47, %v4538_v0  ;;  %v4539_v51 = vld [vmem:[#allocation126_spill] sm:$0xff]  ;;  %v1742_v0 = vld [vmem:[%s4283_s0 + $0x3a8] sm:$0x3f] }
 0x1c3   :  { %v1408_v33 = vmax.f32 %v736_v48, %v1296_v19  ;;  %v4540_v48 = vld [vmem:[#allocation127_spill] sm:$0xff]  ;;  %v740_v45 = vmax.f32 %v1742_v0, %v4541_v41  ;;  %v4544_v41 = vld [vmem:[#allocation41_spill] sm:$0xff] }
 0x1c4   :  { %v1407_v11 = vmax.f32 %v735_v34, %v1295_v2  ;;  %v1020_v46 = vpop.permute.xlu1 %1019  ;;  %v4542_v47 = vld [vmem:[#allocation39_spill] sm:$0xff] }
 0x1c5   :  { %v1018_v32 = vpop.permute.xlu0 %1017  ;;  %1522 = vst.msk [vmem:[%s4284_s1 + $0x1b8] sm:$0x3f] %vm1467_vm0, %v1408_v33  ;;  %v1298_v42 = vmax.f32 %v4539_v51, %v1020_v46  ;;  %v1743_v33 = vld [vmem:[%s4283_s0 + $0x3a0] sm:$0xff] }
 0x1c6   :  { %1521 = vst.msk [vmem:[%s4284_s1 + $0x1b0] sm:$0xff] %vm1465_vm1, %v1407_v11  ;;  %v1297_v34 = vmax.f32 %v4540_v48, %v1018_v32  ;;  %v739_v11 = vmax.f32 %v1743_v33, %v4542_v47  ;;  %v1744_v48 = vld [vmem:[%s4283_s0 + $0x3c8] sm:$0x3f] }
 0x1c7   :  { %v1410_v9 = vmax.f32 %v738_v4, %v1298_v42  ;;  %v1746_v47 = vld [vmem:[%s4283_s0 + $0x3e8] sm:$0x3f] }
 0x1c8   :  { %v1409_v19 = vmax.f32 %v737_v59, %v1297_v34  ;;  %v1024_v27 = vpop.permute.xlu1 %1023  ;;  %v4543_v34 = vld [vmem:[#allocation40_spill] sm:$0xff] }
 0x1c9   :  { %v1022_v2 = vpop.permute.xlu0 %1021  ;;  %1524 = vst.msk [vmem:[%s4284_s1 + $0x1c8] sm:$0x3f] %vm1467_vm0, %v1410_v9  ;;  %v1300_v4 = vmax.f32 %v2924_v57, %v1024_v27  ;;  %v742_v0 = vmax.f32 %v1744_v48, %v4543_v34  ;;  %v1745_v9 = vld [vmem:[%s4283_s0 + $0x3c0] sm:$0xff] }
 0x1ca   :  { %1523 = vst.msk [vmem:[%s4284_s1 + $0x1c0] sm:$0xff] %vm1465_vm1, %v1409_v19  ;;  %v1299_v32 = vmax.f32 %v2929_v62, %v1022_v2  ;;  %v741_v19 = vmax.f32 %v1745_v9, %v4544_v41  ;;  %v4547_v9 = vld [vmem:[#allocation44_spill] sm:$0xff] }
 0x1cb   :  { %v1412_v46 = vmax.f32 %v740_v45, %v1300_v4 }
 0x1cc   :  { %v1411_v59 = vmax.f32 %v739_v11, %v1299_v32  ;;  %v1028_v51 = vpop.permute.xlu1 %1027  ;;  %v4545_v11 = vld [vmem:[#allocation42_spill] sm:$0xff] }
 0x1cd   :  { %v1026_v42 = vpop.permute.xlu0 %1025  ;;  %1526 = vst.msk [vmem:[%s4284_s1 + $0x1d8] sm:$0x3f] %vm1467_vm0, %v1412_v46  ;;  %v1302_v57 = vmax.f32 %v2944_v1, %v1028_v51  ;;  %v744_v4 = vmax.f32 %v1746_v47, %v4545_v11  ;;  %v1747_v32 = vld [vmem:[%s4283_s0 + $0x3e0] sm:$0xff]  ;;  %v4546_v46 = vld [vmem:[#allocation43_spill] sm:$0xff] }
 0x1ce   :  { %1525 = vst.msk [vmem:[%s4284_s1 + $0x1d0] sm:$0xff] %vm1465_vm1, %v1411_v59  ;;  %v1301_v62 = vmax.f32 %v2949_v3, %v1026_v42  ;;  %v743_v59 = vmax.f32 %v1747_v32, %v4546_v46  ;;  %v1750_v47 = vld [vmem:[%s4283_s0 + $0x428] sm:$0x3f]  ;;  %v4549_v11 = vld [vmem:[#allocation46_spill] sm:$0xff] }
 0x1cf   :  { %v1414_v27 = vmax.f32 %v742_v0, %v1302_v57  ;;  %v1748_v0 = vld [vmem:[%s4283_s0 + $0x408] sm:$0x3f]  ;;  %v4548_v57 = vld [vmem:[#allocation45_spill] sm:$0xff]  ;;  %v1751_v32 = vld [vmem:[%s4283_s0 + $0x420] sm:$0xff] }
 0x1d0   :  { %v1413_v2 = vmax.f32 %v741_v19, %v1301_v62  ;;  %v1032_v45 = vpop.permute.xlu1 %1031  ;;  %v746_v41 = vmax.f32 %v1748_v0, %v4547_v9  ;;  %v1749_v19 = vld [vmem:[%s4283_s0 + $0x400] sm:$0xff]  ;;  %v4550_v46 = vld [vmem:[#allocation47_spill] sm:$0xff] }
 0x1d1   :  { %v1030_v33 = vpop.permute.xlu0 %1029  ;;  %1528 = vst.msk [vmem:[%s4284_s1 + $0x1e8] sm:$0x3f] %vm1467_vm0, %v1414_v27  ;;  %v1304_v1 = vmax.f32 %v2972_v60, %v1032_v45  ;;  %v745_v62 = vmax.f32 %v1749_v19, %v4548_v57  ;;  %v1753_v9 = vld [vmem:[%s4283_s0 + $0x440] sm:$0xff] }
 0x1d2   :  { %1527 = vst.msk [vmem:[%s4284_s1 + $0x1e0] sm:$0xff] %vm1465_vm1, %v1413_v2  ;;  %v1303_v3 = vmax.f32 %v2977_v12, %v1030_v33 }
 0x1d3   :  { %v1416_v51 = vmax.f32 %v744_v4, %v1304_v1  ;;  %v748_v4 = vmax.f32 %v1750_v47, %v4549_v11  ;;  %v4554_v47 = vld [vmem:[#allocation51_spill] sm:$0xff] }
 0x1d4   :  { %v1415_v42 = vmax.f32 %v743_v59, %v1303_v3  ;;  %v1036_v48 = vpop.permute.xlu1 %1035  ;;  %v747_v59 = vmax.f32 %v1751_v32, %v4550_v46 }
 0x1d5   :  { %v1034_v34 = vpop.permute.xlu0 %1033  ;;  %1530 = vst.msk [vmem:[%s4284_s1 + $0x1f8] sm:$0x3f] %vm1467_vm0, %v1416_v51  ;;  %v1306_v60 = vmax.f32 %v3000_v16, %v1036_v48  ;;  %v1752_v48 = vld [vmem:[%s4283_s0 + $0x448] sm:$0x3f] }
 0x1d6   :  { %1529 = vst.msk [vmem:[%s4284_s1 + $0x1f0] sm:$0xff] %vm1465_vm1, %v1415_v42  ;;  %v1305_v12 = vmax.f32 %v3005_v17, %v1034_v34  ;;  %v4551_v34 = vld [vmem:[#allocation48_spill] sm:$0xff] }
 0x1d7   :  { %v1418_v27 = vmax.f32 %v746_v41, %v1306_v60  ;;  %v750_v0 = vmax.f32 %v1752_v48, %v4551_v34  ;;  %v4552_v41 = vld [vmem:[#allocation49_spill] sm:$0xff] }
 0x1d8   :  { %v1417_v2 = vmax.f32 %v745_v62, %v1305_v12  ;;  %v1040_v45 = vpop.permute.xlu1 %1039  ;;  %v749_v19 = vmax.f32 %v1753_v9, %v4552_v41  ;;  %v1758_v41 = vld [vmem:[%s4283_s0 + $0x4a8] sm:$0x3f] }
 0x1d9   :  { %v1038_v33 = vpop.permute.xlu0 %1037  ;;  %1532 = vst.msk [vmem:[%s4284_s1 + $0x208] sm:$0x3f] %vm1467_vm0, %v1418_v27  ;;  %v1308_v16 = vmax.f32 %v3028_v20, %v1040_v45  ;;  %v1754_v27 = vld [vmem:[%s4283_s0 + $0x468] sm:$0x3f] }
 0x1da   :  { %1531 = vst.msk [vmem:[%s4284_s1 + $0x200] sm:$0xff] %vm1465_vm1, %v1417_v2  ;;  %v1307_v17 = vmax.f32 %v3033_v21, %v1038_v33  ;;  %v4553_v2 = vld [vmem:[#allocation50_spill] sm:$0xff] }
 0x1db   :  { %v1420_v1 = vmax.f32 %v748_v4, %v1308_v16  ;;  %v752_v45 = vmax.f32 %v1754_v27, %v4553_v2  ;;  %v1755_v33 = vld [vmem:[%s4283_s0 + $0x460] sm:$0xff]  ;;  %v1756_v16 = vld [vmem:[%s4283_s0 + $0x488] sm:$0x3f] }
 0x1dc   :  { %v1419_v3 = vmax.f32 %v747_v59, %v1307_v17  ;;  %v1044_v51 = vpop.permute.xlu1 %1043  ;;  %v751_v11 = vmax.f32 %v1755_v33, %v4554_v47  ;;  %v4555_v17 = vld [vmem:[#allocation52_spill] sm:$0xff] }
 0x1dd   :  { %v1042_v42 = vpop.permute.xlu0 %1041  ;;  %1534 = vst.msk [vmem:[%s4284_s1 + $0x218] sm:$0x3f] %vm1467_vm0, %v1420_v1  ;;  %v1310_v20 = vmax.f32 %v3056_v24, %v1044_v51  ;;  %v754_v1 = vmax.f32 %v1756_v16, %v4555_v17  ;;  %v4556_v51 = vld [vmem:[#allocation53_spill] sm:$0xff]  ;;  %v4559_v33 = vld [vmem:[#allocation60_spill] sm:$0xff]  ;;  %v1762_v16 = vld [vmem:[%s4283_s0 + $0x4e8] sm:$0x3f] }
 0x1de   :  { %1533 = vst.msk [vmem:[%s4284_s1 + $0x210] sm:$0xff] %vm1465_vm1, %v1419_v3  ;;  %v1309_v21 = vmax.f32 %v3061_v25, %v1042_v42  ;;  %v1757_v3 = vld [vmem:[%s4283_s0 + $0x480] sm:$0xff]  ;;  %v4561_v17 = vld [vmem:[#allocation64_spill] sm:$0xff] }
 0x1df   :  { %v1422_v57 = vmax.f32 %v750_v0, %v1310_v20  ;;  %v753_v42 = vmax.f32 %v1757_v3, %v4556_v51  ;;  %v1763_v3 = vld [vmem:[%s4283_s0 + $0x4e0] sm:$0xff]  ;;  %v4562_v51 = vld [vmem:[#allocation65_spill] sm:$0xff] }
 0x1e0   :  { %v1421_v62 = vmax.f32 %v749_v19, %v1309_v21  ;;  %v1048_v60 = vpop.permute.xlu1 %1047  ;;  %v4557_v19 = vld [vmem:[#allocation56_spill] sm:$0xff]  ;;  %v1759_v21 = vld [vmem:[%s4283_s0 + $0x4a0] sm:$0xff] }
 0x1e1   :  { %v1046_v12 = vpop.permute.xlu0 %1045  ;;  %1536 = vst.msk [vmem:[%s4284_s1 + $0x228] sm:$0x3f] %vm1467_vm0, %v1422_v57  ;;  %v1312_v24 = vmax.f32 %v3084_v28, %v1048_v60  ;;  %v756_v20 = vmax.f32 %v1758_v41, %v4557_v19  ;;  %v4558_v57 = vld [vmem:[#allocation57_spill] sm:$0xff]  ;;  %v1765_v19 = vld [vmem:[%s4283_s0 + $0x500] sm:$0xff] }
 0x1e2   :  { %1535 = vst.msk [vmem:[%s4284_s1 + $0x220] sm:$0xff] %vm1465_vm1, %v1421_v62  ;;  %v1311_v25 = vmax.f32 %v3089_v29, %v1046_v12  ;;  %v755_v62 = vmax.f32 %v1759_v21, %v4558_v57 }
 0x1e3   :  { %v1424_v4 = vmax.f32 %v752_v45, %v1312_v24  ;;  %v1760_v45 = vld [vmem:[%s4283_s0 + $0x4c8] sm:$0x3f]  ;;  %v4560_v24 = vld [vmem:[#allocation61_spill] sm:$0xff] }
 0x1e4   :  { %v1423_v32 = vmax.f32 %v751_v11, %v1311_v25  ;;  %v1052_v46 = vpop.permute.xlu1 %1051  ;;  %v758_v47 = vmax.f32 %v1760_v45, %v4559_v33  ;;  %v1761_v11 = vld [vmem:[%s4283_s0 + $0x4c0] sm:$0xff]  ;;  %v4566_v45 = vld [vmem:[#allocation73_spill] sm:$0xff] }
 0x1e5   :  { %v1050_v59 = vpop.permute.xlu0 %1049  ;;  %1538 = vst.msk [vmem:[%s4284_s1 + $0x238] sm:$0x3f] %vm1467_vm0, %v1424_v4  ;;  %v1314_v28 = vmax.f32 %v3116_v31, %v1052_v46  ;;  %v757_v25 = vmax.f32 %v1761_v11, %v4560_v24 }
 0x1e6   :  { %1537 = vst.msk [vmem:[%s4284_s1 + $0x230] sm:$0xff] %vm1465_vm1, %v1423_v32  ;;  %v1313_v29 = vmax.f32 %v3121_v54, %v1050_v59 }
 0x1e7   :  { %v1426_v48 = vmax.f32 %v754_v1, %v1314_v28  ;;  %v760_v1 = vmax.f32 %v1762_v16, %v4561_v17 }
 0x1e8   :  { %v1425_v34 = vmax.f32 %v753_v42, %v1313_v29  ;;  %v1056_v0 = vpop.permute.xlu1 %1055  ;;  %v759_v42 = vmax.f32 %v1763_v3, %v4562_v51  ;;  %v1770_v51 = vld [vmem:[%s4283_s0 + $0x568] sm:$0x3f] }
 0x1e9   :  { %v1054_v9 = vpop.permute.xlu0 %1053  ;;  %1540 = vst.msk [vmem:[%s4284_s1 + $0x248] sm:$0x3f] %vm1467_vm0, %v1426_v48  ;;  %v1316_v31 = vmax.f32 %v3148_v30, %v1056_v0  ;;  %v1764_v0 = vld [vmem:[%s4283_s0 + $0x508] sm:$0x3f] }
 0x1ea   :  { %1539 = vst.msk [vmem:[%s4284_s1 + $0x240] sm:$0xff] %vm1465_vm1, %v1425_v34  ;;  %v1315_v54 = vmax.f32 %v3153_v38, %v1054_v9  ;;  %v4563_v9 = vld [vmem:[#allocation68_spill] sm:$0xff] }
 0x1eb   :  { %v1428_v60 = vmax.f32 %v756_v20, %v1316_v31  ;;  %v762_v41 = vmax.f32 %v1764_v0, %v4563_v9  ;;  %v4564_v20 = vld [vmem:[#allocation69_spill] sm:$0xff] }
 0x1ec   :  { %v1427_v12 = vmax.f32 %v755_v62, %v1315_v54  ;;  %v1060_v27 = vpop.permute.xlu1 %1059  ;;  %v761_v21 = vmax.f32 %v1765_v19, %v4564_v20  ;;  %v4571_v19 = vld [vmem:[#allocation84_spill] sm:$0xff] }
 0x1ed   :  { %v1058_v2 = vpop.permute.xlu0 %1057  ;;  %1542 = vst.msk [vmem:[%s4284_s1 + $0x258] sm:$0x3f] %vm1467_vm0, %v1428_v60  ;;  %v1318_v30 = vmax.f32 %v3180_v55, %v1060_v27  ;;  %v1766_v60 = vld [vmem:[%s4283_s0 + $0x528] sm:$0x3f] }
 0x1ee   :  { %1541 = vst.msk [vmem:[%s4284_s1 + $0x250] sm:$0xff] %vm1465_vm1, %v1427_v12  ;;  %v1317_v38 = vmax.f32 %v3185_v22, %v1058_v2  ;;  %v4565_v12 = vld [vmem:[#allocation72_spill] sm:$0xff]  ;;  %v1767_v2 = vld [vmem:[%s4283_s0 + $0x520] sm:$0xff] }
 0x1ef   :  { %v1430_v4 = vmax.f32 %v758_v47, %v1318_v30  ;;  %v764_v27 = vmax.f32 %v1766_v60, %v4565_v12  ;;  %v763_v33 = vmax.f32 %v1767_v2, %v4566_v45  ;;  %v1768_v30 = vld [vmem:[%s4283_s0 + $0x548] sm:$0x3f]  ;;  %v4573_v12 = vld [vmem:[#allocation88_spill] sm:$0xff]  ;;  %v1775_v2 = vld [vmem:[%s4283_s0 + $0x5a0] sm:$0xff] }
 0x1f0   :  { %v1429_v32 = vmax.f32 %v757_v25, %v1317_v38  ;;  %v1064_v46 = vpop.permute.xlu1 %1063  ;;  %v4567_v38 = vld [vmem:[#allocation76_spill] sm:$0xff]  ;;  %v1774_v60 = vld [vmem:[%s4283_s0 + $0x5a8] sm:$0x3f]  ;;  %v4574_v45 = vld [vmem:[#allocation89_spill] sm:$0xff] }
 0x1f1   :  { %v1062_v59 = vpop.permute.xlu0 %1061  ;;  %1544 = vst.msk [vmem:[%s4284_s1 + $0x268] sm:$0x3f] %vm1467_vm0, %v1430_v4  ;;  %v1320_v55 = vmax.f32 %v3212_v39, %v1064_v46  ;;  %v766_v4 = vmax.f32 %v1768_v30, %v4567_v38  ;;  %v4568_v46 = vld [vmem:[#allocation77_spill] sm:$0xff]  ;;  %v1777_v38 = vld [vmem:[%s4283_s0 + $0x5c0] sm:$0xff] }
 0x1f2   :  { %1543 = vst.msk [vmem:[%s4284_s1 + $0x260] sm:$0xff] %vm1465_vm1, %v1429_v32  ;;  %v1319_v22 = vmax.f32 %v3217_v58, %v1062_v59  ;;  %v1769_v32 = vld [vmem:[%s4283_s0 + $0x540] sm:$0xff] }
 0x1f3   :  { %v1432_v28 = vmax.f32 %v760_v1, %v1320_v55  ;;  %v765_v59 = vmax.f32 %v1769_v32, %v4568_v46 }
 0x1f4   :  { %v1431_v29 = vmax.f32 %v759_v42, %v1319_v22  ;;  %v1068_v48 = vpop.permute.xlu1 %1067  ;;  %v4569_v42 = vld [vmem:[#allocation80_spill] sm:$0xff]  ;;  %v1771_v22 = vld [vmem:[%s4283_s0 + $0x560] sm:$0xff] }
 0x1f5   :  { %v1066_v34 = vpop.permute.xlu0 %1065  ;;  %1546 = vst.msk [vmem:[%s4284_s1 + $0x278] sm:$0x3f] %vm1467_vm0, %v1432_v28  ;;  %v1322_v39 = vmax.f32 %v3244_v23, %v1068_v48  ;;  %v768_v55 = vmax.f32 %v1770_v51, %v4569_v42  ;;  %v4570_v28 = vld [vmem:[#allocation81_spill] sm:$0xff] }
 0x1f6   :  { %1545 = vst.msk [vmem:[%s4284_s1 + $0x270] sm:$0xff] %vm1465_vm1, %v1431_v29  ;;  %v1321_v58 = vmax.f32 %v3249_v50, %v1066_v34  ;;  %v767_v29 = vmax.f32 %v1771_v22, %v4570_v28  ;;  %v4578_v51 = vld [vmem:[#allocation97_spill] sm:$0xff] }
 0x1f7   :  { %v1434_v57 = vmax.f32 %v762_v41, %v1322_v39  ;;  %v1772_v41 = vld [vmem:[%s4283_s0 + $0x588] sm:$0x3f]  ;;  %v4572_v39 = vld [vmem:[#allocation85_spill] sm:$0xff] }
 0x1f8   :  { %v1433_v62 = vmax.f32 %v761_v21, %v1321_v58  ;;  %v1072_v31 = vpop.permute.xlu1 %1071  ;;  %v770_v20 = vmax.f32 %v1772_v41, %v4571_v19  ;;  %v1773_v21 = vld [vmem:[%s4283_s0 + $0x580] sm:$0xff] }
 0x1f9   :  { %v1070_v54 = vpop.permute.xlu0 %1069  ;;  %1548 = vst.msk [vmem:[%s4284_s1 + $0x288] sm:$0x3f] %vm1467_vm0, %v1434_v57  ;;  %v1324_v23 = vmax.f32 %v3276_v8, %v1072_v31  ;;  %v769_v58 = vmax.f32 %v1773_v21, %v4572_v39  ;;  %v1782_v39 = vld [vmem:[%s4283_s0 + $0x628] sm:$0x3f] }
 0x1fa   :  { %1547 = vst.msk [vmem:[%s4284_s1 + $0x280] sm:$0xff] %vm1465_vm1, %v1433_v62  ;;  %v1323_v50 = vmax.f32 %v3281_v40, %v1070_v54 }
 0x1fb   :  { %v1436_v47 = vmax.f32 %v764_v27, %v1324_v23  ;;  %v772_v27 = vmax.f32 %v1774_v60, %v4573_v12 }
 0x1fc   :  { %v1435_v11 = vmax.f32 %v763_v33, %v1323_v50  ;;  %v1076_v24 = vpop.permute.xlu1 %1075  ;;  %v771_v33 = vmax.f32 %v1775_v2, %v4574_v45  ;;  %v4583_v2 = vld [vmem:[#allocation108_spill] sm:$0xff] }
 0x1fd   :  { %v1074_v25 = vpop.permute.xlu0 %1073  ;;  %1550 = vst.msk [vmem:[%s4284_s1 + $0x298] sm:$0x3f] %vm1467_vm0, %v1436_v47  ;;  %v1326_v8 = vmax.f32 %v3308_v18, %v1076_v24  ;;  %v1776_v24 = vld [vmem:[%s4283_s0 + $0x5c8] sm:$0x3f] }
 0x1fe   :  { %1549 = vst.msk [vmem:[%s4284_s1 + $0x290] sm:$0xff] %vm1465_vm1, %v1435_v11  ;;  %v1325_v40 = vmax.f32 %v3313_v35, %v1074_v25  ;;  %v4575_v25 = vld [vmem:[#allocation92_spill] sm:$0xff] }
 0x1ff   :  { %v1438_v16 = vmax.f32 %v766_v4, %v1326_v8  ;;  %v774_v30 = vmax.f32 %v1776_v24, %v4575_v25  ;;  %v4576_v4 = vld [vmem:[#allocation93_spill] sm:$0xff]  ;;  %v1786_v24 = vld [vmem:[%s4283_s0 + $0x668] sm:$0x3f]  ;;  %v4585_v25 = vld [vmem:[#allocation112_spill] sm:$0xff] }
 0x200   :  { %v1437_v17 = vmax.f32 %v765_v59, %v1325_v40  ;;  %v1080_v1 = vpop.permute.xlu1 %1079  ;;  %v773_v32 = vmax.f32 %v1777_v38, %v4576_v4  ;;  %v1787_v38 = vld [vmem:[%s4283_s0 + $0x660] sm:$0xff]  ;;  %v4586_v4 = vld [vmem:[#allocation113_spill] sm:$0xff] }
 0x201   :  { %v1078_v3 = vpop.permute.xlu0 %1077  ;;  %1552 = vst.msk [vmem:[%s4284_s1 + $0x2a8] sm:$0x3f] %vm1467_vm0, %v1438_v16  ;;  %v1328_v18 = vmax.f32 %v3340_v37, %v1080_v1  ;;  %v1778_v16 = vld [vmem:[%s4283_s0 + $0x5e8] sm:$0x3f] }
 0x202   :  { %1551 = vst.msk [vmem:[%s4284_s1 + $0x2a0] sm:$0xff] %vm1465_vm1, %v1437_v17  ;;  %v1327_v35 = vmax.f32 %v3345_v7, %v1078_v3  ;;  %v4577_v17 = vld [vmem:[#allocation96_spill] sm:$0xff]  ;;  %v1779_v3 = vld [vmem:[%s4283_s0 + $0x5e0] sm:$0xff] }
 0x203   :  { %v1440_v48 = vmax.f32 %v768_v55, %v1328_v18  ;;  %v776_v1 = vmax.f32 %v1778_v16, %v4577_v17  ;;  %v775_v42 = vmax.f32 %v1779_v3, %v4578_v51  ;;  %v1780_v18 = vld [vmem:[%s4283_s0 + $0x608] sm:$0x3f]  ;;  %v1789_v17 = vld [vmem:[%s4283_s0 + $0x680] sm:$0xff] }
 0x204   :  { %v1439_v34 = vmax.f32 %v767_v29, %v1327_v35  ;;  %v1084_v0 = vpop.permute.xlu1 %1083  ;;  %v4579_v35 = vld [vmem:[#allocation100_spill] sm:$0xff]  ;;  %v4590_v51 = vld [vmem:[#allocation55_spill] sm:$0xff] }
 0x205   :  { %v1082_v9 = vpop.permute.xlu0 %1081  ;;  %1554 = vst.msk [vmem:[%s4284_s1 + $0x2b8] sm:$0x3f] %vm1467_vm0, %v1440_v48  ;;  %v1330_v37 = vmax.f32 %v3372_v10, %v1084_v0  ;;  %v778_v48 = vmax.f32 %v1780_v18, %v4579_v35  ;;  %v4580_v0 = vld [vmem:[#allocation101_spill] sm:$0xff]  ;;  %v1791_v35 = vld [vmem:[%s4283_s0 + $0x6a0] sm:$0xff] }
 0x206   :  { %1553 = vst.msk [vmem:[%s4284_s1 + $0x2b0] sm:$0xff] %vm1465_vm1, %v1439_v34  ;;  %v1329_v7 = vmax.f32 %v3377_v44, %v1082_v9  ;;  %v1781_v34 = vld [vmem:[%s4283_s0 + $0x600] sm:$0xff] }
 0x207   :  { %v1442_v57 = vmax.f32 %v770_v20, %v1330_v37  ;;  %v777_v9 = vmax.f32 %v1781_v34, %v4580_v0  ;;  %v4593_v0 = vld [vmem:[#allocation2_spill] sm:$0xff] }
 0x208   :  { %v1441_v62 = vmax.f32 %v769_v58, %v1329_v7  ;;  %v1088_v31 = vpop.permute.xlu1 %1087  ;;  %v4581_v58 = vld [vmem:[#allocation104_spill] sm:$0xff]  ;;  %v1783_v7 = vld [vmem:[%s4283_s0 + $0x620] sm:$0xff] }
 0x209   :  { %v1086_v54 = vpop.permute.xlu0 %1085  ;;  %1556 = vst.msk [vmem:[%s4284_s1 + $0x2c8] sm:$0x3f] %vm1467_vm0, %v1442_v57  ;;  %v1332_v10 = vmax.f32 %v3404_v61, %v1088_v31  ;;  %v780_v37 = vmax.f32 %v1782_v39, %v4581_v58  ;;  %v4582_v57 = vld [vmem:[#allocation105_spill] sm:$0xff]  ;;  %v1792_v39 = vld [vmem:[%s4283_s0 + $0x6c8] sm:$0x3f]  ;;  %v4595_v58 = vld [vmem:[#allocation124_spill] sm:$0xff] }
 0x20a   :  { %1555 = vst.msk [vmem:[%s4284_s1 + $0x2c0] sm:$0xff] %vm1465_vm1, %v1441_v62  ;;  %v1331_v44 = vmax.f32 %v3409_v13, %v1086_v54  ;;  %v779_v62 = vmax.f32 %v1783_v7, %v4582_v57  ;;  %v1793_v7 = vld [vmem:[%s4283_s0 + $0x6c0] sm:$0xff]  ;;  %v4596_v57 = vld [vmem:[#allocation125_spill] sm:$0xff] }
 0x20b   :  { %v1444_v23 = vmax.f32 %v772_v27, %v1332_v10  ;;  %v1784_v27 = vld [vmem:[%s4283_s0 + $0x648] sm:$0x3f]  ;;  %v4584_v10 = vld [vmem:[#allocation109_spill] sm:$0xff] }
 0x20c   :  { %v1443_v50 = vmax.f32 %v771_v33, %v1331_v44  ;;  %v1092_v47 = vpop.permute.xlu1 %1091  ;;  %v782_v45 = vmax.f32 %v1784_v27, %v4583_v2  ;;  %v1785_v33 = vld [vmem:[%s4283_s0 + $0x640] sm:$0xff] }
 0x20d   :  { %v1090_v11 = vpop.permute.xlu0 %1089  ;;  %1558 = vst.msk [vmem:[%s4284_s1 + $0x2d8] sm:$0x3f] %vm1467_vm0, %v1444_v23  ;;  %v1334_v61 = vmax.f32 %v3436_v56, %v1092_v47  ;;  %v781_v44 = vmax.f32 %v1785_v33, %v4584_v10  ;;  %v4599_v33 = vld [vmem:[#allocation128_spill] sm:$0xff] }
 0x20e   :  { %1557 = vst.msk [vmem:[%s4284_s1 + $0x2d0] sm:$0xff] %vm1465_vm1, %v1443_v50  ;;  %v1333_v13 = vmax.f32 %v3441_v63, %v1090_v11 }
 0x20f   :  { %v1446_v46 = vmax.f32 %v774_v30, %v1334_v61  ;;  %v784_v30 = vmax.f32 %v1786_v24, %v4585_v25 }
 0x210   :  { %v1445_v59 = vmax.f32 %v773_v32, %v1333_v13  ;;  %v1096_v8 = vpop.permute.xlu1 %1095  ;;  %v783_v32 = vmax.f32 %v1787_v38, %v4586_v4 }
 0x211   :  { %v1094_v40 = vpop.permute.xlu0 %1093  ;;  %1560 = vst.msk [vmem:[%s4284_s1 + $0x2e8] sm:$0x3f] %vm1467_vm0, %v1446_v46  ;;  %v1336_v56 = vmax.f32 %v3468_v6, %v1096_v8  ;;  %v1788_v8 = vld [vmem:[%s4283_s0 + $0x688] sm:$0x3f] }
 0x212   :  { %1559 = vst.msk [vmem:[%s4284_s1 + $0x2e0] sm:$0xff] %vm1465_vm1, %v1445_v59  ;;  %v1335_v63 = vmax.f32 %v3473_v36, %v1094_v40  ;;  %v4587_v40 = vld [vmem:[#allocation116_spill] sm:$0xff] }
 0x213   :  { %v1448_v55 = vmax.f32 %v776_v1, %v1336_v56  ;;  %v786_v16 = vmax.f32 %v1788_v8, %v4587_v40  ;;  %v4588_v1 = vld [vmem:[#allocation117_spill] sm:$0xff] }
 0x214   :  { %v1447_v22 = vmax.f32 %v775_v42, %v1335_v63  ;;  %v1100_v28 = vpop.permute.xlu1 %1099  ;;  %v785_v3 = vmax.f32 %v1789_v17, %v4588_v1 }
 0x215   :  { %v1098_v29 = vpop.permute.xlu0 %1097  ;;  %1562 = vst.msk [vmem:[%s4284_s1 + $0x2f8] sm:$0x3f] %vm1467_vm0, %v1448_v55  ;;  %v1338_v6 = vmax.f32 %v3500_v43, %v1100_v28  ;;  %v1790_v28 = vld [vmem:[%s4283_s0 + $0x6a8] sm:$0x3f] }
 0x216   :  { %1561 = vst.msk [vmem:[%s4284_s1 + $0x2f0] sm:$0xff] %vm1465_vm1, %v1447_v22  ;;  %v1337_v36 = vmax.f32 %v3505_v26, %v1098_v29  ;;  %v4591_v29 = vld [vmem:[#allocation120_spill] sm:$0xff] }
 0x217   :  { %v1450_v41 = vmax.f32 %v778_v48, %v1338_v6  ;;  %v788_v18 = vmax.f32 %v1790_v28, %v4591_v29  ;;  %v4592_v48 = vld [vmem:[#allocation121_spill] sm:$0xff]  ;;  %v4594_v6 = vld [vmem:[#allocation3_spill] sm:$0xff] }
 0x218   :  { %v1449_v19 = vmax.f32 %v777_v9, %v1337_v36  ;;  %v1104_v20 = vpop.permute.xlu1 %1103  ;;  %v787_v34 = vmax.f32 %v1791_v35, %v4592_v48 }
 0x219   :  { %v1102_v21 = vpop.permute.xlu0 %1101  ;;  %1564 = vst.msk [vmem:[%s4284_s1 + $0x308] sm:$0x3f] %vm1467_vm0, %v1450_v41  ;;  %v1340_v43 = vmax.f32 %v3532_v52, %v1104_v20 }
 0x21a   :  { %1563 = vst.msk [vmem:[%s4284_s1 + $0x300] sm:$0xff] %vm1465_vm1, %v1449_v19  ;;  %v1339_v26 = vmax.f32 %v3537_v53, %v1102_v21 }
 0x21b   :  { %v1452_v31 = vmax.f32 %v780_v37, %v1340_v43  ;;  %v790_v37 = vmax.f32 %v1792_v39, %v4595_v58  ;;  %v4597_v43 = vld [vmem:[#allocation58_spill] sm:$0xff] }
 0x21c   :  { %v1451_v54 = vmax.f32 %v779_v62, %v1339_v26  ;;  %v1108_v60 = vpop.permute.xlu1 %1107  ;;  %v789_v62 = vmax.f32 %v1793_v7, %v4596_v57 }
 0x21d   :  { %v1106_v12 = vpop.permute.xlu0 %1105  ;;  %1566 = vst.msk [vmem:[%s4284_s1 + $0x318] sm:$0x3f] %vm1467_vm0, %v1452_v31  ;;  %v1342_v52 = vmax.f32 %v3564_v49, %v1108_v60  ;;  %v4598_v31 = vld [vmem:[#allocation59_spill] sm:$0xff] }
 0x21e   :  { %1565 = vst.msk [vmem:[%s4284_s1 + $0x310] sm:$0xff] %vm1465_vm1, %v1451_v54  ;;  %v1341_v53 = vmax.f32 %v3569_v5, %v1106_v12 }
 0x21f   :  { %v1454_v23 = vmax.f32 %v782_v45, %v1342_v52  ;;  %v1794_v45 = vld [vmem:[%s4283_s0 + $0x6e8] sm:$0x3f]  ;;  %v4600_v52 = vld [vmem:[#allocation129_spill] sm:$0xff] }
 0x220   :  { %v1453_v50 = vmax.f32 %v781_v44, %v1341_v53  ;;  %v1112_v47 = vpop.permute.xlu1 %1111  ;;  %v792_v10 = vmax.f32 %v1794_v45, %v4599_v33  ;;  %v1795_v44 = vld [vmem:[%s4283_s0 + $0x6e0] sm:$0xff] }
 0x221   :  { %v1110_v11 = vpop.permute.xlu0 %1109  ;;  %1568 = vst.msk [vmem:[%s4284_s1 + $0x328] sm:$0x3f] %vm1467_vm0, %v1454_v23  ;;  %v1344_v49 = vmax.f32 %v3596_v14, %v1112_v47  ;;  %v4589_v14 = vld [vmem:[#allocation54_spill] sm:$0xff]  ;;  %v791_v53 = vmax.f32 %v1795_v44, %v4600_v52  ;;  %v4601_v23 = vld [vmem:[#allocation4_spill] sm:$0xff]  ;;  %v4602_v47 = vld [vmem:[#allocation5_spill] sm:$0xff] }
 0x222   :  { %1567 = vst.msk [vmem:[%s4284_s1 + $0x320] sm:$0xff] %vm1465_vm1, %v1453_v50  ;;  %v1343_v5 = vmax.f32 %v3601_v15, %v1110_v11 }
 0x223   :  { %v1456_v61 = vmax.f32 %v784_v30, %v1344_v49 }
 0x224   :  { %v1455_v13 = vmax.f32 %v783_v32, %v1343_v5  ;;  %v1116_v46 = vpop.permute.xlu1 %1115 }
 0x225   :  { %v1114_v59 = vpop.permute.xlu0 %1113  ;;  %1570 = vst.msk [vmem:[%s4284_s1 + $0x338] sm:$0x3f] %vm1467_vm0, %v1456_v61  ;;  %v1346_v15 = vmax.f32 %v4589_v14, %v1116_v46 }
 0x226   :  { %1569 = vst.msk [vmem:[%s4284_s1 + $0x330] sm:$0xff] %vm1465_vm1, %v1455_v13  ;;  %v1345_v42 = vmax.f32 %v4590_v51, %v1114_v59 }
 0x227   :  { %v1458_v56 = vmax.f32 %v786_v16, %v1346_v15 }
 0x228   :  { %v1457_v63 = vmax.f32 %v785_v3, %v1345_v42  ;;  %v1120_v55 = vpop.permute.xlu1 %1119 }
 0x229   :  { %v1118_v22 = vpop.permute.xlu0 %1117  ;;  %1572 = vst.msk [vmem:[%s4284_s1 + $0x348] sm:$0x3f] %vm1467_vm0, %v1458_v56  ;;  %v1348_v9 = vmax.f32 %v4593_v0, %v1120_v55 }
 0x22a   :  { %1571 = vst.msk [vmem:[%s4284_s1 + $0x340] sm:$0xff] %vm1465_vm1, %v1457_v63  ;;  %v1347_v36 = vmax.f32 %v4594_v6, %v1118_v22 }
 0x22b   :  { %v1460_v41 = vmax.f32 %v788_v18, %v1348_v9 }
 0x22c   :  { %v1459_v19 = vmax.f32 %v787_v34, %v1347_v36  ;;  %v1124_v20 = vpop.permute.xlu1 %1123 }
 0x22d   :  { %v1122_v21 = vpop.permute.xlu0 %1121  ;;  %1574 = vst.msk [vmem:[%s4284_s1 + $0x358] sm:$0x3f] %vm1467_vm0, %v1460_v41  ;;  %v1350_v26 = vmax.f32 %v4597_v43, %v1124_v20 }
 0x22e   :  { %1573 = vst.msk [vmem:[%s4284_s1 + $0x350] sm:$0xff] %vm1465_vm1, %v1459_v19  ;;  %v1349_v54 = vmax.f32 %v4598_v31, %v1122_v21 }
 0x22f   :  { %v1462_v60 = vmax.f32 %v790_v37, %v1350_v26 }
 0x230   :  { %v1461_v12 = vmax.f32 %v789_v62, %v1349_v54  ;;  %v1128_v27 = vpop.permute.xlu1 %1127 }
 0x231   :  { %v1126_v2 = vpop.permute.xlu0 %1125  ;;  %1576 = vst.msk [vmem:[%s4284_s1 + $0x368] sm:$0x3f] %vm1467_vm0, %v1462_v60  ;;  %v1352_v50 = vmax.f32 %v4601_v23, %v1128_v27 }
 0x232   :  { %1575 = vst.msk [vmem:[%s4284_s1 + $0x360] sm:$0xff] %vm1465_vm1, %v1461_v12  ;;  %v1351_v11 = vmax.f32 %v4602_v47, %v1126_v2 }
 0x233   :  { %v1464_v24 = vmax.f32 %v792_v10, %v1352_v50 }
 0x234   :  { %v1463_v25 = vmax.f32 %v791_v53, %v1351_v11 }
 0x235   :  { %1578 = vst.msk [vmem:[%s4284_s1 + $0x378] sm:$0x3f] %vm1467_vm0, %v1464_v24 }
 0x236   :  { %1577 = vst.msk [vmem:[%s4284_s1 + $0x370] sm:$0xff] %vm1465_vm1, %v1463_v25 }

// kernel: net_forward.10
= control target key start
LH: loop header
LB: loop body
LE: loop exit
PB: predicated region body
PF: predicated region fallthrough
CT: control target
= control target key end

     0   :  { %s323_s0 = inlined_call_operand.vmem [shape: f32[12,2,6,256], index: 0, kind: input, shape index: {}]   ;;  %s324_s1 = inlined_call_operand.vmem [shape: f32[12,6,128], index: 1, kind: output, shape index: {}]  }
   0x1   :  { %v8_v0 = vld [vmem:[%s323_s0] sm:$0x3f]  ;;  %v20_v1 = vld [vmem:[%s323_s0 + $0x8] sm:$0x3f]  ;;  %v109_v2 = vld [vmem:[%s323_s0 + $0x10] sm:$0x3f] }
   0x2   :  { %v121_v3 = vld [vmem:[%s323_s0 + $0x18] sm:$0x3f]  ;;  %v57_v4 = vmax.f32 %v8_v0, %v20_v1  ;;  %v9_v5 = vld [vmem:[%s323_s0 + $0x20] sm:$0x3f]  ;;  %v21_v6 = vld [vmem:[%s323_s0 + $0x28] sm:$0x3f] }
   0x3   :  { %v69_v7 = vmax.f32 %v109_v2, %v121_v3  ;;  %v110_v8 = vld [vmem:[%s323_s0 + $0x30] sm:$0x3f]  ;;  %v122_v9 = vld [vmem:[%s323_s0 + $0x38] sm:$0x3f]  ;;  %v58_v10 = vmax.f32 %v9_v5, %v21_v6  ;;  %v10_v11 = vld [vmem:[%s323_s0 + $0x40] sm:$0x3f] }
   0x4   :  { %v70_v12 = vmax.f32 %v110_v8, %v122_v9  ;;  %v22_v13 = vld [vmem:[%s323_s0 + $0x48] sm:$0x3f]  ;;  %v111_v14 = vld [vmem:[%s323_s0 + $0x50] sm:$0x3f]  ;;  %v123_v15 = vld [vmem:[%s323_s0 + $0x58] sm:$0x3f] }
   0x5   :  { %v81_v16 = vmax.f32 %v57_v4, %v69_v7  ;;  %v59_v17 = vmax.f32 %v10_v11, %v22_v13  ;;  %v71_v18 = vmax.f32 %v111_v14, %v123_v15  ;;  %v11_v19 = vld [vmem:[%s323_s0 + $0x60] sm:$0x3f]  ;;  %v23_v20 = vld [vmem:[%s323_s0 + $0x68] sm:$0x3f]  ;;  %v112_v21 = vld [vmem:[%s323_s0 + $0x70] sm:$0x3f] }
   0x6   :  { %v82_v22 = vmax.f32 %v58_v10, %v70_v12  ;;  %v124_v23 = vld [vmem:[%s323_s0 + $0x78] sm:$0x3f]  ;;  %v60_v24 = vmax.f32 %v11_v19, %v23_v20  ;;  %v12_v25 = vld [vmem:[%s323_s0 + $0x80] sm:$0x3f]  ;;  %v24_v26 = vld [vmem:[%s323_s0 + $0x88] sm:$0x3f] }
   0x7   :  { %93 = vst [vmem:[%s324_s1] sm:$0x3f] %v81_v16  ;;  %v83_v27 = vmax.f32 %v59_v17, %v71_v18  ;;  %v72_v28 = vmax.f32 %v112_v21, %v124_v23  ;;  %v113_v29 = vld [vmem:[%s323_s0 + $0x90] sm:$0x3f]  ;;  %v125_v30 = vld [vmem:[%s323_s0 + $0x98] sm:$0x3f]  ;;  %v61_v31 = vmax.f32 %v12_v25, %v24_v26 }
   0x8   :  { %v13_v32 = vld [vmem:[%s323_s0 + $0xa0] sm:$0x3f]  ;;  %94 = vst [vmem:[%s324_s1 + $0x8] sm:$0x3f] %v82_v22  ;;  %v73_v33 = vmax.f32 %v113_v29, %v125_v30  ;;  %v25_v34 = vld [vmem:[%s323_s0 + $0xa8] sm:$0x3f] }
   0x9   :  { %v114_v35 = vld [vmem:[%s323_s0 + $0xb0] sm:$0x3f]  ;;  %v126_v36 = vld [vmem:[%s323_s0 + $0xb8] sm:$0x3f]  ;;  %95 = vst [vmem:[%s324_s1 + $0x10] sm:$0x3f] %v83_v27  ;;  %v84_v37 = vmax.f32 %v60_v24, %v72_v28  ;;  %v62_v38 = vmax.f32 %v13_v32, %v25_v34 }
   0xa   :  { %v74_v39 = vmax.f32 %v114_v35, %v126_v36  ;;  %v14_v40 = vld [vmem:[%s323_s0 + $0xc0] sm:$0x3f]  ;;  %v26_v41 = vld [vmem:[%s323_s0 + $0xc8] sm:$0x3f]  ;;  %v115_v42 = vld [vmem:[%s323_s0 + $0xd0] sm:$0x3f]  ;;  %v85_v43 = vmax.f32 %v61_v31, %v73_v33 }
   0xb   :  { %v127_v44 = vld [vmem:[%s323_s0 + $0xd8] sm:$0x3f]  ;;  %v63_v45 = vmax.f32 %v14_v40, %v26_v41  ;;  %v15_v46 = vld [vmem:[%s323_s0 + $0xe0] sm:$0x3f]  ;;  %v27_v47 = vld [vmem:[%s323_s0 + $0xe8] sm:$0x3f] }
   0xc   :  { %96 = vst [vmem:[%s324_s1 + $0x18] sm:$0x3f] %v84_v37  ;;  %v86_v48 = vmax.f32 %v62_v38, %v74_v39  ;;  %v75_v49 = vmax.f32 %v115_v42, %v127_v44  ;;  %v116_v50 = vld [vmem:[%s323_s0 + $0xf0] sm:$0x3f]  ;;  %v128_v51 = vld [vmem:[%s323_s0 + $0xf8] sm:$0x3f]  ;;  %v64_v52 = vmax.f32 %v15_v46, %v27_v47 }
   0xd   :  { %v16_v53 = vld [vmem:[%s323_s0 + $0x100] sm:$0x3f]  ;;  %97 = vst [vmem:[%s324_s1 + $0x20] sm:$0x3f] %v85_v43  ;;  %v76_v54 = vmax.f32 %v116_v50, %v128_v51  ;;  %v28_v55 = vld [vmem:[%s323_s0 + $0x108] sm:$0x3f] }
   0xe   :  { %v117_v56 = vld [vmem:[%s323_s0 + $0x110] sm:$0x3f]  ;;  %v129_v57 = vld [vmem:[%s323_s0 + $0x118] sm:$0x3f]  ;;  %98 = vst [vmem:[%s324_s1 + $0x28] sm:$0x3f] %v86_v48  ;;  %v87_v58 = vmax.f32 %v63_v45, %v75_v49  ;;  %v65_v59 = vmax.f32 %v16_v53, %v28_v55 }
   0xf   :  { %v77_v60 = vmax.f32 %v117_v56, %v129_v57  ;;  %v17_v61 = vld [vmem:[%s323_s0 + $0x120] sm:$0x3f]  ;;  %v29_v62 = vld [vmem:[%s323_s0 + $0x128] sm:$0x3f]  ;;  %v118_v63 = vld [vmem:[%s323_s0 + $0x130] sm:$0x3f]  ;;  %v88_v0 = vmax.f32 %v64_v52, %v76_v54 }
  0x10   :  { %v130_v1 = vld [vmem:[%s323_s0 + $0x138] sm:$0x3f]  ;;  %v66_v2 = vmax.f32 %v17_v61, %v29_v62  ;;  %v18_v3 = vld [vmem:[%s323_s0 + $0x140] sm:$0x3f]  ;;  %v30_v4 = vld [vmem:[%s323_s0 + $0x148] sm:$0x3f] }
  0x11   :  { %99 = vst [vmem:[%s324_s1 + $0x30] sm:$0x3f] %v87_v58  ;;  %v89_v5 = vmax.f32 %v65_v59, %v77_v60  ;;  %v78_v6 = vmax.f32 %v118_v63, %v130_v1  ;;  %v119_v7 = vld [vmem:[%s323_s0 + $0x150] sm:$0x3f]  ;;  %v131_v8 = vld [vmem:[%s323_s0 + $0x158] sm:$0x3f]  ;;  %v67_v9 = vmax.f32 %v18_v3, %v30_v4 }
  0x12   :  { %v19_v10 = vld [vmem:[%s323_s0 + $0x160] sm:$0x3f]  ;;  %100 = vst [vmem:[%s324_s1 + $0x38] sm:$0x3f] %v88_v0  ;;  %v79_v11 = vmax.f32 %v119_v7, %v131_v8  ;;  %v31_v12 = vld [vmem:[%s323_s0 + $0x168] sm:$0x3f] }
  0x13   :  { %v120_v13 = vld [vmem:[%s323_s0 + $0x170] sm:$0x3f]  ;;  %v132_v14 = vld [vmem:[%s323_s0 + $0x178] sm:$0x3f]  ;;  %101 = vst [vmem:[%s324_s1 + $0x40] sm:$0x3f] %v89_v5  ;;  %v90_v15 = vmax.f32 %v66_v2, %v78_v6  ;;  %v68_v16 = vmax.f32 %v19_v10, %v31_v12 }
  0x14   :  { %v80_v17 = vmax.f32 %v120_v13, %v132_v14  ;;  %v91_v18 = vmax.f32 %v67_v9, %v79_v11 }
  0x15   :  { %102 = vst [vmem:[%s324_s1 + $0x48] sm:$0x3f] %v90_v15 }
  0x16   :  { %v92_v19 = vmax.f32 %v68_v16, %v80_v17  ;;  %103 = vst [vmem:[%s324_s1 + $0x50] sm:$0x3f] %v91_v18 }
  0x18   :  { %104 = vst [vmem:[%s324_s1 + $0x58] sm:$0x3f] %v92_v19 }

// kernel: net_forward.9
= control target key start
LH: loop header
LB: loop body
LE: loop exit
PB: predicated region body
PF: predicated region fallthrough
CT: control target
= control target key end

     0   :  { %v2018_v0 = vmov 0   ;;  %vm868_vm0 = vcmask 523264   ;;  %s2855_s1 = inlined_call_operand.vmem [shape: bf16[576,128], index: 1, kind: input, shape index: {}]   ;;  %s2856_s0 = inlined_call_operand.vmem [shape: bf16[288,576], index: 0, kind: input, shape index: {}]   ;;  %s2857_s2 = inlined_call_operand.vmem [shape: f32[1,128], index: 2, kind: input, shape index: {}]   ;;  %s2858_s3 = inlined_call_operand.vmem [shape: f32[288,128], index: 3, kind: output, shape index: {}]  }
   0x1   :  { %923 = vmatprep.subr.bf16.mxu0 %v2018_v0  ;;  %1741 = vmatprep.subr.bf16.mxu1 %v2018_v0  ;;  %v1856_v1 = vld [vmem:[%s2855_s1] sm:$0xff]   ;;  %v1858_v3 = vld [vmem:[%s2855_s1 + $0x8] sm:$0xff]   ;;  %v1860_v5 = vld [vmem:[%s2855_s1 + $0x10] sm:$0xff]  }
   0x2   :  { %v2047_v2 = vld [vmem:[%s2855_s1 + $0x80] sm:$0xff]   ;;  %924 = vmatpush1.bf16.msra.mxu0 %v1856_v1  ;;  %v2057_v4 = vld [vmem:[%s2855_s1 + $0x88] sm:$0xff]   ;;  %v2068_v6 = vld [vmem:[%s2855_s1 + $0x90] sm:$0xff]  }
   0x3   :  { %1757 = vmatpush1.bf16.msra.mxu1 %v2047_v2  ;;  %925 = vmatprep.subr.bf16.mxu0 %v2018_v0  ;;  %v1862_v7 = vld [vmem:[%s2855_s1 + $0x18] sm:$0xff]   ;;  %v1864_v9 = vld [vmem:[%s2855_s1 + $0x20] sm:$0xff]   ;;  %v1866_v11 = vld [vmem:[%s2855_s1 + $0x28] sm:$0xff]  }
   0x4   :  { %1742 = vmatprep.subr.bf16.mxu1 %v2018_v0  ;;  %v2079_v8 = vld [vmem:[%s2855_s1 + $0x98] sm:$0xff]   ;;  %v2090_v10 = vld [vmem:[%s2855_s1 + $0xa0] sm:$0xff]   ;;  %v2101_v12 = vld [vmem:[%s2855_s1 + $0xa8] sm:$0xff]  }
   0x5   :  { %v1868_v13 = vld [vmem:[%s2855_s1 + $0x30] sm:$0xff]   ;;  %v1870_v15 = vld [vmem:[%s2855_s1 + $0x38] sm:$0xff]   ;;  %v1872_v17 = vld [vmem:[%s2855_s1 + $0x40] sm:$0xff]  }
   0x6   :  { %926 = vmatpush1.bf16.msra.mxu0 %v1858_v3  ;;  %v2112_v14 = vld [vmem:[%s2855_s1 + $0xb0] sm:$0xff]   ;;  %v2123_v16 = vld [vmem:[%s2855_s1 + $0xb8] sm:$0xff]   ;;  %v2134_v18 = vld [vmem:[%s2855_s1 + $0xc0] sm:$0xff]  }
   0x7   :  { %1758 = vmatpush1.bf16.msra.mxu1 %v2057_v4  ;;  %927 = vmatprep.subr.bf16.mxu0 %v2018_v0  ;;  %v1890_v19 = vld [vmem:[%s2856_s0 + $0x4] ss:$20 sps:$4 sm:$0xff]   ;;  %v1874_v20 = vld [vmem:[%s2855_s1 + $0x48] sm:$0xff]   ;;  %v1876_v23 = vld [vmem:[%s2855_s1 + $0x50] sm:$0xff]  }
   0x8   :  { %1743 = vmatprep.subr.bf16.mxu1 %v2018_v0  ;;  %v1893_v21 = vld [vmem:[%s2856_s0 + $0xd4] ss:$20 sps:$4 sm:$0xff]   ;;  %955 = vmatprep.mubr.bf16.mxu0 %v1890_v19  ;;  %v1878_v25 = vld [vmem:[%s2855_s1 + $0x58] sm:$0xff]   ;;  %v1880_v27 = vld [vmem:[%s2855_s1 + $0x60] sm:$0xff]  }
   0x9   :  { %v2151_v22 = vld [vmem:[%s2855_s1 + $0xc8] sm:$0xff]   ;;  %1172 = vmatprep.mubr.bf16.mxu1 %v1893_v21  ;;  %v2162_v24 = vld [vmem:[%s2855_s1 + $0xd0] sm:$0xff]   ;;  %v2173_v26 = vld [vmem:[%s2855_s1 + $0xd8] sm:$0xff]  }
   0xa   :  { %928 = vmatpush1.bf16.msra.mxu0 %v1860_v5  ;;  %v2184_v28 = vld [vmem:[%s2855_s1 + $0xe0] sm:$0xff]   ;;  %v1882_v29 = vld [vmem:[%s2855_s1 + $0x68] sm:$0xff]   ;;  %v1884_v31 = vld [vmem:[%s2855_s1 + $0x70] sm:$0xff]  }
   0xb   :  { %1759 = vmatpush1.bf16.msra.mxu1 %v2068_v6  ;;  %929 = vmatprep.subr.bf16.mxu0 %v2018_v0  ;;  %v2195_v30 = vld [vmem:[%s2855_s1 + $0xe8] sm:$0xff]   ;;  %v2206_v32 = vld [vmem:[%s2855_s1 + $0xf0] sm:$0xff]   ;;  %v1886_v33 = vld [vmem:[%s2855_s1 + $0x78] sm:$0xff]  }
   0xc   :  { %1744 = vmatprep.subr.bf16.mxu1 %v2018_v0  ;;  %v2217_v34 = vld [vmem:[%s2855_s1 + $0xf8] sm:$0xff]   ;;  %v1900_v35 = vld [vmem:[%s2855_s1 + $0x100] sm:$0xff]   ;;  %v1919_v40 = vld [vmem:[%s2855_s1 + $0x108] sm:$0xff]  }
   0xd   :  { %v1888_v36 = vld [vmem:[%s2856_s0] ss:$20 sps:$4 sm:$0xff]   ;;  %v1891_v37 = vld [vmem:[%s2856_s0 + $0xd0] ss:$20 sps:$4 sm:$0xff]   ;;  %v1898_v41 = vld [vmem:[%s2856_s0 + $0x28] ss:$20 sps:$4 sm:$0xff]  }
   0xe   :  { %930 = vmatpush1.bf16.msra.mxu0 %v1862_v7  ;;  %v1894_v38 = vld [vmem:[%s2856_s0 + $0x2c] ss:$20 sps:$4 sm:$0xff]   ;;  %v1896_v39 = vld [vmem:[%s2856_s0 + $0xfc] ss:$20 sps:$4 sm:$0xff]   ;;  %v1901_v44 = vld [vmem:[%s2856_s0 + $0x54] ss:$20 sps:$4 sm:$0xff]  }
   0xf   :  { %1760 = vmatpush1.bf16.msra.mxu1 %v2079_v8  ;;  %931 = vmatprep.subr.bf16.mxu0 %v2018_v0  ;;  %v1938_v42 = vld [vmem:[%s2855_s1 + $0x110] sm:$0xff]   ;;  %v1899_v43 = vld [vmem:[%s2856_s0 + $0xf8] ss:$20 sps:$4 sm:$0xff]   ;;  %v1912_v52 = vld [vmem:[%s2856_s0 + $0x148] ss:$20 sps:$4 sm:$0xff]  }
  0x10   :  { %1745 = vmatprep.subr.bf16.mxu1 %v2018_v0  ;;  %v1903_v45 = vld [vmem:[%s2856_s0 + $0x124] ss:$20 sps:$4 sm:$0xff]   ;;  %v1906_v48 = vld [vmem:[%s2856_s0 + $0x120] ss:$20 sps:$4 sm:$0xff]   ;;  %v1907_v49 = vld [vmem:[%s2856_s0 + $0x7c] ss:$20 sps:$4 sm:$0xff]  }
  0x11   :  { %v1961_v46 = vld [vmem:[%s2855_s1 + $0x118] sm:$0xff]   ;;  %v1905_v47 = vld [vmem:[%s2856_s0 + $0x50] ss:$20 sps:$4 sm:$0xff]   ;;  %v1909_v50 = vld [vmem:[%s2856_s0 + $0x14c] ss:$20 sps:$4 sm:$0xff]  }
  0x12   :  { %932 = vmatpush1.bf16.msra.mxu0 %v1864_v9  ;;  %v1911_v51 = vld [vmem:[%s2856_s0 + $0x78] ss:$20 sps:$4 sm:$0xff]   ;;  %v1915_v54 = vld [vmem:[%s2856_s0 + $0x174] ss:$20 sps:$4 sm:$0xff]   ;;  %v1918_v56 = vld [vmem:[%s2856_s0 + $0x170] ss:$20 sps:$4 sm:$0xff]  }
  0x13   :  { %1761 = vmatpush1.bf16.msra.mxu1 %v2090_v10  ;;  %933 = vmatprep.subr.bf16.mxu0 %v2018_v0  ;;  %v1913_v53 = vld [vmem:[%s2856_s0 + $0xa4] ss:$20 sps:$4 sm:$0xff]   ;;  %v1917_v55 = vld [vmem:[%s2856_s0 + $0xa0] ss:$20 sps:$4 sm:$0xff]   ;;  %v1922_v58 = vld [vmem:[%s2856_s0 + $0x19c] ss:$20 sps:$4 sm:$0xff]  }
  0x14   :  { %1746 = vmatprep.subr.bf16.mxu1 %v2018_v0  ;;  %v1920_v57 = vld [vmem:[%s2856_s0 + $0xcc] ss:$20 sps:$4 sm:$0xff]   ;;  %v1924_v59 = vld [vmem:[%s2856_s0 + $0xc8] ss:$20 sps:$4 sm:$0xff]   ;;  %v1928_v62 = vld [vmem:[%s2856_s0 + $0x1c4] ss:$20 sps:$4 sm:$0xff]  }
  0x15   :  { %v1925_v60 = vld [vmem:[%s2856_s0 + $0x198] ss:$20 sps:$4 sm:$0xff]   ;;  %v1926_v61 = vld [vmem:[%s2856_s0 + $0xf4] ss:$20 sps:$4 sm:$0xff]   ;;  %v1930_v63 = vld [vmem:[%s2856_s0 + $0xf0] ss:$20 sps:$4 sm:$0xff]  }
  0x16   :  { %934 = vmatpush1.bf16.msra.mxu0 %v1866_v11  ;;  %v1931_v1 = vld [vmem:[%s2856_s0 + $0x1c0] ss:$20 sps:$4 sm:$0xff]   ;;  %v1937_v5 = vld [vmem:[%s2856_s0 + $0x1e8] ss:$20 sps:$4 sm:$0xff]   ;;  %v1944_v9 = vld [vmem:[%s2856_s0 + $0x210] ss:$20 sps:$4 sm:$0xff]  }
  0x17   :  { %1762 = vmatpush1.bf16.msra.mxu1 %v2101_v12  ;;  %935 = vmatprep.subr.bf16.mxu0 %v2018_v0  ;;  %v1934_v3 = vld [vmem:[%s2856_s0 + $0x1ec] ss:$20 sps:$4 sm:$0xff]   ;;  %v1941_v7 = vld [vmem:[%s2856_s0 + $0x214] ss:$20 sps:$4 sm:$0xff]   ;;  %v1947_v11 = vld [vmem:[%s2856_s0 + $0x23c] ss:$20 sps:$4 sm:$0xff]  }
  0x18   :  { %1747 = vmatprep.subr.bf16.mxu1 %v2018_v0  ;;  %v1962_v19 = vld [vmem:[%s2856_s0 + $0x1b8] ss:$20 sps:$4 sm:$0xff]  }
  0x19   :  { %v1964_v21 = vld [vmem:[%s2856_s0 + $0x1e4] ss:$20 sps:$4 sm:$0xff]  }
  0x1a   :  { %936 = vmatpush1.bf16.msra.mxu0 %v1868_v13  ;;  %v1951_v13 = vld [vmem:[%s2856_s0 + $0x194] ss:$20 sps:$4 sm:$0xff]  }
  0x1b   :  { %1763 = vmatpush1.bf16.msra.mxu1 %v2112_v14  ;;  %937 = vmatprep.subr.bf16.mxu0 %v2018_v0 }
  0x1c   :  { %1748 = vmatprep.subr.bf16.mxu1 %v2018_v0 }
  0x1e   :  { %938 = vmatpush1.bf16.msra.mxu0 %v1870_v15  ;;  %v1955_v15 = vld [vmem:[%s2856_s0 + $0x190] ss:$20 sps:$4 sm:$0xff]  }
  0x1f   :  { %1764 = vmatpush1.bf16.msra.mxu1 %v2123_v16  ;;  %939 = vmatprep.subr.bf16.mxu0 %v2018_v0 }
  0x20   :  { %1749 = vmatprep.subr.bf16.mxu1 %v2018_v0 }
  0x22   :  { %940 = vmatpush1.bf16.msra.mxu0 %v1872_v17  ;;  %v1957_v17 = vld [vmem:[%s2856_s0 + $0x1bc] ss:$20 sps:$4 sm:$0xff]  }
  0x23   :  { %1765 = vmatpush1.bf16.msra.mxu1 %v2134_v18  ;;  %941 = vmatprep.subr.bf16.mxu0 %v2018_v0 }
  0x24   :  { %1750 = vmatprep.subr.bf16.mxu1 %v2018_v0 }
  0x26   :  { %942 = vmatpush1.bf16.msra.mxu0 %v1874_v20  ;;  %v1963_v20 = vld [vmem:[%s2856_s0 + $0x288] ss:$20 sps:$4 sm:$0xff]  }
  0x27   :  { %1766 = vmatpush1.bf16.msra.mxu1 %v2151_v22  ;;  %943 = vmatprep.subr.bf16.mxu0 %v2018_v0 }
  0x28   :  { %1751 = vmatprep.subr.bf16.mxu1 %v2018_v0 }
  0x2a   :  { %944 = vmatpush1.bf16.msra.mxu0 %v1876_v23  ;;  %v1968_v23 = vld [vmem:[%s2856_s0 + $0x1e0] ss:$20 sps:$4 sm:$0xff]  }
  0x2b   :  { %1767 = vmatpush1.bf16.msra.mxu1 %v2162_v24  ;;  %945 = vmatprep.subr.bf16.mxu0 %v2018_v0 }
  0x2c   :  { %1752 = vmatprep.subr.bf16.mxu1 %v2018_v0 }
  0x2e   :  { %946 = vmatpush1.bf16.msra.mxu0 %v1878_v25  ;;  %v1970_v25 = vld [vmem:[%s2856_s0 + $0x20c] ss:$20 sps:$4 sm:$0xff]  }
  0x2f   :  { %1768 = vmatpush1.bf16.msra.mxu1 %v2173_v26  ;;  %947 = vmatprep.subr.bf16.mxu0 %v2018_v0 }
  0x30   :  { %1753 = vmatprep.subr.bf16.mxu1 %v2018_v0 }
  0x32   :  { %948 = vmatpush1.bf16.msra.mxu0 %v1880_v27  ;;  %v1973_v27 = vld [vmem:[%s2856_s0 + $0x208] ss:$20 sps:$4 sm:$0xff]  }
  0x33   :  { %1769 = vmatpush1.bf16.msra.mxu1 %v2184_v28  ;;  %949 = vmatprep.subr.bf16.mxu0 %v2018_v0 }
  0x34   :  { %1754 = vmatprep.subr.bf16.mxu1 %v2018_v0 }
  0x36   :  { %950 = vmatpush1.bf16.msra.mxu0 %v1882_v29  ;;  %v1975_v29 = vld [vmem:[%s2856_s0 + $0x234] ss:$20 sps:$4 sm:$0xff]  }
  0x37   :  { %1770 = vmatpush1.bf16.msra.mxu1 %v2195_v30  ;;  %951 = vmatprep.subr.bf16.mxu0 %v2018_v0 }
  0x38   :  { %1755 = vmatprep.subr.bf16.mxu1 %v2018_v0 }
  0x3a   :  { %952 = vmatpush1.bf16.msra.mxu0 %v1884_v31  ;;  %v1978_v31 = vld [vmem:[%s2856_s0 + $0x230] ss:$20 sps:$4 sm:$0xff]  }
  0x3b   :  { %1771 = vmatpush1.bf16.msra.mxu1 %v2206_v32  ;;  %953 = vmatprep.subr.bf16.mxu0 %v2018_v0 }
  0x3c   :  { %1756 = vmatprep.subr.bf16.mxu1 %v2018_v0 }
  0x3e   :  { %954 = vmatpush1.bf16.msra.mxu0 %v1886_v33  ;;  %v1980_v33 = vld [vmem:[%s2856_s0 + $0x25c] ss:$20 sps:$4 sm:$0xff]  }
  0x3f   :  { %1772 = vmatpush1.bf16.msra.mxu1 %v2217_v34  ;;  %1100 = vmatprep.subr.bf16.mxu0 %v2018_v0 }
  0x40   :  { %1697 = vmatprep.subr.bf16.mxu1 %v1900_v35 }
  0x41   :  { %956 = vmatmul.mubr.bf16.vlgmr.msra.gmra.mrb[0].mxu0 %v1888_v36  ;;  %v1984_v36 = vld [vmem:[%s2856_s0 + $0xd8] ss:$20 sps:$4 sm:$0xff]  }
  0x42   :  { %1173 = vmatmul.mubr.bf16.vlgmr.msra.gmra.mrb[0].mxu1 %v1891_v37  ;;  %1101 = vmatpush1.bf16.msra.mxu0 %v2047_v2  ;;  %v1932_v2 = vld [vmem:[%s2856_s0 + $0x11c] ss:$20 sps:$4 sm:$0xff]   ;;  %v1985_v37 = vld [vmem:[%s2856_s0 + $0x284] ss:$20 sps:$4 sm:$0xff]  }
  0x43   :  { %963 = vmatprep.mubr.bf16.mxu0 %v1894_v38  ;;  %1180 = vmatprep.mubr.bf16.mxu1 %v1896_v39  ;;  %v1987_v38 = vld [vmem:[%s2856_s0 + $0x100] ss:$20 sps:$4 sm:$0xff]  }
  0x44   :  { %1102 = vmatprep.subr.bf16.mxu0 %v2018_v0  ;;  %1698 = vmatpush3.bf16.msra.mxu1 %v1900_v35  ;;  %v1983_v35 = vld [vmem:[%s2856_s0 + $0x258] ss:$20 sps:$4 sm:$0xff]   ;;  %v1988_v39 = vld [vmem:[%s2856_s0 + $0x280] ss:$20 sps:$4 sm:$0xff]  }
  0x45   :  { %1699 = vmatprep.subr.bf16.mxu1 %v1919_v40 }
  0x46   :  { %1103 = vmatpush1.bf16.msra.mxu0 %v2057_v4  ;;  %v1936_v4 = vld [vmem:[%s2856_s0 + $0x118] ss:$20 sps:$4 sm:$0xff]  }
  0x47   :  { %1104 = vmatprep.subr.bf16.mxu0 %v2018_v0 }
  0x48   :  { %1700 = vmatpush3.bf16.msra.mxu1 %v1919_v40  ;;  %v1989_v40 = vld [vmem:[%s2856_s0 + $0x128] ss:$20 sps:$4 sm:$0xff]  }
  0x49   :  { %964 = vmatmul.mubr.bf16.gmra.mrb[4].mxu0 %v1898_v41  ;;  %1701 = vmatprep.subr.bf16.mxu1 %v1938_v42  ;;  %v1990_v41 = vld [vmem:[%s2856_s0 + $0x2ac] ss:$20 sps:$4 sm:$0xff]  }
  0x4a   :  { %1181 = vmatmul.mubr.bf16.gmra.mrb[4].mxu1 %v1899_v43  ;;  %971 = vmatprep.mubr.bf16.mxu0 %v1901_v44  ;;  %v1993_v43 = vld [vmem:[%s2856_s0 + $0x2a8] ss:$20 sps:$4 sm:$0xff]   ;;  %v1994_v44 = vld [vmem:[%s2856_s0 + $0x178] ss:$20 sps:$4 sm:$0xff]  }
  0x4b   :  { %1188 = vmatprep.mubr.bf16.mxu1 %v1903_v45  ;;  %1105 = vmatpush1.bf16.msra.mxu0 %v2068_v6  ;;  %v1939_v6 = vld [vmem:[%s2856_s0 + $0x144] ss:$20 sps:$4 sm:$0xff]   ;;  %v1997_v45 = vld [vmem:[%s2856_s0 + $0xc] ss:$20 sps:$4 sm:$0xff]  }
  0x4c   :  { %1106 = vmatprep.subr.bf16.mxu0 %v2018_v0  ;;  %1702 = vmatpush3.bf16.msra.mxu1 %v1938_v42  ;;  %v1992_v42 = vld [vmem:[%s2856_s0 + $0x150] ss:$20 sps:$4 sm:$0xff]  }
  0x4d   :  { %1703 = vmatprep.subr.bf16.mxu1 %v1961_v46 }
  0x4f   :  { %1107 = vmatpush1.bf16.msra.mxu0 %v2079_v8  ;;  %v1943_v8 = vld [vmem:[%s2856_s0 + $0x140] ss:$20 sps:$4 sm:$0xff]  }
  0x50   :  { %1108 = vmatprep.subr.bf16.mxu0 %v2018_v0  ;;  %1704 = vmatpush3.bf16.msra.mxu1 %v1961_v46  ;;  %v1998_v46 = vld [vmem:[%s2856_s0 + $0x1a0] ss:$20 sps:$4 sm:$0xff]  }
  0x51   :  { %972 = vmatmul.mubr.bf16.gmra.mrb[8].mxu0 %v1905_v47  ;;  %v1995_v47 = vld [vmem:[%s2856_s0 + $0x8] ss:$20 sps:$4 sm:$0xff]  }
  0x52   :  { %1189 = vmatmul.mubr.bf16.gmra.mrb[8].mxu1 %v1906_v48  ;;  %979 = vmatprep.mubr.bf16.mxu0 %v1907_v49  ;;  %v1999_v48 = vld [vmem:[%s2856_s0 + $0x1c8] ss:$20 sps:$4 sm:$0xff]  }
  0x53   :  { %1196 = vmatprep.mubr.bf16.mxu1 %v1909_v50  ;;  %1109 = vmatpush1.bf16.msra.mxu0 %v2090_v10  ;;  %v1945_v10 = vld [vmem:[%s2856_s0 + $0x16c] ss:$20 sps:$4 sm:$0xff]   ;;  %v2000_v49 = vld [vmem:[%s2856_s0 + $0x34] ss:$20 sps:$4 sm:$0xff]   ;;  %v2002_v50 = vld [vmem:[%s2856_s0 + $0x1f0] ss:$20 sps:$4 sm:$0xff]  }
  0x54   :  { %1110 = vmatprep.subr.bf16.mxu0 %v2018_v0 }
  0x57   :  { %1111 = vmatpush1.bf16.msra.mxu0 %v2101_v12  ;;  %v1950_v12 = vld [vmem:[%s2856_s0 + $0x238] ss:$20 sps:$4 sm:$0xff]  }
  0x58   :  { %1112 = vmatprep.subr.bf16.mxu0 %v2018_v0 }
  0x59   :  { %980 = vmatmul.mubr.bf16.gmra.mrb[12].mxu0 %v1911_v51  ;;  %v2003_v51 = vld [vmem:[%s2856_s0 + $0x30] ss:$20 sps:$4 sm:$0xff]  }
  0x5a   :  { %1197 = vmatmul.mubr.bf16.gmra.mrb[12].mxu1 %v1912_v52  ;;  %987 = vmatprep.mubr.bf16.mxu0 %v1913_v53  ;;  %v2004_v52 = vld [vmem:[%s2856_s0 + $0x218] ss:$20 sps:$4 sm:$0xff]   ;;  %v2005_v53 = vld [vmem:[%s2856_s0 + $0x5c] ss:$20 sps:$4 sm:$0xff]  }
  0x5b   :  { %1204 = vmatprep.mubr.bf16.mxu1 %v1915_v54  ;;  %1113 = vmatpush1.bf16.msra.mxu0 %v2112_v14  ;;  %v1953_v14 = vld [vmem:[%s2856_s0 + $0x264] ss:$20 sps:$4 sm:$0xff]   ;;  %v2007_v54 = vld [vmem:[%s2856_s0 + $0x240] ss:$20 sps:$4 sm:$0xff]  }
  0x5c   :  { %1114 = vmatprep.subr.bf16.mxu0 %v2018_v0 }
  0x5f   :  { %1115 = vmatpush1.bf16.msra.mxu0 %v2123_v16  ;;  %v1956_v16 = vld [vmem:[%s2856_s0 + $0x260] ss:$20 sps:$4 sm:$0xff]  }
  0x60   :  { %1116 = vmatprep.subr.bf16.mxu0 %v2018_v0 }
  0x61   :  { %988 = vmatmul.mubr.bf16.gmra.mrb[16].mxu0 %v1917_v55  ;;  %v2008_v55 = vld [vmem:[%s2856_s0 + $0x58] ss:$20 sps:$4 sm:$0xff]  }
  0x62   :  { %1205 = vmatmul.mubr.bf16.gmra.mrb[16].mxu1 %v1918_v56  ;;  %995 = vmatprep.mubr.bf16.mxu0 %v1920_v57  ;;  %v2009_v56 = vld [vmem:[%s2856_s0 + $0x268] ss:$20 sps:$4 sm:$0xff]   ;;  %v2010_v57 = vld [vmem:[%s2856_s0 + $0x84] ss:$20 sps:$4 sm:$0xff]  }
  0x63   :  { %1212 = vmatprep.mubr.bf16.mxu1 %v1922_v58  ;;  %1117 = vmatpush1.bf16.msra.mxu0 %v2134_v18  ;;  %v1959_v18 = vld [vmem:[%s2856_s0 + $0x28c] ss:$20 sps:$4 sm:$0xff]   ;;  %v2012_v58 = vld [vmem:[%s2856_s0 + $0x290] ss:$20 sps:$4 sm:$0xff]  }
  0x64   :  { %1118 = vmatprep.subr.bf16.mxu0 %v2018_v0 }
  0x67   :  { %1119 = vmatpush1.bf16.msra.mxu0 %v2151_v22  ;;  %v1966_v22 = vld [vmem:[%s2856_s0 + $0x2b4] ss:$20 sps:$4 sm:$0xff]  }
  0x68   :  { %1120 = vmatprep.subr.bf16.mxu0 %v2018_v0 }
  0x69   :  { %996 = vmatmul.mubr.bf16.gmra.mrb[20].mxu0 %v1924_v59  ;;  %v2013_v59 = vld [vmem:[%s2856_s0 + $0x80] ss:$20 sps:$4 sm:$0xff]  }
  0x6a   :  { %1213 = vmatmul.mubr.bf16.gmra.mrb[20].mxu1 %v1925_v60  ;;  %1003 = vmatprep.mubr.bf16.mxu0 %v1926_v61  ;;  %v2014_v60 = vld [vmem:[%s2856_s0 + $0x2b8] ss:$20 sps:$4 sm:$0xff]  }
  0x6b   :  { %1220 = vmatprep.mubr.bf16.mxu1 %v1928_v62  ;;  %1121 = vmatpush1.bf16.msra.mxu0 %v2162_v24  ;;  %v1969_v24 = vld [vmem:[%s2856_s0 + $0x2b0] ss:$20 sps:$4 sm:$0xff]   ;;  %v2015_v61 = vld [vmem:[%s2856_s0 + $0xac] ss:$20 sps:$4 sm:$0xff]   ;;  %v2017_v62 = vld [vmem:[%s2856_s0 + $0xa8] ss:$20 sps:$4 sm:$0xff]  }
  0x6c   :  { %1122 = vmatprep.subr.bf16.mxu0 %v2018_v0 }
  0x6f   :  { %1123 = vmatpush1.bf16.msra.mxu0 %v2173_v26  ;;  %v1972_v26 = vld [vmem:[%s2856_s0 + $0x10] ss:$20 sps:$4 sm:$0xff]  }
  0x70   :  { %1124 = vmatprep.subr.bf16.mxu0 %v2018_v0 }
  0x71   :  { %1004 = vmatmul.mubr.bf16.gmra.mrb[24].mxu0 %v1930_v63 }
  0x72   :  { %1221 = vmatmul.mubr.bf16.gmra.mrb[24].mxu1 %v1931_v1  ;;  %1011 = vmatprep.mubr.bf16.mxu0 %v1932_v2 }
  0x73   :  { %1228 = vmatprep.mubr.bf16.mxu1 %v1934_v3  ;;  %1125 = vmatpush1.bf16.msra.mxu0 %v2184_v28  ;;  %v1974_v28 = vld [vmem:[%s2856_s0 + $0x38] ss:$20 sps:$4 sm:$0xff]  }
  0x74   :  { %1126 = vmatprep.subr.bf16.mxu0 %v2018_v0 }
  0x77   :  { %1127 = vmatpush1.bf16.msra.mxu0 %v2195_v30  ;;  %v1977_v30 = vld [vmem:[%s2856_s0 + $0x60] ss:$20 sps:$4 sm:$0xff]  }
  0x78   :  { %1128 = vmatprep.subr.bf16.mxu0 %v2018_v0 }
  0x79   :  { %1012 = vmatmul.mubr.bf16.gmra.mrb[28].mxu0 %v1936_v4 }
  0x7a   :  { %1229 = vmatmul.mubr.bf16.gmra.mrb[28].mxu1 %v1937_v5  ;;  %1019 = vmatprep.mubr.bf16.mxu0 %v1939_v6 }
  0x7b   :  { %1236 = vmatprep.mubr.bf16.mxu1 %v1941_v7  ;;  %1129 = vmatpush1.bf16.msra.mxu0 %v2206_v32  ;;  %v1979_v32 = vld [vmem:[%s2856_s0 + $0x88] ss:$20 sps:$4 sm:$0xff]  }
  0x7c   :  { %1130 = vmatprep.subr.bf16.mxu0 %v2018_v0  ;;  %v1949_v0 = vld [vmem:[%s2856_s0 + $0x168] ss:$20 sps:$4 sm:$0xff]  }
  0x7f   :  { %1131 = vmatpush1.bf16.msra.mxu0 %v2217_v34  ;;  %v1982_v34 = vld [vmem:[%s2856_s0 + $0xb0] ss:$20 sps:$4 sm:$0xff]  }
  0x81   :  { %1020 = vmatmul.mubr.bf16.gmra.mrb[32].mxu0 %v1943_v8 }
  0x82   :  { %1237 = vmatmul.mubr.bf16.gmra.mrb[32].mxu1 %v1944_v9  ;;  %1027 = vmatprep.mubr.bf16.mxu0 %v1945_v10 }
  0x83   :  { %1244 = vmatprep.mubr.bf16.mxu1 %v1947_v11 }
  0x89   :  { %1028 = vmatmul.mubr.bf16.gmra.mrb[36].mxu0 %v1949_v0 }
  0x8a   :  { %1245 = vmatmul.mubr.bf16.gmra.mrb[36].mxu1 %v1950_v12  ;;  %1035 = vmatprep.mubr.bf16.mxu0 %v1951_v13 }
  0x8b   :  { %1252 = vmatprep.mubr.bf16.mxu1 %v1953_v14 }
  0x91   :  { %1036 = vmatmul.mubr.bf16.gmra.mrb[40].mxu0 %v1955_v15 }
  0x92   :  { %1253 = vmatmul.mubr.bf16.gmra.mrb[40].mxu1 %v1956_v16  ;;  %1043 = vmatprep.mubr.bf16.mxu0 %v1957_v17 }
  0x93   :  { %1260 = vmatprep.mubr.bf16.mxu1 %v1959_v18 }
  0x99   :  { %1044 = vmatmul.mubr.bf16.gmra.mrb[44].mxu0 %v1962_v19  ;;  %v2552_v19 = vld [vmem:[%s2857_s2] ss:$0 sm:$0xff] }
  0x9a   :  { %1261 = vmatmul.mubr.bf16.gmra.mrb[44].mxu1 %v1963_v20  ;;  %1051 = vmatprep.mubr.bf16.mxu0 %v1964_v21 }
  0x9b   :  { %1268 = vmatprep.mubr.bf16.mxu1 %v1966_v22 }
  0xa1   :  { %1052 = vmatmul.mubr.bf16.gmra.mrb[48].mxu0 %v1968_v23 }
  0xa2   :  { %1269 = vmatmul.mubr.bf16.gmra.mrb[48].mxu1 %v1969_v24  ;;  %1059 = vmatprep.mubr.bf16.mxu0 %v1970_v25 }
  0xa3   :  { %1705 = vmatprep.mubr.msk.bf16.mxu1 %vm868_vm0, %v1972_v26 }
  0xa9   :  { %1060 = vmatmul.mubr.bf16.gmra.mrb[52].mxu0 %v1973_v27 }
  0xaa   :  { %1706 = vmatmul.mubr.msk.bf16.vlgmr.msra.gmra.mrb[52].mxu1 %vm868_vm0, %v1974_v28  ;;  %1067 = vmatprep.mubr.bf16.mxu0 %v1975_v29 }
  0xab   :  { %1709 = vmatprep.mubr.msk.bf16.mxu1 %vm868_vm0, %v1977_v30 }
  0xb1   :  { %1068 = vmatmul.mubr.bf16.gmra.mrb[56].mxu0 %v1978_v31 }
  0xb2   :  { %1710 = vmatmul.mubr.msk.bf16.gmra.mrb[56].mxu1 %vm868_vm0, %v1979_v32  ;;  %1075 = vmatprep.mubr.bf16.mxu0 %v1980_v33 }
  0xb3   :  { %1713 = vmatprep.mubr.msk.bf16.mxu1 %vm868_vm0, %v1982_v34 }
  0xb9   :  { %1076 = vmatmul.mubr.bf16.gmra.mrb[60].mxu0 %v1983_v35 }
  0xba   :  { %1714 = vmatmul.mubr.msk.bf16.gmra.mrb[60].mxu1 %vm868_vm0, %v1984_v36  ;;  %1083 = vmatprep.mubr.bf16.mxu0 %v1985_v37 }
  0xbb   :  { %1717 = vmatprep.mubr.msk.bf16.mxu1 %vm868_vm0, %v1987_v38 }
  0xc1   :  { %1084 = vmatmul.mubr.bf16.gmra.mrb[64].mxu0 %v1988_v39 }
  0xc2   :  { %1718 = vmatmul.mubr.msk.bf16.gmra.mrb[64].mxu1 %vm868_vm0, %v1989_v40  ;;  %1091 = vmatprep.mubr.bf16.mxu0 %v1990_v41 }
  0xc3   :  { %1721 = vmatprep.mubr.msk.bf16.mxu1 %vm868_vm0, %v1992_v42 }
  0xc9   :  { %1092 = vmatmul.mubr.bf16.gmra.mrb[68].mxu0 %v1993_v43 }
  0xca   :  { %1722 = vmatmul.mubr.msk.bf16.gmra.mrb[68].mxu1 %vm868_vm0, %v1994_v44  ;;  %1132 = vmatprep.mubr.bf16.mxu0 %v1997_v45 }
  0xcb   :  { %1725 = vmatprep.mubr.msk.bf16.mxu1 %vm868_vm0, %v1998_v46 }
  0xd1   :  { %1133 = vmatmul.mubr.bf16.vlgmr.msra.gmra.mrb[0].mxu0 %v1995_v47 }
  0xd2   :  { %1726 = vmatmul.mubr.msk.bf16.gmra.mrb[72].mxu1 %vm868_vm0, %v1999_v48  ;;  %1140 = vmatprep.mubr.bf16.mxu0 %v2000_v49 }
  0xd3   :  { %1729 = vmatprep.mubr.msk.bf16.mxu1 %vm868_vm0, %v2002_v50 }
  0xd9   :  { %1141 = vmatmul.mubr.bf16.gmra.mrb[4].mxu0 %v2003_v51 }
  0xda   :  { %1730 = vmatmul.mubr.msk.bf16.gmra.mrb[76].mxu1 %vm868_vm0, %v2004_v52  ;;  %1148 = vmatprep.mubr.bf16.mxu0 %v2005_v53 }
  0xdb   :  { %1733 = vmatprep.mubr.msk.bf16.mxu1 %vm868_vm0, %v2007_v54 }
  0xe1   :  { %1149 = vmatmul.mubr.bf16.gmra.mrb[8].mxu0 %v2008_v55 }
  0xe2   :  { %1734 = vmatmul.mubr.msk.bf16.gmra.mrb[80].mxu1 %vm868_vm0, %v2009_v56  ;;  %1156 = vmatprep.mubr.bf16.mxu0 %v2010_v57 }
  0xe3   :  { %1737 = vmatprep.mubr.msk.bf16.mxu1 %vm868_vm0, %v2012_v58 }
  0xe9   :  { %1157 = vmatmul.mubr.bf16.gmra.mrb[12].mxu0 %v2013_v59 }
  0xea   :  { %1738 = vmatmul.mubr.msk.bf16.gmra.mrb[84].mxu1 %vm868_vm0, %v2014_v60  ;;  %1164 = vmatprep.mubr.bf16.mxu0 %v2015_v61 }
  0xf1   :  { %1165 = vmatmul.mubr.bf16.gmra.mrb[16].mxu0 %v2017_v62 }
 0x115   :  { %v1174_v63 = vpop.f32.mrb[0].mxu1 }
 0x116   :  { %v1176_v1 = vpop.f32.mrb[1].mxu1 }
 0x117   :  { %v1177_v2 = vpop.f32.mrb[2].mxu1 }
 0x118   :  { %v1179_v3 = vpop.f32.mrb[3].mxu1 }
 0x11d   :  { %v1182_v4 = vpop.f32.mrb[4].mxu1 }
 0x11e   :  { %v1184_v5 = vpop.f32.mrb[5].mxu1 }
 0x11f   :  { %v1185_v6 = vpop.f32.mrb[6].mxu1 }
 0x120   :  { %v1187_v7 = vpop.f32.mrb[7].mxu1 }
 0x125   :  { %v1190_v8 = vpop.f32.mrb[8].mxu1 }
 0x126   :  { %v1192_v9 = vpop.f32.mrb[9].mxu1 }
 0x127   :  { %v1193_v10 = vpop.f32.mrb[10].mxu1 }
 0x128   :  { %v1195_v11 = vpop.f32.mrb[11].mxu1 }
 0x12d   :  { %v1198_v0 = vpop.f32.mrb[12].mxu1 }
 0x12e   :  { %v1200_v12 = vpop.f32.mrb[13].mxu1 }
 0x12f   :  { %v1201_v13 = vpop.f32.mrb[14].mxu1 }
 0x130   :  { %v1203_v14 = vpop.f32.mrb[15].mxu1 }
 0x135   :  { %v2547_v15 = vpop.f32.mrb[16].mxu1 }
 0x136   :  { %v1208_v16 = vpop.f32.mrb[17].mxu1 }
 0x137   :  { %v1209_v17 = vpop.f32.mrb[18].mxu1 }
 0x138   :  { %v1211_v18 = vpop.f32.mrb[19].mxu1 }
 0x13c   :  { %v997_v20 = vpop.f32.mrb[20].mxu0 }
 0x13d   :  { %v998_v21 = vadd.f32 %v2552_v19, %v997_v20  ;;  %v999_v22 = vpop.f32.mrb[21].mxu0  ;;  %v2555_v23 = vpop.f32.mrb[20].mxu1 }
 0x13e   :  { %v1000_v24 = vpop.f32.mrb[22].mxu0  ;;  %v1216_v25 = vpop.f32.mrb[21].mxu1 }
 0x13f   :  { %v1001_v26 = vadd.f32 %v2552_v19, %v1000_v24  ;;  %v1002_v27 = vpop.f32.mrb[23].mxu0  ;;  %v2558_v28 = vpop.f32.mrb[22].mxu1  ;;  %v2560_v29 = vadd.f32 %v1174_v63, %v998_v21 }
 0x140   :  { %v1219_v30 = vpop.f32.mrb[23].mxu1 }
 0x141   :  { %v2562_v31 = vadd.f32 %v1177_v2, %v1001_v26 }
 0x144   :  { %v1005_v32 = vpop.f32.mrb[24].mxu0 }
 0x145   :  { %v1006_v33 = vadd.f32 %v2552_v19, %v1005_v32  ;;  %v1007_v34 = vpop.f32.mrb[25].mxu0  ;;  %v2565_v35 = vpop.f32.mrb[24].mxu1 }
 0x146   :  { %v1008_v36 = vpop.f32.mrb[26].mxu0  ;;  %v1224_v37 = vpop.f32.mrb[25].mxu1 }
 0x147   :  { %v1009_v38 = vadd.f32 %v2552_v19, %v1008_v36  ;;  %v1010_v39 = vpop.f32.mrb[27].mxu0  ;;  %v2568_v40 = vpop.f32.mrb[26].mxu1  ;;  %v2570_v41 = vadd.f32 %v1182_v4, %v1006_v33 }
 0x148   :  { %v1227_v42 = vpop.f32.mrb[27].mxu1 }
 0x149   :  { %v2572_v43 = vadd.f32 %v1185_v6, %v1009_v38 }
 0x14c   :  { %v1013_v44 = vpop.f32.mrb[28].mxu0 }
 0x14d   :  { %v1014_v45 = vadd.f32 %v2552_v19, %v1013_v44  ;;  %v1015_v46 = vpop.f32.mrb[29].mxu0  ;;  %v2575_v47 = vpop.f32.mrb[28].mxu1 }
 0x14e   :  { %v1016_v48 = vpop.f32.mrb[30].mxu0  ;;  %v1232_v49 = vpop.f32.mrb[29].mxu1 }
 0x14f   :  { %v1017_v50 = vadd.f32 %v2552_v19, %v1016_v48  ;;  %v1018_v51 = vpop.f32.mrb[31].mxu0  ;;  %v2578_v52 = vpop.f32.mrb[30].mxu1  ;;  %v2580_v53 = vadd.f32 %v1190_v8, %v1014_v45 }
 0x150   :  { %v1235_v54 = vpop.f32.mrb[31].mxu1 }
 0x151   :  { %v2582_v55 = vadd.f32 %v1193_v10, %v1017_v50 }
 0x154   :  { %v1021_v56 = vpop.f32.mrb[32].mxu0 }
 0x155   :  { %v1022_v57 = vadd.f32 %v2552_v19, %v1021_v56  ;;  %v1023_v58 = vpop.f32.mrb[33].mxu0  ;;  %v2585_v59 = vpop.f32.mrb[32].mxu1 }
 0x156   :  { %v1024_v60 = vpop.f32.mrb[34].mxu0  ;;  %v1240_v61 = vpop.f32.mrb[33].mxu1 }
 0x157   :  { %v1025_v62 = vadd.f32 %v2552_v19, %v1024_v60  ;;  %v1026_v63 = vpop.f32.mrb[35].mxu0  ;;  %v2588_v1 = vpop.f32.mrb[34].mxu1  ;;  %v2590_v2 = vadd.f32 %v1198_v0, %v1022_v57 }
 0x158   :  { %v1243_v3 = vpop.f32.mrb[35].mxu1 }
 0x159   :  { %v2592_v4 = vadd.f32 %v1201_v13, %v1025_v62 }
 0x15c   :  { %v1029_v5 = vpop.f32.mrb[36].mxu0 }
 0x15d   :  { %v1030_v6 = vadd.f32 %v2552_v19, %v1029_v5  ;;  %v1031_v7 = vpop.f32.mrb[37].mxu0  ;;  %v2595_v8 = vpop.f32.mrb[36].mxu1 }
 0x15e   :  { %v1032_v9 = vpop.f32.mrb[38].mxu0  ;;  %v1248_v10 = vpop.f32.mrb[37].mxu1 }
 0x15f   :  { %v1033_v11 = vadd.f32 %v2552_v19, %v1032_v9  ;;  %v1034_v12 = vpop.f32.mrb[39].mxu0  ;;  %v2598_v14 = vpop.f32.mrb[38].mxu1  ;;  %v2601_v16 = vadd.f32 %v2547_v15, %v1030_v6 }
 0x160   :  { %v1251_v0 = vpop.f32.mrb[39].mxu1 }
 0x161   :  { %v2603_v18 = vadd.f32 %v1209_v17, %v1033_v11 }
 0x164   :  { %v1037_v13 = vpop.f32.mrb[40].mxu0 }
 0x165   :  { %v1038_v20 = vadd.f32 %v2552_v19, %v1037_v13  ;;  %v1039_v21 = vpop.f32.mrb[41].mxu0  ;;  %v2606_v22 = vpop.f32.mrb[40].mxu1 }
 0x166   :  { %v1040_v24 = vpop.f32.mrb[42].mxu0  ;;  %v1256_v25 = vpop.f32.mrb[41].mxu1 }
 0x167   :  { %v1041_v26 = vadd.f32 %v2552_v19, %v1040_v24  ;;  %v1042_v27 = vpop.f32.mrb[43].mxu0  ;;  %v2609_v30 = vpop.f32.mrb[42].mxu1  ;;  %v2612_v32 = vadd.f32 %v2555_v23, %v1038_v20 }
 0x168   :  { %v1259_v15 = vpop.f32.mrb[43].mxu1 }
 0x169   :  { %v2615_v17 = vadd.f32 %v2558_v28, %v1041_v26 }
 0x16c   :  { %v1045_v33 = vpop.f32.mrb[44].mxu0 }
 0x16d   :  { %v1046_v34 = vadd.f32 %v2552_v19, %v1045_v33  ;;  %v1047_v36 = vpop.f32.mrb[45].mxu0  ;;  %v2618_v37 = vpop.f32.mrb[44].mxu1 }
 0x16e   :  { %v1048_v38 = vpop.f32.mrb[46].mxu0  ;;  %v1264_v39 = vpop.f32.mrb[45].mxu1 }
 0x16f   :  { %v1049_v42 = vadd.f32 %v2552_v19, %v1048_v38  ;;  %v1050_v44 = vpop.f32.mrb[47].mxu0  ;;  %v2621_v45 = vpop.f32.mrb[46].mxu1  ;;  %v2624_v23 = vadd.f32 %v2565_v35, %v1046_v34 }
 0x170   :  { %v1267_v46 = vpop.f32.mrb[47].mxu1 }
 0x171   :  { %v2627_v28 = vadd.f32 %v2568_v40, %v1049_v42 }
 0x174   :  { %v1053_v48 = vpop.f32.mrb[48].mxu0 }
 0x175   :  { %v1054_v49 = vadd.f32 %v2552_v19, %v1053_v48  ;;  %v1055_v50 = vpop.f32.mrb[49].mxu0  ;;  %v2630_v51 = vpop.f32.mrb[48].mxu1 }
 0x176   :  { %v1056_v54 = vpop.f32.mrb[50].mxu0  ;;  %v1272_v56 = vpop.f32.mrb[49].mxu1 }
 0x177   :  { %v1057_v57 = vadd.f32 %v2552_v19, %v1056_v54  ;;  %v1058_v58 = vpop.f32.mrb[51].mxu0  ;;  %v2633_v60 = vpop.f32.mrb[50].mxu1  ;;  %v2636_v35 = vadd.f32 %v2575_v47, %v1054_v49 }
 0x178   :  { %v1275_v61 = vpop.f32.mrb[51].mxu1 }
 0x179   :  { %v2639_v40 = vadd.f32 %v2578_v52, %v1057_v57 }
 0x17c   :  { %v1061_v62 = vpop.f32.mrb[52].mxu0 }
 0x17d   :  { %v1062_v63 = vadd.f32 %v2552_v19, %v1061_v62  ;;  %v1063_v3 = vpop.f32.mrb[53].mxu0  ;;  %v2642_v5 = vpop.f32.mrb[52].mxu1 }
 0x17e   :  { %v1064_v6 = vpop.f32.mrb[54].mxu0  ;;  %v2644_v7 = vpop.f32.mrb[53].mxu1 }
 0x17f   :  { %v1065_v9 = vadd.f32 %v2552_v19, %v1064_v6  ;;  %v1066_v10 = vpop.f32.mrb[55].mxu0  ;;  %v2647_v11 = vpop.f32.mrb[54].mxu1  ;;  %v2650_v47 = vadd.f32 %v2585_v59, %v1062_v63 }
 0x180   :  { %v2652_v12 = vpop.f32.mrb[55].mxu1 }
 0x181   :  { %v2655_v52 = vadd.f32 %v2588_v1, %v1065_v9 }
 0x184   :  { %v1069_v0 = vpop.f32.mrb[56].mxu0 }
 0x185   :  { %v1070_v13 = vadd.f32 %v2552_v19, %v1069_v0  ;;  %v1071_v20 = vpop.f32.mrb[57].mxu0  ;;  %v2658_v21 = vpop.f32.mrb[56].mxu1 }
 0x186   :  { %v1072_v24 = vpop.f32.mrb[58].mxu0  ;;  %v2660_v25 = vpop.f32.mrb[57].mxu1 }
 0x187   :  { %v1073_v26 = vadd.f32 %v2552_v19, %v1072_v24  ;;  %v1074_v27 = vpop.f32.mrb[59].mxu0  ;;  %v2663_v15 = vpop.f32.mrb[58].mxu1  ;;  %v2666_v59 = vadd.f32 %v2595_v8, %v1070_v13 }
 0x188   :  { %v2668_v33 = vpop.f32.mrb[59].mxu1 }
 0x189   :  { %v2671_v1 = vadd.f32 %v2598_v14, %v1073_v26 }
 0x18c   :  { %v1077_v34 = vpop.f32.mrb[60].mxu0 }
 0x18d   :  { %v1078_v36 = vadd.f32 %v2552_v19, %v1077_v34  ;;  %v1715_v38 = vpop.f32.mrb[60].mxu1  ;;  %v1079_v39 = vpop.f32.mrb[61].mxu0 }
 0x18e   :  { %v1352_v42 = vadd.f32 %v1715_v38, %v2560_v29  ;;  %v2675_v44 = vpop.f32.mrb[61].mxu1  ;;  %v1080_v46 = vpop.f32.mrb[62].mxu0 }
 0x18f   :  { %v1081_v48 = vadd.f32 %v2552_v19, %v1080_v46  ;;  %v1716_v49 = vpop.f32.mrb[62].mxu1  ;;  %v1082_v8 = vpop.f32.mrb[63].mxu0  ;;  %v2679_v50 = vadd.f32 %v2606_v22, %v1078_v36 }
 0x190   :  { %v1464_v54 = vmax.f32 %v1352_v42, 0.0  ;;  %v1355_v14 = vadd.f32 %v1716_v49, %v2562_v31  ;;  %v2682_v56 = vpop.f32.mrb[63].mxu1 }
 0x191   :  { %v2685_v57 = vadd.f32 %v2609_v30, %v1081_v48 }
 0x192   :  { %1500 = vst [vmem:[%s2858_s3 + $0x50] sm:$0xff] %v1464_v54  ;;  %v1465_v29 = vmax.f32 %v1355_v14, 0.0 }
 0x194   :  { %1501 = vst [vmem:[%s2858_s3 + $0x58] sm:$0xff] %v1465_v29  ;;  %v1085_v58 = vpop.f32.mrb[64].mxu0 }
 0x195   :  { %v1086_v22 = vadd.f32 %v2552_v19, %v1085_v58  ;;  %v1719_v61 = vpop.f32.mrb[64].mxu1  ;;  %v1087_v62 = vpop.f32.mrb[65].mxu0 }
 0x196   :  { %v1368_v31 = vadd.f32 %v1719_v61, %v2580_v53  ;;  %v1359_v63 = vpop.f32.mrb[65].mxu1  ;;  %v1088_v3 = vpop.f32.mrb[66].mxu0 }
 0x197   :  { %v1360_v30 = vadd.f32 %v1359_v63, %v2570_v41  ;;  %v1089_v6 = vadd.f32 %v2552_v19, %v1088_v3  ;;  %v1720_v9 = vpop.f32.mrb[66].mxu1  ;;  %v1090_v10 = vpop.f32.mrb[67].mxu0  ;;  %v2698_v0 = vadd.f32 %v2618_v37, %v1086_v22 }
 0x198   :  { %v1468_v13 = vmax.f32 %v1368_v31, 0.0  ;;  %v1371_v20 = vadd.f32 %v1720_v9, %v2582_v55  ;;  %v1362_v24 = vpop.f32.mrb[67].mxu1 }
 0x199   :  { %v1466_v26 = vmax.f32 %v1360_v30, 0.0  ;;  %v1363_v27 = vadd.f32 %v1362_v24, %v2572_v43  ;;  %v2703_v53 = vadd.f32 %v2621_v45, %v1089_v6 }
 0x19a   :  { %1504 = vst [vmem:[%s2858_s3 + $0x70] sm:$0xff] %v1468_v13  ;;  %v1469_v41 = vmax.f32 %v1371_v20, 0.0 }
 0x19b   :  { %1502 = vst [vmem:[%s2858_s3 + $0x60] sm:$0xff] %v1466_v26  ;;  %v1467_v37 = vmax.f32 %v1363_v27, 0.0 }
 0x19c   :  { %1505 = vst [vmem:[%s2858_s3 + $0x78] sm:$0xff] %v1469_v41  ;;  %v1093_v55 = vpop.f32.mrb[68].mxu0 }
 0x19d   :  { %1503 = vst [vmem:[%s2858_s3 + $0x68] sm:$0xff] %v1467_v37  ;;  %v1094_v43 = vadd.f32 %v2552_v19, %v1093_v55  ;;  %v1723_v45 = vpop.f32.mrb[68].mxu1  ;;  %v1095_v34 = vpop.f32.mrb[69].mxu0 }
 0x19e   :  { %v1384_v36 = vadd.f32 %v1723_v45, %v2601_v16  ;;  %v1375_v38 = vpop.f32.mrb[69].mxu1  ;;  %v1096_v39 = vpop.f32.mrb[70].mxu0 }
 0x19f   :  { %v1376_v42 = vadd.f32 %v1375_v38, %v2590_v2  ;;  %v1097_v46 = vadd.f32 %v2552_v19, %v1096_v39  ;;  %v1724_v48 = vpop.f32.mrb[70].mxu1  ;;  %v1098_v49 = vpop.f32.mrb[71].mxu0  ;;  %v2722_v8 = vadd.f32 %v2630_v51, %v1094_v43 }
 0x1a0   :  { %v1472_v54 = vmax.f32 %v1384_v36, 0.0  ;;  %v1387_v14 = vadd.f32 %v1724_v48, %v2603_v18  ;;  %v1378_v29 = vpop.f32.mrb[71].mxu1 }
 0x1a1   :  { %v1470_v58 = vmax.f32 %v1376_v42, 0.0  ;;  %v1379_v22 = vadd.f32 %v1378_v29, %v2592_v4  ;;  %v2727_v16 = vadd.f32 %v2633_v60, %v1097_v46 }
 0x1a2   :  { %1508 = vst [vmem:[%s2858_s3 + $0x90] sm:$0xff] %v1472_v54  ;;  %v1473_v2 = vmax.f32 %v1387_v14, 0.0 }
 0x1a3   :  { %1506 = vst [vmem:[%s2858_s3 + $0x80] sm:$0xff] %v1470_v58  ;;  %v1471_v51 = vmax.f32 %v1379_v22, 0.0 }
 0x1a4   :  { %1509 = vst [vmem:[%s2858_s3 + $0x98] sm:$0xff] %v1473_v2  ;;  %v1134_v18 = vpop.f32.mrb[0].mxu0 }
 0x1a5   :  { %1507 = vst [vmem:[%s2858_s3 + $0x88] sm:$0xff] %v1471_v51  ;;  %v1773_v4 = vadd.f32 %v2552_v19, %v1134_v18  ;;  %v1727_v60 = vpop.f32.mrb[72].mxu1  ;;  %v1136_v61 = vpop.f32.mrb[1].mxu0 }
 0x1a6   :  { %v1400_v62 = vadd.f32 %v1727_v60, %v2624_v23  ;;  %v1391_v31 = vpop.f32.mrb[73].mxu1  ;;  %v1137_v63 = vpop.f32.mrb[2].mxu0 }
 0x1a7   :  { %v1312_v3 = vadd.f32 %v1773_v4, %v2644_v7  ;;  %v1392_v30 = vadd.f32 %v1391_v31, %v2612_v32  ;;  %v1774_v6 = vadd.f32 %v2552_v19, %v1137_v63  ;;  %v1728_v9 = vpop.f32.mrb[74].mxu1  ;;  %v1139_v10 = vpop.f32.mrb[3].mxu0 }
 0x1a8   :  { %v1476_v13 = vmax.f32 %v1400_v62, 0.0  ;;  %v1403_v20 = vadd.f32 %v1728_v9, %v2627_v28  ;;  %v1394_v24 = vpop.f32.mrb[75].mxu1 }
 0x1a9   :  { %v1454_v26 = vmax.f32 %v1312_v3, 0.0  ;;  %v1474_v27 = vmax.f32 %v1392_v30, 0.0  ;;  %v1315_v41 = vadd.f32 %v1774_v6, %v2652_v12  ;;  %v1395_v23 = vadd.f32 %v1394_v24, %v2615_v17 }
 0x1aa   :  { %1512 = vst [vmem:[%s2858_s3 + $0xb0] sm:$0xff] %v1476_v13  ;;  %v1477_v7 = vmax.f32 %v1403_v20, 0.0 }
 0x1ab   :  { %1490 = vst [vmem:[%s2858_s3] sm:$0xff] %v1454_v26  ;;  %1510 = vst [vmem:[%s2858_s3 + $0xa0] sm:$0xff] %v1474_v27  ;;  %v1455_v32 = vmax.f32 %v1315_v41, 0.0  ;;  %v1475_v28 = vmax.f32 %v1395_v23, 0.0 }
 0x1ac   :  { %1513 = vst [vmem:[%s2858_s3 + $0xb8] sm:$0xff] %v1477_v7  ;;  %v1142_v17 = vpop.f32.mrb[4].mxu0 }
 0x1ad   :  { %1491 = vst [vmem:[%s2858_s3 + $0x8] sm:$0xff] %v1455_v32  ;;  %1511 = vst [vmem:[%s2858_s3 + $0xa8] sm:$0xff] %v1475_v28  ;;  %v1775_v12 = vadd.f32 %v2552_v19, %v1142_v17  ;;  %v1731_v37 = vpop.f32.mrb[76].mxu1  ;;  %v1144_v55 = vpop.f32.mrb[5].mxu0 }
 0x1ae   :  { %v1416_v43 = vadd.f32 %v1731_v37, %v2650_v47  ;;  %v1407_v45 = vpop.f32.mrb[77].mxu1  ;;  %v1145_v34 = vpop.f32.mrb[6].mxu0 }
 0x1af   :  { %v1320_v36 = vadd.f32 %v1775_v12, %v2642_v5  ;;  %v1408_v38 = vadd.f32 %v1407_v45, %v2636_v35  ;;  %v1776_v39 = vadd.f32 %v2552_v19, %v1145_v34  ;;  %v1732_v42 = vpop.f32.mrb[78].mxu1  ;;  %v1147_v46 = vpop.f32.mrb[7].mxu0 }
 0x1b0   :  { %v1480_v48 = vmax.f32 %v1416_v43, 0.0  ;;  %v1419_v49 = vadd.f32 %v1732_v42, %v2655_v52  ;;  %v1410_v54 = vpop.f32.mrb[79].mxu1 }
 0x1b1   :  { %v1456_v14 = vmax.f32 %v1320_v36, 0.0  ;;  %v1478_v29 = vmax.f32 %v1408_v38, 0.0  ;;  %v1323_v58 = vadd.f32 %v1776_v39, %v2647_v11  ;;  %v1411_v47 = vadd.f32 %v1410_v54, %v2639_v40 }
 0x1b2   :  { %1516 = vst [vmem:[%s2858_s3 + $0xd0] sm:$0xff] %v1480_v48  ;;  %v1481_v5 = vmax.f32 %v1419_v49, 0.0 }
 0x1b3   :  { %1492 = vst [vmem:[%s2858_s3 + $0x10] sm:$0xff] %v1456_v14  ;;  %1514 = vst [vmem:[%s2858_s3 + $0xc0] sm:$0xff] %v1478_v29  ;;  %v1457_v35 = vmax.f32 %v1323_v58, 0.0  ;;  %v1479_v52 = vmax.f32 %v1411_v47, 0.0 }
 0x1b4   :  { %1517 = vst [vmem:[%s2858_s3 + $0xd8] sm:$0xff] %v1481_v5  ;;  %v1150_v40 = vpop.f32.mrb[8].mxu0 }
 0x1b5   :  { %1493 = vst [vmem:[%s2858_s3 + $0x18] sm:$0xff] %v1457_v35  ;;  %1515 = vst [vmem:[%s2858_s3 + $0xc8] sm:$0xff] %v1479_v52  ;;  %v1777_v11 = vadd.f32 %v2552_v19, %v1150_v40  ;;  %v1735_v22 = vpop.f32.mrb[80].mxu1  ;;  %v1152_v2 = vpop.f32.mrb[9].mxu0 }
 0x1b6   :  { %v1432_v51 = vadd.f32 %v1735_v22, %v2679_v50  ;;  %v1423_v18 = vpop.f32.mrb[81].mxu1  ;;  %v1153_v4 = vpop.f32.mrb[10].mxu0 }
 0x1b7   :  { %v1328_v60 = vadd.f32 %v1777_v11, %v2660_v25  ;;  %v1424_v61 = vadd.f32 %v1423_v18, %v2666_v59  ;;  %v1778_v62 = vadd.f32 %v2552_v19, %v1153_v4  ;;  %v1736_v31 = vpop.f32.mrb[82].mxu1  ;;  %v1155_v63 = vpop.f32.mrb[11].mxu0 }
 0x1b8   :  { %v1484_v3 = vmax.f32 %v1432_v51, 0.0  ;;  %v1435_v30 = vadd.f32 %v1736_v31, %v2685_v57  ;;  %v1426_v6 = vpop.f32.mrb[83].mxu1 }
 0x1b9   :  { %v1458_v9 = vmax.f32 %v1328_v60, 0.0  ;;  %v1482_v10 = vmax.f32 %v1424_v61, 0.0  ;;  %v1331_v13 = vadd.f32 %v1778_v62, %v2668_v33  ;;  %v1427_v50 = vadd.f32 %v1426_v6, %v2671_v1 }
 0x1ba   :  { %1520 = vst [vmem:[%s2858_s3 + $0xf0] sm:$0xff] %v1484_v3  ;;  %v1485_v25 = vmax.f32 %v1435_v30, 0.0 }
 0x1bb   :  { %1494 = vst [vmem:[%s2858_s3 + $0x20] sm:$0xff] %v1458_v9  ;;  %1518 = vst [vmem:[%s2858_s3 + $0xe0] sm:$0xff] %v1482_v10  ;;  %v1459_v59 = vmax.f32 %v1331_v13, 0.0  ;;  %v1483_v57 = vmax.f32 %v1427_v50, 0.0 }
 0x1bc   :  { %1521 = vst [vmem:[%s2858_s3 + $0xf8] sm:$0xff] %v1485_v25  ;;  %v1158_v33 = vpop.f32.mrb[12].mxu0 }
 0x1bd   :  { %1495 = vst [vmem:[%s2858_s3 + $0x28] sm:$0xff] %v1459_v59  ;;  %1519 = vst [vmem:[%s2858_s3 + $0xe8] sm:$0xff] %v1483_v57  ;;  %v1779_v1 = vadd.f32 %v2552_v19, %v1158_v33  ;;  %v1739_v20 = vpop.f32.mrb[84].mxu1  ;;  %v1160_v24 = vpop.f32.mrb[13].mxu0 }
 0x1be   :  { %v1448_v26 = vadd.f32 %v1739_v20, %v2722_v8  ;;  %v1439_v27 = vpop.f32.mrb[85].mxu1  ;;  %v1161_v41 = vpop.f32.mrb[14].mxu0 }
 0x1bf   :  { %v1336_v23 = vadd.f32 %v1779_v1, %v2658_v21  ;;  %v1440_v7 = vadd.f32 %v1439_v27, %v2698_v0  ;;  %v1780_v32 = vadd.f32 %v2552_v19, %v1161_v41  ;;  %v1740_v28 = vpop.f32.mrb[86].mxu1  ;;  %v1163_v17 = vpop.f32.mrb[15].mxu0 }
 0x1c0   :  { %v1488_v12 = vmax.f32 %v1448_v26, 0.0  ;;  %v1451_v37 = vadd.f32 %v1740_v28, %v2727_v16  ;;  %v1442_v55 = vpop.f32.mrb[87].mxu1 }
 0x1c1   :  { %v1460_v43 = vmax.f32 %v1336_v23, 0.0  ;;  %v1486_v45 = vmax.f32 %v1440_v7, 0.0  ;;  %v1339_v34 = vadd.f32 %v1780_v32, %v2663_v15  ;;  %v1443_v8 = vadd.f32 %v1442_v55, %v2703_v53 }
 0x1c2   :  { %1524 = vst [vmem:[%s2858_s3 + $0x110] sm:$0xff] %v1488_v12  ;;  %v1489_v21 = vmax.f32 %v1451_v37, 0.0 }
 0x1c3   :  { %1496 = vst [vmem:[%s2858_s3 + $0x30] sm:$0xff] %v1460_v43  ;;  %1522 = vst [vmem:[%s2858_s3 + $0x100] sm:$0xff] %v1486_v45  ;;  %v1461_v0 = vmax.f32 %v1339_v34, 0.0  ;;  %v1487_v16 = vmax.f32 %v1443_v8, 0.0 }
 0x1c4   :  { %1525 = vst [vmem:[%s2858_s3 + $0x118] sm:$0xff] %v1489_v21  ;;  %v1166_v15 = vpop.f32.mrb[16].mxu0 }
 0x1c5   :  { %1497 = vst [vmem:[%s2858_s3 + $0x38] sm:$0xff] %v1461_v0  ;;  %1523 = vst [vmem:[%s2858_s3 + $0x108] sm:$0xff] %v1487_v16  ;;  %v1781_v53 = vadd.f32 %v2552_v19, %v1166_v15  ;;  %v1168_v36 = vpop.f32.mrb[17].mxu0 }
 0x1c6   :  { %v1169_v38 = vpop.f32.mrb[18].mxu0 }
 0x1c7   :  { %v1344_v39 = vadd.f32 %v1781_v53, %v2675_v44  ;;  %v1782_v42 = vadd.f32 %v2552_v19, %v1169_v38  ;;  %v1171_v46 = vpop.f32.mrb[19].mxu0 }
 0x1c9   :  { %v1462_v48 = vmax.f32 %v1344_v39, 0.0  ;;  %v1347_v49 = vadd.f32 %v1782_v42, %v2682_v56 }
 0x1cb   :  { %1498 = vst [vmem:[%s2858_s3 + $0x40] sm:$0xff] %v1462_v48  ;;  %v1463_v54 = vmax.f32 %v1347_v49, 0.0 }
 0x1cd   :  { %1499 = vst [vmem:[%s2858_s3 + $0x48] sm:$0xff] %v1463_v54 }

// kernel: net_forward.12
= control target key start
LH: loop header
LB: loop body
LE: loop exit
PB: predicated region body
PF: predicated region fallthrough
CT: control target
= control target key end

     0   :  { %s123_s0 = inlined_call_operand.vmem [shape: f32[4,2,2,512], index: 0, kind: input, shape index: {}]   ;;  %s124_s1 = inlined_call_operand.vmem [shape: f32[4,2,256], index: 1, kind: output, shape index: {}]  }
   0x1   :  { %v8_v0 = vld [vmem:[%s123_s0] sm:$0xf]  ;;  %v12_v1 = vld [vmem:[%s123_s0 + $0x4] sm:$0xf]  ;;  %v45_v2 = vld [vmem:[%s123_s0 + $0x8] sm:$0xf] }
   0x2   :  { %v49_v3 = vld [vmem:[%s123_s0 + $0xc] sm:$0xf]  ;;  %v25_v4 = vmax.f32 %v8_v0, %v12_v1  ;;  %v9_v5 = vld [vmem:[%s123_s0 + $0x10] sm:$0xf]  ;;  %v13_v6 = vld [vmem:[%s123_s0 + $0x14] sm:$0xf] }
   0x3   :  { %v29_v7 = vmax.f32 %v45_v2, %v49_v3  ;;  %v46_v8 = vld [vmem:[%s123_s0 + $0x18] sm:$0xf]  ;;  %v50_v9 = vld [vmem:[%s123_s0 + $0x1c] sm:$0xf]  ;;  %v26_v10 = vmax.f32 %v9_v5, %v13_v6  ;;  %v10_v11 = vld [vmem:[%s123_s0 + $0x20] sm:$0xf] }
   0x4   :  { %v30_v12 = vmax.f32 %v46_v8, %v50_v9  ;;  %v14_v13 = vld [vmem:[%s123_s0 + $0x24] sm:$0xf]  ;;  %v47_v14 = vld [vmem:[%s123_s0 + $0x28] sm:$0xf]  ;;  %v51_v15 = vld [vmem:[%s123_s0 + $0x2c] sm:$0xf] }
   0x5   :  { %v33_v16 = vmax.f32 %v25_v4, %v29_v7  ;;  %v27_v17 = vmax.f32 %v10_v11, %v14_v13  ;;  %v31_v18 = vmax.f32 %v47_v14, %v51_v15  ;;  %v11_v19 = vld [vmem:[%s123_s0 + $0x30] sm:$0xf]  ;;  %v15_v20 = vld [vmem:[%s123_s0 + $0x34] sm:$0xf]  ;;  %v48_v21 = vld [vmem:[%s123_s0 + $0x38] sm:$0xf] }
   0x6   :  { %v34_v22 = vmax.f32 %v26_v10, %v30_v12  ;;  %v52_v23 = vld [vmem:[%s123_s0 + $0x3c] sm:$0xf]  ;;  %v28_v24 = vmax.f32 %v11_v19, %v15_v20 }
   0x7   :  { %37 = vst [vmem:[%s124_s1] sm:$0xf] %v33_v16  ;;  %v35_v25 = vmax.f32 %v27_v17, %v31_v18  ;;  %v32_v26 = vmax.f32 %v48_v21, %v52_v23 }
   0x8   :  { %38 = vst [vmem:[%s124_s1 + $0x4] sm:$0xf] %v34_v22 }
   0x9   :  { %39 = vst [vmem:[%s124_s1 + $0x8] sm:$0xf] %v35_v25  ;;  %v36_v27 = vmax.f32 %v28_v24, %v32_v26 }
   0xb   :  { %40 = vst [vmem:[%s124_s1 + $0xc] sm:$0xf] %v36_v27 }

// kernel: net_forward.11
= control target key start
LH: loop header
LB: loop body
LE: loop exit
PB: predicated region body
PF: predicated region fallthrough
CT: control target
= control target key end

     0   :  { %s2283_s1 = inlined_call_operand.vmem [shape: bf16[1152,256], index: 1, kind: input, shape index: {}]   ;;  %s2284_s0 = inlined_call_operand.vmem [shape: bf16[32,1152], index: 0, kind: input, shape index: {}]   ;;  %s2285_s2 = inlined_call_operand.vmem [shape: f32[1,256], index: 2, kind: input, shape index: {}]   ;;  %s2286_s3 = inlined_call_operand.vmem [shape: f32[32,256], index: 3, kind: output, shape index: {}]  }
   0x1   :  { %v1507_v0 = vld [vmem:[%s2283_s1 + $0x4] ss:$8 sps:$4 sm:$0xff]   ;;  %v1511_v2 = vld [vmem:[%s2283_s1] ss:$8 sps:$4 sm:$0xff]   ;;  %v1513_v4 = vld [vmem:[%s2283_s1 + $0x14] ss:$8 sps:$4 sm:$0xff]  }
   0x2   :  { %v1509_v1 = vld [vmem:[%s2283_s1 + $0x204] ss:$8 sps:$4 sm:$0xff]   ;;  %1003 = vmatprep.subr.bf16.mxu1 %v1507_v0  ;;  %v1512_v3 = vld [vmem:[%s2283_s1 + $0x200] ss:$8 sps:$4 sm:$0xff]   ;;  %v1515_v5 = vld [vmem:[%s2283_s1 + $0x214] ss:$8 sps:$4 sm:$0xff]  }
   0x3   :  { %1109 = vmatprep.subr.bf16.mxu0 %v1509_v1  ;;  %1004 = vmatpush1.bf16.msra.mxu1 %v1511_v2  ;;  %v1517_v6 = vld [vmem:[%s2283_s1 + $0x10] ss:$8 sps:$4 sm:$0xff]   ;;  %v1519_v8 = vld [vmem:[%s2283_s1 + $0x24] ss:$8 sps:$4 sm:$0xff]   ;;  %v1523_v10 = vld [vmem:[%s2283_s1 + $0x20] ss:$8 sps:$4 sm:$0xff]  }
   0x4   :  { %1110 = vmatpush1.bf16.msra.mxu0 %v1512_v3  ;;  %1005 = vmatprep.subr.bf16.mxu1 %v1513_v4  ;;  %v1518_v7 = vld [vmem:[%s2283_s1 + $0x210] ss:$8 sps:$4 sm:$0xff]   ;;  %v1521_v9 = vld [vmem:[%s2283_s1 + $0x224] ss:$8 sps:$4 sm:$0xff]   ;;  %v1524_v11 = vld [vmem:[%s2283_s1 + $0x220] ss:$8 sps:$4 sm:$0xff]  }
   0x5   :  { %1111 = vmatprep.subr.bf16.mxu0 %v1515_v5  ;;  %v1525_v12 = vld [vmem:[%s2283_s1 + $0x34] ss:$8 sps:$4 sm:$0xff]   ;;  %v1529_v14 = vld [vmem:[%s2283_s1 + $0x30] ss:$8 sps:$4 sm:$0xff]   ;;  %v1531_v16 = vld [vmem:[%s2283_s1 + $0x44] ss:$8 sps:$4 sm:$0xff]  }
   0x6   :  { %v1527_v13 = vld [vmem:[%s2283_s1 + $0x234] ss:$8 sps:$4 sm:$0xff]   ;;  %v1530_v15 = vld [vmem:[%s2283_s1 + $0x230] ss:$8 sps:$4 sm:$0xff]   ;;  %v1533_v17 = vld [vmem:[%s2283_s1 + $0x244] ss:$8 sps:$4 sm:$0xff]  }
   0x7   :  { %1006 = vmatpush1.bf16.msra.mxu1 %v1517_v6  ;;  %v1535_v18 = vld [vmem:[%s2283_s1 + $0x40] ss:$8 sps:$4 sm:$0xff]   ;;  %v1537_v20 = vld [vmem:[%s2283_s1 + $0x54] ss:$8 sps:$4 sm:$0xff]   ;;  %v1541_v22 = vld [vmem:[%s2283_s1 + $0x50] ss:$8 sps:$4 sm:$0xff]  }
   0x8   :  { %1112 = vmatpush1.bf16.msra.mxu0 %v1518_v7  ;;  %1007 = vmatprep.subr.bf16.mxu1 %v1519_v8  ;;  %v1536_v19 = vld [vmem:[%s2283_s1 + $0x240] ss:$8 sps:$4 sm:$0xff]   ;;  %v1539_v21 = vld [vmem:[%s2283_s1 + $0x254] ss:$8 sps:$4 sm:$0xff]   ;;  %v1542_v23 = vld [vmem:[%s2283_s1 + $0x250] ss:$8 sps:$4 sm:$0xff]  }
   0x9   :  { %1113 = vmatprep.subr.bf16.mxu0 %v1521_v9  ;;  %v1543_v24 = vld [vmem:[%s2283_s1 + $0x64] ss:$8 sps:$4 sm:$0xff]   ;;  %v1547_v26 = vld [vmem:[%s2283_s1 + $0x60] ss:$8 sps:$4 sm:$0xff]   ;;  %v1549_v28 = vld [vmem:[%s2283_s1 + $0x74] ss:$8 sps:$4 sm:$0xff]  }
   0xa   :  { %v1545_v25 = vld [vmem:[%s2283_s1 + $0x264] ss:$8 sps:$4 sm:$0xff]   ;;  %v1548_v27 = vld [vmem:[%s2283_s1 + $0x260] ss:$8 sps:$4 sm:$0xff]   ;;  %v1551_v29 = vld [vmem:[%s2283_s1 + $0x274] ss:$8 sps:$4 sm:$0xff]  }
   0xb   :  { %1008 = vmatpush1.bf16.msra.mxu1 %v1523_v10  ;;  %v1553_v30 = vld [vmem:[%s2283_s1 + $0x70] ss:$8 sps:$4 sm:$0xff]   ;;  %v1555_v32 = vld [vmem:[%s2283_s1 + $0x84] ss:$8 sps:$4 sm:$0xff]   ;;  %v1559_v34 = vld [vmem:[%s2283_s1 + $0x80] ss:$8 sps:$4 sm:$0xff]  }
   0xc   :  { %1114 = vmatpush1.bf16.msra.mxu0 %v1524_v11  ;;  %1009 = vmatprep.subr.bf16.mxu1 %v1525_v12  ;;  %v1554_v31 = vld [vmem:[%s2283_s1 + $0x270] ss:$8 sps:$4 sm:$0xff]   ;;  %v1557_v33 = vld [vmem:[%s2283_s1 + $0x284] ss:$8 sps:$4 sm:$0xff]   ;;  %v1560_v35 = vld [vmem:[%s2283_s1 + $0x280] ss:$8 sps:$4 sm:$0xff]  }
   0xd   :  { %1115 = vmatprep.subr.bf16.mxu0 %v1527_v13  ;;  %v1561_v36 = vld [vmem:[%s2283_s1 + $0x94] ss:$8 sps:$4 sm:$0xff]   ;;  %v1565_v38 = vld [vmem:[%s2283_s1 + $0x90] ss:$8 sps:$4 sm:$0xff]   ;;  %v1567_v40 = vld [vmem:[%s2283_s1 + $0xa4] ss:$8 sps:$4 sm:$0xff]  }
   0xe   :  { %v1563_v37 = vld [vmem:[%s2283_s1 + $0x294] ss:$8 sps:$4 sm:$0xff]   ;;  %v1566_v39 = vld [vmem:[%s2283_s1 + $0x290] ss:$8 sps:$4 sm:$0xff]   ;;  %v1569_v41 = vld [vmem:[%s2283_s1 + $0x2a4] ss:$8 sps:$4 sm:$0xff]  }
   0xf   :  { %1010 = vmatpush1.bf16.msra.mxu1 %v1529_v14  ;;  %v1571_v42 = vld [vmem:[%s2283_s1 + $0xa0] ss:$8 sps:$4 sm:$0xff]   ;;  %v1573_v44 = vld [vmem:[%s2283_s1 + $0xb4] ss:$8 sps:$4 sm:$0xff]   ;;  %v1577_v46 = vld [vmem:[%s2283_s1 + $0xb0] ss:$8 sps:$4 sm:$0xff]  }
  0x10   :  { %1116 = vmatpush1.bf16.msra.mxu0 %v1530_v15  ;;  %1011 = vmatprep.subr.bf16.mxu1 %v1531_v16  ;;  %v1572_v43 = vld [vmem:[%s2283_s1 + $0x2a0] ss:$8 sps:$4 sm:$0xff]   ;;  %v1575_v45 = vld [vmem:[%s2283_s1 + $0x2b4] ss:$8 sps:$4 sm:$0xff]   ;;  %v1578_v47 = vld [vmem:[%s2283_s1 + $0x2b0] ss:$8 sps:$4 sm:$0xff]  }
  0x11   :  { %1117 = vmatprep.subr.bf16.mxu0 %v1533_v17  ;;  %v1605_v48 = vld [vmem:[%s2284_s0 + $0x4] ss:$36 sps:$4 sm:$0xff]   ;;  %v1611_v51 = vld [vmem:[%s2284_s0 + $0x14] ss:$36 sps:$4 sm:$0xff]  }
  0x12   :  { %v1579_v49 = vld [vmem:[%s2283_s1 + $0xc4] ss:$8 sps:$4 sm:$0xff]   ;;  %1035 = vmatprep.mubr.bf16.mxu1 %v1605_v48  ;;  %v1583_v52 = vld [vmem:[%s2283_s1 + $0xc0] ss:$8 sps:$4 sm:$0xff]   ;;  %v1585_v54 = vld [vmem:[%s2283_s1 + $0xd4] ss:$8 sps:$4 sm:$0xff]   ;;  %1141 = vmatprep.mubr.bf16.mxu0 %v1611_v51 }
  0x13   :  { %1012 = vmatpush1.bf16.msra.mxu1 %v1535_v18  ;;  %v1581_v50 = vld [vmem:[%s2283_s1 + $0x2c4] ss:$8 sps:$4 sm:$0xff]   ;;  %v1584_v53 = vld [vmem:[%s2283_s1 + $0x2c0] ss:$8 sps:$4 sm:$0xff]   ;;  %v1587_v55 = vld [vmem:[%s2283_s1 + $0x2d4] ss:$8 sps:$4 sm:$0xff]  }
  0x14   :  { %1118 = vmatpush1.bf16.msra.mxu0 %v1536_v19  ;;  %1013 = vmatprep.subr.bf16.mxu1 %v1537_v20  ;;  %v1589_v56 = vld [vmem:[%s2283_s1 + $0xd0] ss:$8 sps:$4 sm:$0xff]   ;;  %v1591_v58 = vld [vmem:[%s2283_s1 + $0xe4] ss:$8 sps:$4 sm:$0xff]   ;;  %v1595_v60 = vld [vmem:[%s2283_s1 + $0xe0] ss:$8 sps:$4 sm:$0xff]  }
  0x15   :  { %1119 = vmatprep.subr.bf16.mxu0 %v1539_v21  ;;  %v1590_v57 = vld [vmem:[%s2283_s1 + $0x2d0] ss:$8 sps:$4 sm:$0xff]   ;;  %v1593_v59 = vld [vmem:[%s2283_s1 + $0x2e4] ss:$8 sps:$4 sm:$0xff]   ;;  %v1596_v61 = vld [vmem:[%s2283_s1 + $0x2e0] ss:$8 sps:$4 sm:$0xff]  }
  0x16   :  { %v1597_v62 = vld [vmem:[%s2283_s1 + $0xf4] ss:$8 sps:$4 sm:$0xff]   ;;  %v1601_v0 = vld [vmem:[%s2283_s1 + $0xf0] ss:$8 sps:$4 sm:$0xff]   ;;  %v1608_v2 = vld [vmem:[%s2283_s1 + $0x104] ss:$8 sps:$4 sm:$0xff]  }
  0x17   :  { %1014 = vmatpush1.bf16.msra.mxu1 %v1541_v22  ;;  %v1599_v63 = vld [vmem:[%s2283_s1 + $0x2f4] ss:$8 sps:$4 sm:$0xff]   ;;  %v1602_v1 = vld [vmem:[%s2283_s1 + $0x2f0] ss:$8 sps:$4 sm:$0xff]   ;;  %v1614_v3 = vld [vmem:[%s2283_s1 + $0x304] ss:$8 sps:$4 sm:$0xff]  }
  0x18   :  { %1120 = vmatpush1.bf16.msra.mxu0 %v1542_v23  ;;  %1015 = vmatprep.subr.bf16.mxu1 %v1543_v24  ;;  %v1603_v4 = vld [vmem:[%s2284_s0] ss:$36 sps:$4 sm:$0xff]   ;;  %v1609_v6 = vld [vmem:[%s2284_s0 + $0x10] ss:$36 sps:$4 sm:$0xff]  }
  0x19   :  { %1121 = vmatprep.subr.bf16.mxu0 %v1545_v25  ;;  %v1606_v5 = vld [vmem:[%s2283_s1 + $0x100] ss:$8 sps:$4 sm:$0xff]   ;;  %v1617_v8 = vld [vmem:[%s2283_s1 + $0x114] ss:$8 sps:$4 sm:$0xff]   ;;  %v1615_v10 = vld [vmem:[%s2283_s1 + $0x110] ss:$8 sps:$4 sm:$0xff]  }
  0x1a   :  { %v1612_v7 = vld [vmem:[%s2283_s1 + $0x300] ss:$8 sps:$4 sm:$0xff]   ;;  %v1620_v9 = vld [vmem:[%s2283_s1 + $0x314] ss:$8 sps:$4 sm:$0xff]   ;;  %v1618_v11 = vld [vmem:[%s2283_s1 + $0x310] ss:$8 sps:$4 sm:$0xff]  }
  0x1b   :  { %1016 = vmatpush1.bf16.msra.mxu1 %v1547_v26  ;;  %v1623_v12 = vld [vmem:[%s2283_s1 + $0x124] ss:$8 sps:$4 sm:$0xff]   ;;  %v1621_v14 = vld [vmem:[%s2283_s1 + $0x120] ss:$8 sps:$4 sm:$0xff]   ;;  %v1629_v16 = vld [vmem:[%s2283_s1 + $0x134] ss:$8 sps:$4 sm:$0xff]  }
  0x1c   :  { %1122 = vmatpush1.bf16.msra.mxu0 %v1548_v27  ;;  %1017 = vmatprep.subr.bf16.mxu1 %v1549_v28  ;;  %v1626_v13 = vld [vmem:[%s2283_s1 + $0x324] ss:$8 sps:$4 sm:$0xff]   ;;  %v1624_v15 = vld [vmem:[%s2283_s1 + $0x320] ss:$8 sps:$4 sm:$0xff]   ;;  %v1632_v17 = vld [vmem:[%s2283_s1 + $0x334] ss:$8 sps:$4 sm:$0xff]  }
  0x1d   :  { %1123 = vmatprep.subr.bf16.mxu0 %v1551_v29  ;;  %v1627_v18 = vld [vmem:[%s2283_s1 + $0x130] ss:$8 sps:$4 sm:$0xff]   ;;  %v1635_v20 = vld [vmem:[%s2283_s1 + $0x144] ss:$8 sps:$4 sm:$0xff]   ;;  %v1633_v22 = vld [vmem:[%s2283_s1 + $0x140] ss:$8 sps:$4 sm:$0xff]  }
  0x1e   :  { %v1630_v19 = vld [vmem:[%s2283_s1 + $0x330] ss:$8 sps:$4 sm:$0xff]   ;;  %v1638_v21 = vld [vmem:[%s2283_s1 + $0x344] ss:$8 sps:$4 sm:$0xff]   ;;  %v1636_v23 = vld [vmem:[%s2283_s1 + $0x340] ss:$8 sps:$4 sm:$0xff]  }
  0x1f   :  { %1018 = vmatpush1.bf16.msra.mxu1 %v1553_v30  ;;  %v1641_v24 = vld [vmem:[%s2283_s1 + $0x154] ss:$8 sps:$4 sm:$0xff]   ;;  %v1639_v26 = vld [vmem:[%s2283_s1 + $0x150] ss:$8 sps:$4 sm:$0xff]   ;;  %v1647_v28 = vld [vmem:[%s2283_s1 + $0x164] ss:$8 sps:$4 sm:$0xff]  }
  0x20   :  { %1124 = vmatpush1.bf16.msra.mxu0 %v1554_v31  ;;  %1019 = vmatprep.subr.bf16.mxu1 %v1555_v32  ;;  %v1644_v25 = vld [vmem:[%s2283_s1 + $0x354] ss:$8 sps:$4 sm:$0xff]   ;;  %v1642_v27 = vld [vmem:[%s2283_s1 + $0x350] ss:$8 sps:$4 sm:$0xff]   ;;  %v1697_v31 = vld [vmem:[%s2284_s0 + $0x48] ss:$36 sps:$4 sm:$0xff]  }
  0x21   :  { %1125 = vmatprep.subr.bf16.mxu0 %v1557_v33  ;;  %v1693_v29 = vld [vmem:[%s2284_s0 + $0x4c] ss:$36 sps:$4 sm:$0xff]   ;;  %v1695_v30 = vld [vmem:[%s2284_s0 + $0x5c] ss:$36 sps:$4 sm:$0xff]  }
  0x22   :  { %v1650_v32 = vld [vmem:[%s2283_s1 + $0x364] ss:$8 sps:$4 sm:$0xff]   ;;  %v1701_v33 = vld [vmem:[%s2284_s0 + $0x58] ss:$36 sps:$4 sm:$0xff]  }
  0x23   :  { %1020 = vmatpush1.bf16.msra.mxu1 %v1559_v34  ;;  %v1645_v34 = vld [vmem:[%s2283_s1 + $0x160] ss:$8 sps:$4 sm:$0xff]   ;;  %v1663_v48 = vld [vmem:[%s2283_s1 + $0x190] ss:$8 sps:$4 sm:$0xff]   ;;  %v1674_v51 = vld [vmem:[%s2283_s1 + $0x3a4] ss:$8 sps:$4 sm:$0xff]  }
  0x24   :  { %1126 = vmatpush1.bf16.msra.mxu0 %v1560_v35  ;;  %1021 = vmatprep.subr.bf16.mxu1 %v1561_v36  ;;  %v1648_v35 = vld [vmem:[%s2283_s1 + $0x360] ss:$8 sps:$4 sm:$0xff]   ;;  %v1653_v36 = vld [vmem:[%s2283_s1 + $0x174] ss:$8 sps:$4 sm:$0xff]  }
  0x25   :  { %1127 = vmatprep.subr.bf16.mxu0 %v1563_v37  ;;  %v1656_v37 = vld [vmem:[%s2283_s1 + $0x374] ss:$8 sps:$4 sm:$0xff]  }
  0x27   :  { %1022 = vmatpush1.bf16.msra.mxu1 %v1565_v38  ;;  %v1651_v38 = vld [vmem:[%s2283_s1 + $0x170] ss:$8 sps:$4 sm:$0xff]  }
  0x28   :  { %1128 = vmatpush1.bf16.msra.mxu0 %v1566_v39  ;;  %1023 = vmatprep.subr.bf16.mxu1 %v1567_v40  ;;  %v1654_v39 = vld [vmem:[%s2283_s1 + $0x370] ss:$8 sps:$4 sm:$0xff]   ;;  %v1659_v40 = vld [vmem:[%s2283_s1 + $0x184] ss:$8 sps:$4 sm:$0xff]  }
  0x29   :  { %1129 = vmatprep.subr.bf16.mxu0 %v1569_v41  ;;  %v1713_v41 = vld [vmem:[%s2284_s0 + $0xc] ss:$36 sps:$4 sm:$0xff]  }
  0x2b   :  { %1024 = vmatpush1.bf16.msra.mxu1 %v1571_v42  ;;  %v1662_v42 = vld [vmem:[%s2283_s1 + $0x384] ss:$8 sps:$4 sm:$0xff]  }
  0x2c   :  { %1130 = vmatpush1.bf16.msra.mxu0 %v1572_v43  ;;  %1025 = vmatprep.subr.bf16.mxu1 %v1573_v44  ;;  %v1716_v43 = vld [vmem:[%s2284_s0 + $0x1c] ss:$36 sps:$4 sm:$0xff]  }
  0x2d   :  { %1131 = vmatprep.subr.bf16.mxu0 %v1575_v45  ;;  %v1657_v44 = vld [vmem:[%s2283_s1 + $0x180] ss:$8 sps:$4 sm:$0xff]  }
  0x2e   :  { %v1660_v45 = vld [vmem:[%s2283_s1 + $0x380] ss:$8 sps:$4 sm:$0xff]  }
  0x2f   :  { %1026 = vmatpush1.bf16.msra.mxu1 %v1577_v46  ;;  %v1665_v46 = vld [vmem:[%s2283_s1 + $0x194] ss:$8 sps:$4 sm:$0xff]  }
  0x30   :  { %1132 = vmatpush1.bf16.msra.mxu0 %v1578_v47  ;;  %1027 = vmatprep.subr.bf16.mxu1 %v1579_v49  ;;  %v1668_v47 = vld [vmem:[%s2283_s1 + $0x394] ss:$8 sps:$4 sm:$0xff]   ;;  %v1666_v49 = vld [vmem:[%s2283_s1 + $0x390] ss:$8 sps:$4 sm:$0xff]  }
  0x31   :  { %1133 = vmatprep.subr.bf16.mxu0 %v1581_v50  ;;  %v1671_v50 = vld [vmem:[%s2283_s1 + $0x1a4] ss:$8 sps:$4 sm:$0xff]  }
  0x33   :  { %1028 = vmatpush1.bf16.msra.mxu1 %v1583_v52  ;;  %v1669_v52 = vld [vmem:[%s2283_s1 + $0x1a0] ss:$8 sps:$4 sm:$0xff]  }
  0x34   :  { %1134 = vmatpush1.bf16.msra.mxu0 %v1584_v53  ;;  %1029 = vmatprep.subr.bf16.mxu1 %v1585_v54  ;;  %v1672_v53 = vld [vmem:[%s2283_s1 + $0x3a0] ss:$8 sps:$4 sm:$0xff]   ;;  %v1677_v54 = vld [vmem:[%s2283_s1 + $0x1b4] ss:$8 sps:$4 sm:$0xff]  }
  0x35   :  { %1135 = vmatprep.subr.bf16.mxu0 %v1587_v55  ;;  %v1680_v55 = vld [vmem:[%s2283_s1 + $0x3b4] ss:$8 sps:$4 sm:$0xff]  }
  0x37   :  { %1030 = vmatpush1.bf16.msra.mxu1 %v1589_v56  ;;  %v1675_v56 = vld [vmem:[%s2283_s1 + $0x1b0] ss:$8 sps:$4 sm:$0xff]  }
  0x38   :  { %1136 = vmatpush1.bf16.msra.mxu0 %v1590_v57  ;;  %1031 = vmatprep.subr.bf16.mxu1 %v1591_v58  ;;  %v1678_v57 = vld [vmem:[%s2283_s1 + $0x3b0] ss:$8 sps:$4 sm:$0xff]   ;;  %v1683_v58 = vld [vmem:[%s2283_s1 + $0x1c4] ss:$8 sps:$4 sm:$0xff]  }
  0x39   :  { %1137 = vmatprep.subr.bf16.mxu0 %v1593_v59  ;;  %v1686_v59 = vld [vmem:[%s2283_s1 + $0x3c4] ss:$8 sps:$4 sm:$0xff]  }
  0x3b   :  { %1032 = vmatpush1.bf16.msra.mxu1 %v1595_v60  ;;  %v1681_v60 = vld [vmem:[%s2283_s1 + $0x1c0] ss:$8 sps:$4 sm:$0xff]  }
  0x3c   :  { %1138 = vmatpush1.bf16.msra.mxu0 %v1596_v61  ;;  %1033 = vmatprep.subr.bf16.mxu1 %v1597_v62  ;;  %v1684_v61 = vld [vmem:[%s2283_s1 + $0x3c0] ss:$8 sps:$4 sm:$0xff]   ;;  %v1689_v62 = vld [vmem:[%s2283_s1 + $0x1d4] ss:$8 sps:$4 sm:$0xff]  }
  0x3d   :  { %1139 = vmatprep.subr.bf16.mxu0 %v1599_v63  ;;  %v1692_v63 = vld [vmem:[%s2283_s1 + $0x3d4] ss:$8 sps:$4 sm:$0xff]  }
  0x3f   :  { %1034 = vmatpush1.bf16.msra.mxu1 %v1601_v0  ;;  %v1687_v0 = vld [vmem:[%s2283_s1 + $0x1d0] ss:$8 sps:$4 sm:$0xff]  }
  0x40   :  { %1140 = vmatpush1.bf16.msra.mxu0 %v1602_v1  ;;  %1056 = vmatprep.subr.bf16.mxu1 %v1608_v2  ;;  %v1690_v1 = vld [vmem:[%s2283_s1 + $0x3d0] ss:$8 sps:$4 sm:$0xff]   ;;  %v1700_v2 = vld [vmem:[%s2283_s1 + $0x1e4] ss:$8 sps:$4 sm:$0xff]  }
  0x41   :  { %1162 = vmatprep.subr.bf16.mxu0 %v1614_v3  ;;  %v1704_v3 = vld [vmem:[%s2283_s1 + $0x3e4] ss:$8 sps:$4 sm:$0xff]  }
  0x42   :  { %1036 = vmatmul.mubr.bf16.vlgmr.msra.gmra.mrb[0].mxu1 %v1603_v4  ;;  %v1698_v4 = vld [vmem:[%s2283_s1 + $0x1e0] ss:$8 sps:$4 sm:$0xff]  }
  0x43   :  { %1142 = vmatmul.mubr.bf16.vlgmr.msra.gmra.mrb[0].mxu0 %v1609_v6  ;;  %1057 = vmatpush1.bf16.msra.mxu1 %v1606_v5  ;;  %v1702_v5 = vld [vmem:[%s2283_s1 + $0x3e0] ss:$8 sps:$4 sm:$0xff]   ;;  %v1707_v6 = vld [vmem:[%s2283_s1 + $0x1f4] ss:$8 sps:$4 sm:$0xff]  }
  0x44   :  { %1163 = vmatpush1.bf16.msra.mxu0 %v1612_v7  ;;  %1058 = vmatprep.subr.bf16.mxu1 %v1617_v8  ;;  %v1710_v7 = vld [vmem:[%s2283_s1 + $0x3f4] ss:$8 sps:$4 sm:$0xff]   ;;  %v1705_v8 = vld [vmem:[%s2283_s1 + $0x1f0] ss:$8 sps:$4 sm:$0xff]  }
  0x45   :  { %1164 = vmatprep.subr.bf16.mxu0 %v1620_v9  ;;  %1045 = vmatprep.mubr.bf16.mxu1 %v1693_v29  ;;  %v1708_v9 = vld [vmem:[%s2283_s1 + $0x3f0] ss:$8 sps:$4 sm:$0xff]   ;;  %v1743_v29 = vld [vmem:[%s2283_s1 + $0x464] ss:$8 sps:$4 sm:$0xff]  }
  0x46   :  { %1151 = vmatprep.mubr.bf16.mxu0 %v1695_v30  ;;  %v1741_v30 = vld [vmem:[%s2283_s1 + $0x460] ss:$8 sps:$4 sm:$0xff]  }
  0x47   :  { %1059 = vmatpush1.bf16.msra.mxu1 %v1615_v10  ;;  %v1719_v10 = vld [vmem:[%s2283_s1 + $0x404] ss:$8 sps:$4 sm:$0xff]  }
  0x48   :  { %1165 = vmatpush1.bf16.msra.mxu0 %v1618_v11  ;;  %1060 = vmatprep.subr.bf16.mxu1 %v1623_v12  ;;  %v1711_v11 = vld [vmem:[%s2284_s0 + $0x8] ss:$36 sps:$4 sm:$0xff]   ;;  %v1714_v12 = vld [vmem:[%s2284_s0 + $0x18] ss:$36 sps:$4 sm:$0xff]  }
  0x49   :  { %1166 = vmatprep.subr.bf16.mxu0 %v1626_v13  ;;  %v1717_v13 = vld [vmem:[%s2283_s1 + $0x400] ss:$8 sps:$4 sm:$0xff]  }
  0x4a   :  { %1046 = vmatmul.mubr.bf16.gmra.mrb[4].mxu1 %v1697_v31  ;;  %v1746_v31 = vld [vmem:[%s2283_s1 + $0x474] ss:$8 sps:$4 sm:$0xff]  }
  0x4b   :  { %1061 = vmatpush1.bf16.msra.mxu1 %v1621_v14  ;;  %1152 = vmatmul.mubr.bf16.gmra.mrb[4].mxu0 %v1701_v33  ;;  %v1722_v14 = vld [vmem:[%s2283_s1 + $0x414] ss:$8 sps:$4 sm:$0xff]   ;;  %v1747_v33 = vld [vmem:[%s2284_s0 + $0x20] ss:$36 sps:$4 sm:$0xff]  }
  0x4c   :  { %1167 = vmatpush1.bf16.msra.mxu0 %v1624_v15  ;;  %1062 = vmatprep.subr.bf16.mxu1 %v1629_v16  ;;  %v1723_v15 = vld [vmem:[%s2284_s0 + $0x54] ss:$36 sps:$4 sm:$0xff]   ;;  %v1725_v16 = vld [vmem:[%s2284_s0 + $0x64] ss:$36 sps:$4 sm:$0xff]  }
  0x4d   :  { %1168 = vmatprep.subr.bf16.mxu0 %v1632_v17  ;;  %1088 = vmatprep.mubr.bf16.mxu1 %v1713_v41  ;;  %v1720_v17 = vld [vmem:[%s2283_s1 + $0x410] ss:$8 sps:$4 sm:$0xff]  }
  0x4e   :  { %1194 = vmatprep.mubr.bf16.mxu0 %v1716_v43 }
  0x4f   :  { %1063 = vmatpush1.bf16.msra.mxu1 %v1627_v18  ;;  %v1731_v18 = vld [vmem:[%s2283_s1 + $0x424] ss:$8 sps:$4 sm:$0xff]  }
  0x50   :  { %1169 = vmatpush1.bf16.msra.mxu0 %v1630_v19  ;;  %1064 = vmatprep.subr.bf16.mxu1 %v1635_v20  ;;  %v1727_v19 = vld [vmem:[%s2284_s0 + $0x50] ss:$36 sps:$4 sm:$0xff]   ;;  %v1728_v20 = vld [vmem:[%s2284_s0 + $0x60] ss:$36 sps:$4 sm:$0xff]  }
  0x51   :  { %1170 = vmatprep.subr.bf16.mxu0 %v1638_v21  ;;  %v1729_v21 = vld [vmem:[%s2283_s1 + $0x420] ss:$8 sps:$4 sm:$0xff]  }
  0x53   :  { %1065 = vmatpush1.bf16.msra.mxu1 %v1633_v22  ;;  %v1734_v22 = vld [vmem:[%s2283_s1 + $0x434] ss:$8 sps:$4 sm:$0xff]  }
  0x54   :  { %1171 = vmatpush1.bf16.msra.mxu0 %v1636_v23  ;;  %1066 = vmatprep.subr.bf16.mxu1 %v1641_v24  ;;  %v1732_v23 = vld [vmem:[%s2283_s1 + $0x430] ss:$8 sps:$4 sm:$0xff]   ;;  %v1737_v24 = vld [vmem:[%s2283_s1 + $0x444] ss:$8 sps:$4 sm:$0xff]  }
  0x55   :  { %1172 = vmatprep.subr.bf16.mxu0 %v1644_v25  ;;  %v1749_v25 = vmov 0  }
  0x57   :  { %1067 = vmatpush1.bf16.msra.mxu1 %v1639_v26  ;;  %v1735_v26 = vld [vmem:[%s2283_s1 + $0x440] ss:$8 sps:$4 sm:$0xff]  }
  0x58   :  { %1173 = vmatpush1.bf16.msra.mxu0 %v1642_v27  ;;  %1068 = vmatprep.subr.bf16.mxu1 %v1647_v28  ;;  %v1740_v27 = vld [vmem:[%s2283_s1 + $0x454] ss:$8 sps:$4 sm:$0xff]   ;;  %v1738_v28 = vld [vmem:[%s2283_s1 + $0x450] ss:$8 sps:$4 sm:$0xff]  }
  0x59   :  { %1174 = vmatprep.subr.bf16.mxu0 %v1650_v32  ;;  %v1744_v32 = vld [vmem:[%s2283_s1 + $0x470] ss:$8 sps:$4 sm:$0xff]  }
  0x5b   :  { %1069 = vmatpush1.bf16.msra.mxu1 %v1645_v34  ;;  %v1748_v34 = vld [vmem:[%s2284_s0 + $0x68] ss:$36 sps:$4 sm:$0xff]  }
  0x5c   :  { %1175 = vmatpush1.bf16.msra.mxu0 %v1648_v35  ;;  %1070 = vmatprep.subr.bf16.mxu1 %v1653_v36  ;;  %v181_v35 = vlaneseq }
  0x5d   :  { %1176 = vmatprep.subr.bf16.mxu0 %v1656_v37 }
  0x5e   :  { %v182_v36 = vshrl.u32 %v181_v35, 7 }
  0x5f   :  { %1071 = vmatpush1.bf16.msra.mxu1 %v1651_v38 }
  0x60   :  { %1177 = vmatpush1.bf16.msra.mxu0 %v1654_v39  ;;  %1072 = vmatprep.subr.bf16.mxu1 %v1659_v40  ;;  %v183_v40 = vsub.s32 0, %v182_v36  ;;  %v187_v43 = vsub.s32 1, %v182_v36 }
  0x61   :  { %1178 = vmatprep.subr.bf16.mxu0 %v1662_v42  ;;  %v179_v42 = vld [vmem:[%s2285_s2] sm:$0x3] }
  0x63   :  { %1073 = vmatpush1.bf16.msra.mxu1 %v1657_v44  ;;  %v184_v44 = vrot.slane %v179_v42, %v183_v40 }
  0x64   :  { %1179 = vmatpush1.bf16.msra.mxu0 %v1660_v45  ;;  %1074 = vmatprep.subr.bf16.mxu1 %v1665_v46  ;;  %v188_v45 = vrot.slane %v179_v42, %v187_v43 }
  0x65   :  { %1180 = vmatprep.subr.bf16.mxu0 %v1668_v47 }
  0x67   :  { %1075 = vmatpush1.bf16.msra.mxu1 %v1663_v48 }
  0x68   :  { %1181 = vmatpush1.bf16.msra.mxu0 %v1666_v49  ;;  %1076 = vmatprep.subr.bf16.mxu1 %v1671_v50 }
  0x69   :  { %1182 = vmatprep.subr.bf16.mxu0 %v1674_v51 }
  0x6b   :  { %1077 = vmatpush1.bf16.msra.mxu1 %v1669_v52 }
  0x6c   :  { %1183 = vmatpush1.bf16.msra.mxu0 %v1672_v53  ;;  %1078 = vmatprep.subr.bf16.mxu1 %v1677_v54 }
  0x6d   :  { %1184 = vmatprep.subr.bf16.mxu0 %v1680_v55 }
  0x6f   :  { %1079 = vmatpush1.bf16.msra.mxu1 %v1675_v56 }
  0x70   :  { %1185 = vmatpush1.bf16.msra.mxu0 %v1678_v57  ;;  %1080 = vmatprep.subr.bf16.mxu1 %v1683_v58 }
  0x71   :  { %1186 = vmatprep.subr.bf16.mxu0 %v1686_v59 }
  0x73   :  { %1081 = vmatpush1.bf16.msra.mxu1 %v1681_v60 }
  0x74   :  { %1187 = vmatpush1.bf16.msra.mxu0 %v1684_v61  ;;  %1082 = vmatprep.subr.bf16.mxu1 %v1689_v62 }
  0x75   :  { %1188 = vmatprep.subr.bf16.mxu0 %v1692_v63 }
  0x77   :  { %1083 = vmatpush1.bf16.msra.mxu1 %v1687_v0 }
  0x78   :  { %1189 = vmatpush1.bf16.msra.mxu0 %v1690_v1  ;;  %1084 = vmatprep.subr.bf16.mxu1 %v1700_v2 }
  0x79   :  { %1190 = vmatprep.subr.bf16.mxu0 %v1704_v3 }
  0x7b   :  { %1085 = vmatpush1.bf16.msra.mxu1 %v1698_v4 }
  0x7c   :  { %1191 = vmatpush1.bf16.msra.mxu0 %v1702_v5  ;;  %1086 = vmatprep.subr.bf16.mxu1 %v1707_v6 }
  0x7d   :  { %1192 = vmatprep.subr.bf16.mxu0 %v1710_v7 }
  0x7f   :  { %1087 = vmatpush1.bf16.msra.mxu1 %v1705_v8 }
  0x80   :  { %1193 = vmatpush1.bf16.msra.mxu0 %v1708_v9  ;;  %1450 = vmatprep.subr.bf16.mxu1 %v1719_v10 }
  0x81   :  { %1215 = vmatprep.subr.bf16.mxu0 %v1719_v10 }
  0x82   :  { %1089 = vmatmul.mubr.bf16.vlgmr.msra.gmra.mrb[0].mxu1 %v1711_v11 }
  0x83   :  { %1195 = vmatmul.mubr.bf16.vlgmr.msra.gmra.mrb[0].mxu0 %v1714_v12  ;;  %1458 = vmatpush1.bf16.msra.mxu1 %v1717_v13 }
  0x84   :  { %1216 = vmatpush1.bf16.msra.mxu0 %v1717_v13  ;;  %1451 = vmatprep.subr.bf16.mxu1 %v1722_v14 }
  0x85   :  { %1217 = vmatprep.subr.bf16.mxu0 %v1722_v14  ;;  %1098 = vmatprep.mubr.bf16.mxu1 %v1723_v15 }
  0x86   :  { %1204 = vmatprep.mubr.bf16.mxu0 %v1725_v16 }
  0x87   :  { %1459 = vmatpush1.bf16.msra.mxu1 %v1720_v17 }
  0x88   :  { %1218 = vmatpush1.bf16.msra.mxu0 %v1720_v17  ;;  %1452 = vmatprep.subr.bf16.mxu1 %v1731_v18 }
  0x89   :  { %1219 = vmatprep.subr.bf16.mxu0 %v1731_v18 }
  0x8a   :  { %1099 = vmatmul.mubr.bf16.gmra.mrb[4].mxu1 %v1727_v19 }
  0x8b   :  { %1205 = vmatmul.mubr.bf16.gmra.mrb[4].mxu0 %v1728_v20  ;;  %1460 = vmatpush1.bf16.msra.mxu1 %v1729_v21 }
  0x8c   :  { %1220 = vmatpush1.bf16.msra.mxu0 %v1729_v21  ;;  %1453 = vmatprep.subr.bf16.mxu1 %v1734_v22 }
  0x8d   :  { %1221 = vmatprep.subr.bf16.mxu0 %v1734_v22  ;;  %1247 = vmatprep.mubr.bf16.mxu0 %v1749_v25 }
  0x8e   :  { %1257 = vmatprep.mubr.bf16.mxu1 %v1749_v25 }
  0x8f   :  { %1461 = vmatpush1.bf16.msra.mxu1 %v1732_v23 }
  0x90   :  { %1222 = vmatpush1.bf16.msra.mxu0 %v1732_v23  ;;  %1454 = vmatprep.subr.bf16.mxu1 %v1737_v24 }
  0x91   :  { %1223 = vmatprep.subr.bf16.mxu0 %v1737_v24 }
  0x93   :  { %1462 = vmatpush1.bf16.msra.mxu1 %v1735_v26 }
  0x94   :  { %1224 = vmatpush1.bf16.msra.mxu0 %v1735_v26  ;;  %1455 = vmatprep.subr.bf16.mxu1 %v1740_v27 }
  0x95   :  { %1225 = vmatprep.subr.bf16.mxu0 %v1740_v27 }
  0x97   :  { %1463 = vmatpush1.bf16.msra.mxu1 %v1738_v28 }
  0x98   :  { %1226 = vmatpush1.bf16.msra.mxu0 %v1738_v28  ;;  %1456 = vmatprep.subr.bf16.mxu1 %v1743_v29 }
  0x99   :  { %1227 = vmatprep.subr.bf16.mxu0 %v1743_v29 }
  0x9b   :  { %1464 = vmatpush1.bf16.msra.mxu1 %v1741_v30 }
  0x9c   :  { %1228 = vmatpush1.bf16.msra.mxu0 %v1741_v30  ;;  %1457 = vmatprep.subr.bf16.mxu1 %v1746_v31 }
  0x9d   :  { %1229 = vmatprep.subr.bf16.mxu0 %v1746_v31 }
  0x9f   :  { %1465 = vmatpush1.bf16.msra.mxu1 %v1744_v32 }
  0xa0   :  { %1230 = vmatpush1.bf16.msra.mxu0 %v1744_v32 }
  0xa2   :  { %1258 = vmatmul.mubr.bf16.vlgmr.msra.gmra.mrb[8].mxu1 %v1748_v34 }
  0xa3   :  { %1248 = vmatmul.mubr.bf16.vlgmr.msra.gmra.mrb[0].mxu0 %v1747_v33 }
 0x155   :  { %v1090_v37 = vpop.f32.mrb[0].mxu1 }
 0x156   :  { %v1092_v38 = vpop.f32.mrb[1].mxu1  ;;  %v1466_v62 = vadd.f32 %v1090_v37, %v184_v44 }
 0x157   :  { %v1094_v39 = vpop.f32.mrb[2].mxu1  ;;  %v1468_v63 = vadd.f32 %v1092_v38, %v188_v45 }
 0x158   :  { %v1096_v41 = vpop.f32.mrb[3].mxu1  ;;  %v1470_v2 = vadd.f32 %v1094_v39, %v184_v44 }
 0x159   :  { %v1472_v7 = vadd.f32 %v1096_v41, %v188_v45 }
 0x15d   :  { %v1100_v46 = vpop.f32.mrb[4].mxu1 }
 0x15e   :  { %v1206_v47 = vpop.f32.mrb[4].mxu0  ;;  %v1474_v48 = vadd.f32 %v1100_v46, %v184_v44  ;;  %v1102_v49 = vpop.f32.mrb[5].mxu1 }
 0x15f   :  { %v1208_v50 = vpop.f32.mrb[5].mxu0  ;;  %v1477_v51 = vadd.f32 %v1102_v49, %v188_v45  ;;  %v1104_v52 = vpop.f32.mrb[6].mxu1 }
 0x160   :  { %v1210_v53 = vpop.f32.mrb[6].mxu0  ;;  %v1475_v54 = vadd.f32 %v1474_v48, %v1206_v47  ;;  %v1480_v55 = vadd.f32 %v1104_v52, %v184_v44  ;;  %v1106_v56 = vpop.f32.mrb[7].mxu1 }
 0x161   :  { %v1212_v57 = vpop.f32.mrb[7].mxu0  ;;  %v1478_v58 = vadd.f32 %v1477_v51, %v1208_v50  ;;  %v1483_v59 = vadd.f32 %v1106_v56, %v188_v45 }
 0x162   :  { %v1481_v60 = vadd.f32 %v1480_v55, %v1210_v53 }
 0x163   :  { %v1484_v61 = vadd.f32 %v1483_v59, %v1212_v57 }
 0x175   :  { %v1259_v1 = vpop.f32.mrb[8].mxu1 }
 0x176   :  { %v1249_v0 = vpop.f32.mrb[0].mxu0  ;;  %v1476_v4 = vadd.f32 %v1475_v54, %v1259_v1  ;;  %v1261_v6 = vpop.f32.mrb[9].mxu1 }
 0x177   :  { %v1467_v3 = vadd.f32 %v1466_v62, %v1249_v0  ;;  %v1251_v5 = vpop.f32.mrb[1].mxu0  ;;  %v1479_v9 = vadd.f32 %v1478_v58, %v1261_v6  ;;  %v1263_v11 = vpop.f32.mrb[10].mxu1 }
 0x178   :  { %v1469_v8 = vadd.f32 %v1468_v63, %v1251_v5  ;;  %v1253_v10 = vpop.f32.mrb[2].mxu0  ;;  %v1272_v13 = vmax.f32 %v1476_v4, 0.0  ;;  %v1482_v15 = vadd.f32 %v1481_v60, %v1263_v11  ;;  %v1265_v17 = vpop.f32.mrb[11].mxu1 }
 0x179   :  { %v1268_v12 = vmax.f32 %v1467_v3, 0.0  ;;  %v1471_v14 = vadd.f32 %v1470_v2, %v1253_v10  ;;  %v1255_v16 = vpop.f32.mrb[3].mxu0  ;;  %v1273_v19 = vmax.f32 %v1479_v9, 0.0  ;;  %v1485_v21 = vadd.f32 %v1484_v61, %v1265_v17 }
 0x17a   :  { %v1269_v18 = vmax.f32 %v1469_v8, 0.0  ;;  %v1473_v20 = vadd.f32 %v1472_v7, %v1255_v16  ;;  %1280 = vst [vmem:[%s2286_s3 + $0x20] sm:$0xff] %v1272_v13  ;;  %v1274_v23 = vmax.f32 %v1482_v15, 0.0 }
 0x17b   :  { %1276 = vst [vmem:[%s2286_s3] sm:$0xff] %v1268_v12  ;;  %v1270_v22 = vmax.f32 %v1471_v14, 0.0  ;;  %1281 = vst [vmem:[%s2286_s3 + $0x28] sm:$0xff] %v1273_v19  ;;  %v1275_v25 = vmax.f32 %v1485_v21, 0.0 }
 0x17c   :  { %1277 = vst [vmem:[%s2286_s3 + $0x8] sm:$0xff] %v1269_v18  ;;  %v1271_v24 = vmax.f32 %v1473_v20, 0.0  ;;  %1282 = vst [vmem:[%s2286_s3 + $0x30] sm:$0xff] %v1274_v23 }
 0x17d   :  { %1278 = vst [vmem:[%s2286_s3 + $0x10] sm:$0xff] %v1270_v22  ;;  %1283 = vst [vmem:[%s2286_s3 + $0x38] sm:$0xff] %v1275_v25 }
 0x17e   :  { %1279 = vst [vmem:[%s2286_s3 + $0x18] sm:$0xff] %v1271_v24 }

// kernel: net_forward.13
= control target key start
LH: loop header
LB: loop body
LE: loop exit
PB: predicated region body
PF: predicated region fallthrough
CT: control target
= control target key end

     0   :  { %v608_v1 = vmov 0.0   ;;  %vm35_vm0 = vcmask 1043456   ;;  %vm120_vm1 = vcmask 1041409   ;;  %vm609_vm2 = vmmov 0   ;;  %s770_s1 = inlined_call_operand.vmem [shape: bf16[256,128], index: 1, kind: input, shape index: {}]   ;;  %s771_s0 = inlined_call_operand.vmem [shape: f32[2,4,256], index: 0, kind: input, shape index: {}]   ;;  %s772_s3 = inlined_call_operand.vmem [shape: bf16[128,64], index: 3, kind: input, shape index: {}]   ;;  %s773_s5 = inlined_call_operand.vmem [shape: bf16[64,128], index: 5, kind: input, shape index: {}]   ;;  %s774_s2 = inlined_call_operand.vmem [shape: f32[1,128], index: 2, kind: input, shape index: {}]   ;;  %s775_s4 = inlined_call_operand.vmem [shape: f32[1,64], index: 4, kind: input, shape index: {}]   ;;  %s776_s6 = inlined_call_operand.vmem [shape: f32[1,128], index: 6, kind: input, shape index: {}]   ;;  %s777_s7 = inlined_call_operand.vmem [shape: f32[2,128], index: 7, kind: output, shape index: {}]  }
   0x1   :  { %v574_v0 = vld [vmem:[%s770_s1 + $0x40] sm:$0xff]   ;;  %540 = vmatprep.subr.bf16.mxu1 %v608_v1  ;;  %v576_v3 = vld [vmem:[%s770_s1 + $0x48] sm:$0xff]   ;;  %v578_v5 = vld [vmem:[%s770_s1 + $0x50] sm:$0xff]   ;;  %556 = vmatprep.mubr.msk.bf16.mxu1 %vm609_vm2, %v608_v1  ;;  %vm417_vm3 = vcmask 523264  }
   0x2   :  { %v575_v2 = vld [vmem:[%s770_s1] sm:$0xff]   ;;  %504 = vmatprep.subr.bf16.mxu0 %v574_v0  ;;  %v577_v4 = vld [vmem:[%s770_s1 + $0x8] sm:$0xff]   ;;  %v579_v6 = vld [vmem:[%s770_s1 + $0x10] sm:$0xff]  }
   0x3   :  { %505 = vmatpush3.bf16.msra.mxu0 %v575_v2  ;;  %v580_v7 = vld [vmem:[%s770_s1 + $0x58] sm:$0xff]   ;;  %v582_v9 = vld [vmem:[%s770_s1 + $0x60] sm:$0xff]   ;;  %v584_v11 = vld [vmem:[%s770_s1 + $0x68] sm:$0xff]  }
   0x4   :  { %506 = vmatprep.subr.bf16.mxu0 %v576_v3  ;;  %v581_v8 = vld [vmem:[%s770_s1 + $0x18] sm:$0xff]   ;;  %v583_v10 = vld [vmem:[%s770_s1 + $0x20] sm:$0xff]   ;;  %v28_v13 = vld [vmem:[%s771_s0 + $0x8] sm:$0xff] }
   0x5   :  { %v27_v12 = vld [vmem:[%s771_s0] sm:$0xff]  ;;  %v585_v14 = vld [vmem:[%s770_s1 + $0x28] sm:$0xff]   ;;  %v32_v16 = vcombine.high %v28_v13, %v28_v13  ;;  %v50_v18 = vsel %vm35_vm0, %v28_v13, 0.0  ;;  %v586_v25 = vld [vmem:[%s770_s1 + $0x70] sm:$0xff]  }
   0x6   :  { %v31_v15 = vcombine.high %v27_v12, %v27_v12  ;;  %v36_v17 = vsel %vm35_vm0, %v27_v12, 0.0  ;;  %v592_v19 = vld [vmem:[%s772_s3] sm:$0xff]   ;;  %v593_v20 = vld [vmem:[%s772_s3 + $0x8] sm:$0xff]   ;;  %v51_v22 = vrot.slane %v50_v18, 4  ;;  %v587_v30 = vld [vmem:[%s770_s1 + $0x30] sm:$0xff]  }
   0x7   :  { %507 = vmatpush3.bf16.msra.mxu0 %v577_v4  ;;  %v37_v21 = vrot.slane %v36_v17, 4  ;;  %v57_v24 = vsel %vm35_vm0, %v32_v16, 0.0  ;;  %541 = vmatpush3.bf16.msra.mxu1 %v592_v19  ;;  %v588_v31 = vld [vmem:[%s770_s1 + $0x78] sm:$0xff]   ;;  %v594_v36 = vld [vmem:[%s772_s3 + $0x10] sm:$0xff]   ;;  %v596_v55 = vld [vmem:[%s772_s3 + $0x20] sm:$0xff]  }
   0x8   :  { %508 = vmatprep.subr.bf16.mxu0 %v578_v5  ;;  %v43_v23 = vsel %vm35_vm0, %v31_v15, 0.0  ;;  %v58_v27 = vrot.slane %v57_v24, 4  ;;  %v52_v29 = vadd.f32 %v51_v22, %v50_v18  ;;  %542 = vmatprep.subr.bf16.mxu1 %v608_v1  ;;  %v589_v45 = vld [vmem:[%s770_s1 + $0x38] sm:$0xff]   ;;  %v597_v0 = vld [vmem:[%s772_s3 + $0x28] sm:$0xff]   ;;  %v472_v13 = vld [vmem:[%s774_s2] ss:$0 sm:$0xff] }
   0x9   :  { %v44_v26 = vrot.slane %v43_v23, 4  ;;  %v38_v28 = vadd.f32 %v37_v21, %v36_v17  ;;  %v595_v46 = vld [vmem:[%s772_s3 + $0x18] sm:$0xff]   ;;  %v602_v21 = vld [vmem:[%s773_s5 + $0x10] sm:$0xff]  }
   0xa   :  { %v59_v33 = vadd.f32 %v58_v27, %v57_v24  ;;  %v53_v35 = vrot.slane %v52_v29, 2  ;;  %v603_v22 = vld [vmem:[%s773_s5 + $0x18] sm:$0xff]  }
   0xb   :  { %509 = vmatpush3.bf16.msra.mxu0 %v579_v6  ;;  %v45_v32 = vadd.f32 %v44_v26, %v43_v23  ;;  %v39_v34 = vrot.slane %v38_v28, 2  ;;  %543 = vmatpush3.bf16.msra.mxu1 %v593_v20  ;;  %v489_v23 = vld [vmem:[%s775_s4] ss:$0 sm:$0xff] }
   0xc   :  { %510 = vmatprep.subr.bf16.mxu0 %v580_v7  ;;  %v60_v38 = vrot.slane %v59_v33, 2  ;;  %v54_v40 = vadd.f32 %v53_v35, %v52_v29  ;;  %544 = vmatprep.subr.bf16.mxu1 %v608_v1 }
   0xd   :  { %v46_v37 = vrot.slane %v45_v32, 2  ;;  %v40_v39 = vadd.f32 %v39_v34, %v38_v28 }
   0xe   :  { %v61_v42 = vadd.f32 %v60_v38, %v59_v33  ;;  %v55_v44 = vrot.slane %v54_v40, 1 }
   0xf   :  { %511 = vmatpush3.bf16.msra.mxu0 %v581_v8  ;;  %v47_v41 = vadd.f32 %v46_v37, %v45_v32  ;;  %v41_v43 = vrot.slane %v40_v39, 1  ;;  %545 = vmatpush3.bf16.msra.mxu1 %v594_v36  ;;  %v598_v8 = vld [vmem:[%s772_s3 + $0x30] sm:$0xff]  }
  0x10   :  { %512 = vmatprep.subr.bf16.mxu0 %v582_v9  ;;  %v62_v48 = vrot.slane %v61_v42, 1  ;;  %v56_v50 = vadd.f32 %v55_v44, %v54_v40  ;;  %546 = vmatprep.subr.bf16.mxu1 %v608_v1  ;;  %v599_v9 = vld [vmem:[%s772_s3 + $0x38] sm:$0xff]  }
  0x11   :  { %v48_v47 = vrot.slane %v47_v41, 1  ;;  %v42_v49 = vadd.f32 %v41_v43, %v40_v39 }
  0x12   :  { %v63_v52 = vadd.f32 %v62_v48, %v61_v42  ;;  %v67_v54 = vmul.f32 0.25, %v56_v50 }
  0x13   :  { %513 = vmatpush3.bf16.msra.mxu0 %v583_v10  ;;  %v49_v51 = vadd.f32 %v48_v47, %v47_v41  ;;  %v65_v53 = vmul.f32 0.25, %v42_v49  ;;  %547 = vmatpush3.bf16.msra.mxu1 %v595_v46  ;;  %v600_v10 = vld [vmem:[%s773_s5] sm:$0xff]  }
  0x14   :  { %514 = vmatprep.subr.bf16.mxu0 %v584_v11  ;;  %v68_v57 = vmul.f32 0.25, %v63_v52  ;;  %v71_v59 = vpack.c.bf16 %v67_v54, %v67_v54  ;;  %548 = vmatprep.subr.bf16.mxu1 %v608_v1  ;;  %v601_v11 = vld [vmem:[%s773_s5 + $0x8] sm:$0xff]  }
  0x15   :  { %v66_v56 = vmul.f32 0.25, %v49_v51  ;;  %v69_v58 = vpack.c.bf16 %v65_v53, %v65_v53 }
  0x16   :  { %v72_v61 = vpack.c.bf16 %v68_v57, %v68_v57  ;;  %v118_v63 = vunpack.c.l.b16 %v71_v59 }
  0x17   :  { %515 = vmatpush3.bf16.msra.mxu0 %v585_v14  ;;  %v70_v60 = vpack.c.bf16 %v66_v56, %v66_v56  ;;  %v116_v62 = vunpack.c.l.b16 %v69_v58  ;;  %549 = vmatpush3.bf16.msra.mxu1 %v596_v55 }
  0x18   :  { %516 = vmatprep.subr.bf16.mxu0 %v586_v25  ;;  %v119_v3 = vunpack.c.l.b16 %v72_v61  ;;  %550 = vmatprep.subr.bf16.mxu1 %v608_v1 }
  0x19   :  { %v117_v2 = vunpack.c.l.b16 %v70_v60  ;;  %v121_v4 = vsel %vm120_vm1, %v118_v63, %v116_v62 }
  0x1a   :  { %v123_v6 = vpack.c.b16 %v121_v4, %v121_v4 }
  0x1b   :  { %517 = vmatpush3.bf16.msra.mxu0 %v587_v30  ;;  %v122_v5 = vsel %vm120_vm1, %v119_v3, %v117_v2  ;;  %551 = vmatpush3.bf16.msra.mxu1 %v597_v0 }
  0x1c   :  { %518 = vmatprep.subr.bf16.mxu0 %v588_v31  ;;  %v124_v7 = vpack.c.b16 %v122_v5, %v122_v5  ;;  %552 = vmatprep.subr.bf16.mxu1 %v608_v1 }
  0x1e   :  { %255 = vmatprep.mubr.bf16.mxu0 %v124_v7 }
  0x1f   :  { %519 = vmatpush3.bf16.msra.mxu0 %v589_v45  ;;  %553 = vmatpush3.bf16.msra.mxu1 %v598_v8 }
  0x20   :  { %560 = vmatprep.subr.bf16.mxu0 %v608_v1  ;;  %554 = vmatprep.subr.bf16.mxu1 %v608_v1 }
  0x22   :  { %256 = vmatmul.mubr.bf16.vlgmr.msra.gmra.mrb[0].mxu0 %v123_v6 }
  0x23   :  { %555 = vmatpush3.bf16.msra.mxu1 %v599_v9  ;;  %568 = vmatprep.mubr.msk.bf16.mxu0 %vm609_vm2, %v608_v1 }
  0x24   :  { %561 = vmatpush3.bf16.msra.mxu0 %v600_v10 }
  0x25   :  { %562 = vmatprep.subr.bf16.mxu0 %v608_v1 }
  0x28   :  { %563 = vmatpush3.bf16.msra.mxu0 %v601_v11 }
  0x29   :  { %564 = vmatprep.subr.bf16.mxu0 %v608_v1 }
  0x2c   :  { %565 = vmatpush3.bf16.msra.mxu0 %v602_v21 }
  0x2d   :  { %566 = vmatprep.subr.bf16.mxu0 %v608_v1  ;;  %v498_v1 = vld [vmem:[%s776_s6] ss:$0 sm:$0xff] }
  0x30   :  { %567 = vmatpush3.bf16.msra.mxu0 %v603_v22 }
  0xf5   :  { %v520_v12 = vpop.f32.mrb[0].mxu0 }
  0xf6   :  { %v521_v14 = vpop.f32.mrb[1].mxu0 }
  0xf7   :  { %v522_v15 = vadd.f32 %v521_v14, %v520_v12  ;;  %v523_v16 = vpop.f32.mrb[2].mxu0 }
  0xf8   :  { %v524_v17 = vpop.f32.mrb[3].mxu0 }
  0xf9   :  { %v258_v18 = vadd.f32 %v522_v15, %v472_v13 }
  0xfb   :  { %v263_v19 = vmax.f32 %v258_v18, 0.0 }
  0xfd   :  { %v264_v20 = vpack.c.bf16 %v263_v19, %v263_v19 }
  0xff   :  { %557 = vmatmul.mubr.bf16.vlgmr.msra.gmra.mrb[0].mxu1 %v264_v20 }
 0x1d2   :  { %v370_v24 = vpop.f32.mrb[0].mxu1 }
 0x1d3   :  { %v371_v25 = vadd.f32 %v489_v23, %v370_v24  ;;  %v558_v26 = vpop.f32.mrb[1].mxu1 }
 0x1d4   :  { %v373_v27 = vpop.f32.mrb[2].mxu1 }
 0x1d5   :  { %v376_v28 = vmax.f32 %v371_v25, 0.0  ;;  %v559_v29 = vpop.f32.mrb[3].mxu1 }
 0x1d7   :  { %v377_v30 = vpack.c.bf16 %v376_v28, %v376_v28 }
 0x1d9   :  { %569 = vmatmul.mubr.msk.bf16.vlgmr.msra.gmra.mrb[4].mxu0 %vm417_vm3, %v377_v30 }
 0x2ac   :  { %v455_v31 = vpop.f32.mrb[4].mxu0 }
 0x2ad   :  { %v456_v32 = vadd.f32 %v498_v1, %v455_v31  ;;  %v570_v33 = vpop.f32.mrb[5].mxu0 }
 0x2ae   :  { %v458_v34 = vpop.f32.mrb[6].mxu0 }
 0x2af   :  { %v461_v35 = vsub.f32 0.0, %v456_v32  ;;  %v571_v36 = vpop.f32.mrb[7].mxu0 }
 0x2b1   :  { %v462_v37 = vmul.f32 1.442695, %v461_v35 }
 0x2b3   :  { %604 = vpow2.f32 %v462_v37 }
 0x2bd   :  { %v605_v38 = vpop.eup %604 }
 0x2be   :  { %v464_v39 = vadd.f32 1.0, %v605_v38 }
 0x2c0   :  { %606 = vrcp.f32 %v464_v39 }
 0x2ca   :  { %v607_v40 = vpop.eup %606 }
 0x2cb   :  { %467 = vst [vmem:[%s777_s7] sm:$0x3] %v607_v40 }

</bundles_post_ra>
